<compile_context>
chip_gen: v7x
topology: tpu7x:2x2x1
jax: 0.10.0
libtpu: 0.0.40
codegen_flags: <defaults>
</compile_context>

<pallas_src>
import jax
import jax.numpy as jnp
from jax.experimental import pallas as pl
from jax.experimental.pallas import tpu as pltpu

NEG_SLOPE = 0.01  # F.leaky_relu default negative_slope


def _round_up(n, m):
    return ((n + m - 1) // m) * m


def _device_kind():
    try:
        return jax.devices()[0].device_kind.lower()
    except Exception:
        return ""


def _vmem_estimate(tb, din_pad, h1, h2, act_bytes, fc3_cols):
    """Rough VMEM working set: double-buffered pipelined windows + temporaries."""
    fc3_w_bytes = h2 * fc3_cols * (2 if fc3_cols > 1 else 4)
    io = 2 * (tb * din_pad * 4            # x tile (f32 in, cast in-kernel)
              + din_pad * h1 * 2          # w1 bf16
              + h1 * h2 * 2               # w2 bf16
              + fc3_w_bytes
              + (h1 + h2 + 1) * 4         # biases
              + tb * 4)                   # output tile
    tmp = tb * (din_pad * 2               # bf16 copy of x
                + h1 * (4 + act_bytes)    # fc1 accumulate + activation
                + h2 * (4 + act_bytes)    # fc2 accumulate + activation
                + fc3_cols * 4)           # fc3 result
    return io + tmp


def _make_kernel(use_bf16_act, fc3_mxu):
    def kernel(x_ref, w1_ref, b1_ref, w2_ref, b2_ref, w3_ref, b3_ref, o_ref):
        # x arrives as f32; cast to bf16 in-kernel (saves a wrapper-side copy).
        x = x_ref[...].astype(jnp.bfloat16)

        # fc1 (MXU: bf16 operands, f32 accumulate) + leaky_relu.
        h1 = jnp.dot(x, w1_ref[...], preferred_element_type=jnp.float32)
        if use_bf16_act:
            h1 = h1.astype(jnp.bfloat16) + b1_ref[...]
            h1 = jnp.maximum(h1, h1 * NEG_SLOPE)          # bf16 VALU, 2 ops
        else:
            h1 = h1 + b1_ref[...]
            h1 = jnp.maximum(h1, h1 * NEG_SLOPE)          # f32 VALU
            h1 = h1.astype(jnp.bfloat16)

        # fc2 (MXU) + leaky_relu.
        h2 = jnp.dot(h1, w2_ref[...], preferred_element_type=jnp.float32)
        if use_bf16_act:
            h2 = h2.astype(jnp.bfloat16) + b2_ref[...]
            h2 = jnp.maximum(h2, h2 * NEG_SLOPE)
        else:
            h2 = h2 + b2_ref[...]
            h2 = jnp.maximum(h2, h2 * NEG_SLOPE)

        # fc3 (out_features = 1).
        if fc3_mxu:
            # w3 zero-padded to (H2, 128) bf16: one MXU pass, take column 0.
            h2b = h2 if use_bf16_act else h2.astype(jnp.bfloat16)
            l = jnp.dot(h2b, w3_ref[...], preferred_element_type=jnp.float32)
            logits = l[:, 0:1] + b3_ref[...]
        else:
            # VPU multiply + XLU lane reduce (kept on MXU-bound v5e).
            logits = jnp.sum(h2.astype(jnp.float32) * w3_ref[...],
                             axis=-1, keepdims=True) + b3_ref[...]

        o_ref[...] = jax.nn.sigmoid(logits).astype(o_ref.dtype)

    return kernel


def discriminator_forward(x, params, *, batch_tile=1024):
    """x: (B, in_channels) float32.  Returns (B, 1) float32 in [0, 1]."""
    w1, b1, w2, b2, w3, b3 = params
    B, Din = x.shape
    H1 = w1.shape[1]   # 512
    H2 = w2.shape[1]   # 1024

    # --- generation-dependent choices -------------------------------------
    kind = _device_kind()
    is_v7 = ("v7" in kind) or ("tpu7" in kind)
    use_bf16_act = ("v6" in kind) or is_v7    # bf16 VALU exists on v6e/v7x only
    fc3_mxu = use_bf16_act                    # keep VPU fc3 on MXU-bound v5e
    act_bytes = 2 if use_bf16_act else 4
    fc3_cols = 128 if fc3_mxu else 1

    # --- pad the fc1 contraction dim to a full lane width (zeros are free) --
    Din_pad = _round_up(Din, 128)
    if Din_pad != Din:
        x = jnp.pad(x, ((0, 0), (0, Din_pad - Din)))
        w1 = jnp.pad(w1, ((0, Din_pad - Din), (0, 0)))

    # --- batch tile: big, 128-aligned, VMEM-bounded ------------------------
    b128 = _round_up(max(B, 1), 128)
    tb = min(_round_up(batch_tile, 128), b128)
    # Only v7x (2 TensorCores) benefits from forcing >=2 grid steps; keep the
    # two tiles equally sized so both cores get balanced work.
    if is_v7 and b128 >= 256 and b128 // tb < 2:
        tb = _round_up(pl.cdiv(b128, 2), 128)
    vmem_budget = 24 * 1024 * 1024   # headroom under the 32 MiB scoped limit
    while tb > 128 and _vmem_estimate(tb, Din_pad, H1, H2, act_bytes, fc3_cols) > vmem_budget:
        tb -= 128

    B_pad = _round_up(B, tb)
    if B_pad != B:
        x = jnp.pad(x, ((0, B_pad - B), (0, 0)))
    grid = B_pad // tb

    # --- operand prep (weights to bf16; x stays f32 and is cast in-kernel) --
    x_in = x.astype(jnp.float32)
    w1_bf = w1.astype(jnp.bfloat16)
    w2_bf = w2.astype(jnp.bfloat16)
    bias_dt = jnp.bfloat16 if use_bf16_act else jnp.float32
    b1_r = b1.reshape(1, H1).astype(bias_dt)
    b2_r = b2.reshape(1, H2).astype(bias_dt)
    if fc3_mxu:
        w3_in = jnp.pad(w3.astype(jnp.bfloat16), ((0, 0), (0, 128 - w3.shape[1])))
        w3_spec = pl.BlockSpec((H2, 128), lambda i: (0, 0))
    else:
        w3_in = w3.reshape(1, H2).astype(jnp.float32)
        w3_spec = pl.BlockSpec((1, H2), lambda i: (0, 0))
    b3_r = b3.reshape(1, 1).astype(jnp.float32)

    # --- advisory cost estimate for the surrounding XLA graph --------------
    flops = 2 * B_pad * (Din_pad * H1 + H1 * H2 + H2 * fc3_cols)
    bytes_accessed = (B_pad * Din_pad * 4 + Din_pad * H1 * 2 + H1 * H2 * 2
                      + H2 * fc3_cols * 2 + (H1 + H2 + 1) * 4 + B_pad * 4)
    cost = pl.CostEstimate(flops=flops, transcendentals=B_pad,
                           bytes_accessed=bytes_accessed)

    out = pl.pallas_call(
        _make_kernel(use_bf16_act, fc3_mxu),
        out_shape=jax.ShapeDtypeStruct((B_pad, 1), jnp.float32),
        grid_spec=pltpu.PrefetchScalarGridSpec(
            num_scalar_prefetch=0,
            grid=(grid,),
            in_specs=[
                pl.BlockSpec((tb, Din_pad), lambda i: (i, 0)),   # x tile
                pl.BlockSpec((Din_pad, H1), lambda i: (0, 0)),   # w1 (resident)
                pl.BlockSpec((1, H1), lambda i: (0, 0)),         # b1
                pl.BlockSpec((H1, H2), lambda i: (0, 0)),        # w2 (resident)
                pl.BlockSpec((1, H2), lambda i: (0, 0)),         # b2
                w3_spec,                                         # w3
                pl.BlockSpec((1, 1), lambda i: (0, 0)),          # b3
            ],
            out_specs=pl.BlockSpec((tb, 1), lambda i: (i, 0)),
        ),
        compiler_params=pltpu.CompilerParams(
            dimension_semantics=("parallel",),
            vmem_limit_bytes=32 * 1024 * 1024,
        ),
        cost_estimate=cost,
    )(x_in, w1_bf, b1_r, w2_bf, b2_r, w3_in, b3_r)

    return out[:B]


def init_params(key, in_channels):
    """Deterministic synthetic parameters matching nn.Linear shapes.

    PyTorch stores Linear weights as (out, in); we keep them as (in, out)
    so the kernel computes x @ W + b (same math as x @ W_pt.T + b).
    """
    ks = jax.random.split(key, 6)
    scale = 0.02
    w1 = scale * jax.random.normal(ks[0], (in_channels, 512), jnp.float32)
    b1 = scale * jax.random.normal(ks[1], (512,), jnp.float32)
    w2 = scale * jax.random.normal(ks[2], (512, 1024), jnp.float32)
    b2 = scale * jax.random.normal(ks[3], (1024,), jnp.float32)
    w3 = scale * jax.random.normal(ks[4], (1024, 1), jnp.float32)
    b3 = scale * jax.random.normal(ks[5], (1,), jnp.float32)
    return (w1, b1, w2, b2, w3, b3)


def _reference_forward(x, params):
    """Pure-JAX reference with the same bf16-operand / f32-accumulate matmuls."""
    w1, b1, w2, b2, w3, b3 = params
    h1 = jnp.dot(x.astype(jnp.bfloat16), w1.astype(jnp.bfloat16),
                 preferred_element_type=jnp.float32) + b1
    h1 = jnp.where(h1 > 0, h1, NEG_SLOPE * h1)
    h2 = jnp.dot(h1.astype(jnp.bfloat16), w2.astype(jnp.bfloat16),
                 preferred_element_type=jnp.float32) + b2
    h2 = jnp.where(h2 > 0, h2, NEG_SLOPE * h2)
    h3 = h2 @ w3 + b3
    return jax.nn.sigmoid(h3)


if __name__ == "__main__":
    key = jax.random.PRNGKey(0)
    k_x, k_p = jax.random.split(key)

    # Small check: B=8, in_channels=32 (exercises Din / batch padding).
    B, in_channels = 8, 32
    x = jax.random.normal(k_x, (B, in_channels), jnp.float32)
    params = init_params(k_p, in_channels)

    out = jax.block_until_ready(discriminator_forward(x, params))
    ref = _reference_forward(x, params)
    assert out.shape == (B, 1), out.shape
    # bf16 MXU operands (and bf16 activations on v6e/v7x) -> ~1e-3 deviation
    # from a pure-f32 PyTorch forward; verified against the matching reference.
    assert jnp.allclose(out, ref, atol=2e-3, rtol=2e-3), "mismatch vs JAX reference (B=8)"

    # Second check: non-multiple batch, exercises padding / multi-row tiles.
    B2 = 300
    x2 = jax.random.normal(jax.random.PRNGKey(1), (B2, in_channels), jnp.float32)
    out2 = jax.block_until_ready(discriminator_forward(x2, params))
    ref2 = _reference_forward(x2, params)
    assert out2.shape == (B2, 1), out2.shape
    assert jnp.allclose(out2, ref2, atol=2e-3, rtol=2e-3), "mismatch vs JAX reference (B=300)"

    print("KERNEL_OK")
</pallas_src>

<mosaic_0001>
module attributes {stable_mosaic.version = 11 : i64} {
  func.func @kernel(%arg0: i32, %arg1: memref<128x128xf32, #tpu.memory_space<vmem>>, %arg2: memref<128x512xbf16, #tpu.memory_space<vmem>>, %arg3: memref<1x512xf32, #tpu.memory_space<vmem>>, %arg4: memref<512x1024xbf16, #tpu.memory_space<vmem>>, %arg5: memref<1x1024xf32, #tpu.memory_space<vmem>>, %arg6: memref<1x1024xf32, #tpu.memory_space<vmem>>, %arg7: memref<1x1xf32, #tpu.memory_space<vmem>>, %arg8: memref<128x1xf32, #tpu.memory_space<vmem>>) attributes {dimension_semantics = [#tpu.dimension_semantics<parallel>], iteration_bounds = array<i64: 1>, scalar_prefetch = 0 : i64, scratch_operands = 0 : i64, tpu.core_type = #tpu.core_type<tc>, window_params = [{transform_indices = @transform_0, window_bounds = array<i64: 128, 128>}, {pipeline_mode = #tpu.pipeline_mode<synchronous>, transform_indices = @transform_1, window_bounds = array<i64: 128, 512>}, {pipeline_mode = #tpu.pipeline_mode<synchronous>, transform_indices = @transform_2, window_bounds = array<i64: 1, 512>}, {pipeline_mode = #tpu.pipeline_mode<synchronous>, transform_indices = @transform_3, window_bounds = array<i64: 512, 1024>}, {pipeline_mode = #tpu.pipeline_mode<synchronous>, transform_indices = @transform_4, window_bounds = array<i64: 1, 1024>}, {pipeline_mode = #tpu.pipeline_mode<synchronous>, transform_indices = @transform_5, window_bounds = array<i64: 1, 1024>}, {pipeline_mode = #tpu.pipeline_mode<synchronous>, transform_indices = @transform_6, window_bounds = array<i64: 1, 1>}, {transform_indices = @transform_7, window_bounds = array<i64: 128, 1>}]} {
    %c0 = arith.constant 0 : index
    %c0_0 = arith.constant 0 : index
    %0 = vector.load %arg1[%c0, %c0_0] : memref<128x128xf32, #tpu.memory_space<vmem>>, vector<128x128xf32>
    %1 = arith.truncf %0 : vector<128x128xf32> to vector<128x128xbf16>
    %c0_1 = arith.constant 0 : index
    %c0_2 = arith.constant 0 : index
    %2 = vector.load %arg2[%c0_1, %c0_2] : memref<128x512xbf16, #tpu.memory_space<vmem>>, vector<128x512xbf16>
    %cst = arith.constant dense<0.000000e+00> : vector<128x512xf32>
    %3 = tpu.matmul %1, %2, %cst {dimension_numbers = #tpu.dot_dimension_numbers<[1], [0], [0], [1], [0, 0, 1, 1], [], []>} : vector<128x128xbf16>, vector<128x512xbf16>, vector<128x512xf32> -> vector<128x512xf32>
    %c0_3 = arith.constant 0 : index
    %c0_4 = arith.constant 0 : index
    %4 = vector.load %arg3[%c0_3, %c0_4] : memref<1x512xf32, #tpu.memory_space<vmem>>, vector<1x512xf32>
    %5 = vector.broadcast %4 : vector<1x512xf32> to vector<128x512xf32>
    %6 = arith.addf %3, %5 : vector<128x512xf32>
    %cst_5 = arith.constant 0.00999999977 : f32
    %7 = vector.broadcast %cst_5 : f32 to vector<128x512xf32>
    %8 = arith.mulf %6, %7 : vector<128x512xf32>
    %9 = arith.maximumf %6, %8 : vector<128x512xf32>
    %10 = arith.truncf %9 : vector<128x512xf32> to vector<128x512xbf16>
    %c0_6 = arith.constant 0 : index
    %c0_7 = arith.constant 0 : index
    %11 = vector.load %arg4[%c0_6, %c0_7] : memref<512x1024xbf16, #tpu.memory_space<vmem>>, vector<512x1024xbf16>
    %cst_8 = arith.constant dense<0.000000e+00> : vector<128x1024xf32>
    %12 = tpu.matmul %10, %11, %cst_8 {dimension_numbers = #tpu.dot_dimension_numbers<[1], [0], [0], [1], [0, 0, 1, 1], [], []>} : vector<128x512xbf16>, vector<512x1024xbf16>, vector<128x1024xf32> -> vector<128x1024xf32>
    %c0_9 = arith.constant 0 : index
    %c0_10 = arith.constant 0 : index
    %13 = vector.load %arg5[%c0_9, %c0_10] : memref<1x1024xf32, #tpu.memory_space<vmem>>, vector<1x1024xf32>
    %14 = vector.broadcast %13 : vector<1x1024xf32> to vector<128x1024xf32>
    %15 = arith.addf %12, %14 : vector<128x1024xf32>
    %cst_11 = arith.constant 0.00999999977 : f32
    %16 = vector.broadcast %cst_11 : f32 to vector<128x1024xf32>
    %17 = arith.mulf %15, %16 : vector<128x1024xf32>
    %18 = arith.maximumf %15, %17 : vector<128x1024xf32>
    %c0_12 = arith.constant 0 : index
    %c0_13 = arith.constant 0 : index
    %19 = vector.load %arg6[%c0_12, %c0_13] : memref<1x1024xf32, #tpu.memory_space<vmem>>, vector<1x1024xf32>
    %20 = vector.broadcast %19 : vector<1x1024xf32> to vector<128x1024xf32>
    %21 = arith.mulf %18, %20 : vector<128x1024xf32>
    %cst_14 = arith.constant dense<0.000000e+00> : vector<128xf32>
    %22 = vector.multi_reduction <add>, %21, %cst_14 [1] : vector<128x1024xf32> to vector<128xf32>
    %23 = vector.shape_cast %22 : vector<128xf32> to vector<128x1xf32>
    %c0_15 = arith.constant 0 : index
    %c0_16 = arith.constant 0 : index
    %24 = vector.load %arg7[%c0_15, %c0_16] : memref<1x1xf32, #tpu.memory_space<vmem>>, vector<1x1xf32>
    %25 = vector.broadcast %24 : vector<1x1xf32> to vector<128x1xf32>
    %26 = arith.addf %23, %25 : vector<128x1xf32>
    %27 = arith.negf %26 : vector<128x1xf32>
    %28 = math.exp %27 : vector<128x1xf32>
    %cst_17 = arith.constant 1.000000e+00 : f32
    %29 = vector.broadcast %cst_17 : f32 to vector<128x1xf32>
    %30 = arith.addf %29, %28 : vector<128x1xf32>
    %31 = arith.divf %29, %30 : vector<128x1xf32>
    %c0_18 = arith.constant 0 : index
    %c0_19 = arith.constant 0 : index
    %32 = vector.load %arg8[%c0_18, %c0_19] : memref<128x1xf32, #tpu.memory_space<vmem>>, vector<128x1xf32>
    tpu.vector_store %arg8[%c0_18, %c0_19], %31 {strides = array<i32>} : memref<128x1xf32, #tpu.memory_space<vmem>>, vector<128x1xf32>,
    return
  }
  func.func @transform_0(%arg0: i32) -> (i32, i32) {
    %c0_i32 = arith.constant 0 : i32
    %c0_i32_0 = arith.constant 0 : i32
    return %arg0, %c0_i32 : i32, i32
  }
  func.func @transform_1(%arg0: i32) -> (i32, i32) {
    %c0_i32 = arith.constant 0 : i32
    %c0_i32_0 = arith.constant 0 : i32
    %c0_i32_1 = arith.constant 0 : i32
    return %c0_i32, %c0_i32_0 : i32, i32
  }
  func.func @transform_2(%arg0: i32) -> (i32, i32) {
    %c0_i32 = arith.constant 0 : i32
    %c0_i32_0 = arith.constant 0 : i32
    %c0_i32_1 = arith.constant 0 : i32
    return %c0_i32, %c0_i32_0 : i32, i32
  }
  func.func @transform_3(%arg0: i32) -> (i32, i32) {
    %c0_i32 = arith.constant 0 : i32
    %c0_i32_0 = arith.constant 0 : i32
    %c0_i32_1 = arith.constant 0 : i32
    return %c0_i32, %c0_i32_0 : i32, i32
  }
  func.func @transform_4(%arg0: i32) -> (i32, i32) {
    %c0_i32 = arith.constant 0 : i32
    %c0_i32_0 = arith.constant 0 : i32
    %c0_i32_1 = arith.constant 0 : i32
    return %c0_i32, %c0_i32_0 : i32, i32
  }
  func.func @transform_5(%arg0: i32) -> (i32, i32) {
    %c0_i32 = arith.constant 0 : i32
    %c0_i32_0 = arith.constant 0 : i32
    %c0_i32_1 = arith.constant 0 : i32
    return %c0_i32, %c0_i32_0 : i32, i32
  }
  func.func @transform_6(%arg0: i32) -> (i32, i32) {
    %c0_i32 = arith.constant 0 : i32
    %c0_i32_0 = arith.constant 0 : i32
    %c0_i32_1 = arith.constant 0 : i32
    return %c0_i32, %c0_i32_0 : i32, i32
  }
  func.func @transform_7(%arg0: i32) -> (i32, i32) {
    %c0_i32 = arith.constant 0 : i32
    %c0_i32_0 = arith.constant 0 : i32
    return %arg0, %c0_i32 : i32, i32
  }
}

</mosaic_0001>

<bundles_post_ra>
// kernel: tpu_custom_call.1
= control target key start
LH: loop header
LB: loop body
LE: loop exit
PB: predicated region body
PF: predicated region fallthrough
CT: control target
= control target key end

     0   :  { %s6175_s0 = inlined_call_operand.hbm [shape: f32[128,128], index: 0, kind: input, shape index: {}]   ;;  %s6176_s1 = inlined_call_operand.hbm [shape: bf16[128,512], index: 1, kind: input, shape index: {}]   ;;  %s6177_s2 = inlined_call_operand.hbm [shape: f32[1,512], index: 2, kind: input, shape index: {}]   ;;  %s6178_s3 = inlined_call_operand.hbm [shape: bf16[512,1024], index: 3, kind: input, shape index: {}]   ;;  %s6179_s4 = inlined_call_operand.vmem [shape: f32[1,1024], index: 4, kind: input, shape index: {}]   ;;  %s6180_s5 = inlined_call_operand.vmem [shape: f32[1,1024], index: 5, kind: input, shape index: {}]   ;;  %s6181_s6 = inlined_call_operand.<no memory space> [shape: f32[1,1], index: 6, kind: input, shape index: {}]   ;;  %s6182_s7 = inlined_call_operand.vmem [shape: f32[128,1], index: 7, kind: output, shape index: {}]  }
   0x1   :  { %v12_v0 = vstv %s6181_s6 }
   0x2   :  { %13 = vst [vmem:[#allocation2] sm:$0x1] %v12_v0 }
   0x3   :  { %14 = vsyncpa [#allocation4], 0 }
   0x4   :  { %15 = vsyncpa [#allocation6], 0 }
   0x5   :  { %16 = vsyncpa [#allocation9], 0  ;;  %s4679_s26 = smov [#allocation5]   ;;  %s4585_s30 = scalar_lea.hbm %s6176_s1, 4096 }
   0x6   :  { %s34_s27 = sshll.u32 %s4679_s26, 4  ;;  %p4586_p0 = scmp.ne.s32.totalorder %s6176_s1, %s4585_s30  ;;  %s35_s27 = int_to_ptr.vmem [resolvable:$true] %s34_s27 }
   0x7   :  { %p4589_p1 = scmp.lt.u32.totalorder %s4585_s30, %s6176_s1 }
   0x9   :  { %p4591_p2 = pnand %p4589_p1, %p4586_p0 }
   0xb   :  { %4594 = shalt.err (!%p4591_p2)
}
   0xc   :  { %s4595_s6 = scalar_lea.vmem %s35_s27, 4096  ;;  %p4600_p4 = scmp.lt.s32.totalorder %s35_s27, %s35_s27 }
   0xd   :  { %p4596_p3 = scmp.ne.s32.totalorder %s35_s27, %s4595_s6  ;;  %p4601_p5 = scmp.lt.s32.totalorder %s4595_s6, %s4595_s6 }
   0xf   :  { %p4602_p6 = por %p4601_p5, %p4600_p4 }
  0x11   :  { %p4603_p7 = pnand %p4602_p6, %p4596_p3 }
  0x13   :  { %4606 = shalt.err (!%p4603_p7)
}
  0x14   :  { %s4680_s12 = smov 256   ;;  %s4681_s13 = smov 16  }
  0x15   :  { %40 = dma.hbm_to_vmem [thread:$0]  %s6176_s1, 4096, %s35_s27, [#allocation6], %s4680_s12, %s4680_s12, %s4681_s13  }
  0x16   :  { %s4682_s16 = smov [#allocation3]   ;;  %s4607_s20 = scalar_lea.hbm %s6175_s0, 2048 }
  0x17   :  { %s22_s17 = sshll.u32 %s4682_s16, 4  ;;  %p4608_p8 = scmp.ne.s32.totalorder %s6175_s0, %s4607_s20  ;;  %s23_s17 = int_to_ptr.vmem [resolvable:$true] %s22_s17 }
  0x18   :  { %p4611_p9 = scmp.lt.u32.totalorder %s4607_s20, %s6175_s0 }
  0x1a   :  { %p4613_p10 = pnand %p4611_p9, %p4608_p8 }
  0x1c   :  { %4616 = shalt.err (!%p4613_p10)
}
  0x1d   :  { %s4617_s25 = scalar_lea.vmem %s23_s17, 2048  ;;  %p4622_p12 = scmp.lt.s32.totalorder %s23_s17, %s23_s17 }
  0x1e   :  { %p4618_p11 = scmp.ne.s32.totalorder %s23_s17, %s4617_s25  ;;  %p4623_p13 = scmp.lt.s32.totalorder %s4617_s25, %s4617_s25 }
  0x20   :  { %p4624_p0 = por %p4623_p13, %p4622_p12 }
  0x22   :  { %p4625_p1 = pnand %p4624_p0, %p4618_p11 }
  0x24   :  { %4628 = shalt.err (!%p4625_p1)
}
  0x25   :  { %s4683_s1 = smov 128   ;;  %s4684_s26 = smov 8  }
  0x26   :  { %28 = dma.hbm_to_vmem [thread:$0]  %s6175_s0, 2048, %s23_s17, [#allocation4], %s4683_s1, %s4683_s1, %s4684_s26  }
  0x27   :  { %s4685_s29 = smov [#allocation7]   ;;  %s4686_s8 = smov [#allocation8]  }
  0x28   :  { %s47_s30 = sshll.u32 %s4685_s29, 4  ;;  %s56_s9 = sshll.u32 %s4686_s8, 4  ;;  %s48_s30 = int_to_ptr.vmem [resolvable:$true] %s47_s30  ;;  %s4757_s9 = int_to_ptr.vmem [resolvable:$true] %s56_s9 }
  0x29   :  { %s4629_s6 = scalar_lea.hbm %s6177_s2, 64 }
  0x2a   :  { %p4630_p2 = scmp.ne.s32.totalorder %s6177_s2, %s4629_s6  ;;  %p4633_p3 = scmp.lt.u32.totalorder %s4629_s6, %s6177_s2 }
  0x2c   :  { %p4635_p4 = pnand %p4633_p3, %p4630_p2 }
  0x2e   :  { %4638 = shalt.err (!%p4635_p4)
}
  0x2f   :  { %s4639_s0 = scalar_lea.vmem %s48_s30, 64  ;;  %p4644_p6 = scmp.lt.s32.totalorder %s48_s30, %s48_s30 }
  0x30   :  { %p4640_p5 = scmp.ne.s32.totalorder %s48_s30, %s4639_s0  ;;  %p4645_p7 = scmp.lt.s32.totalorder %s4639_s0, %s4639_s0 }
  0x32   :  { %p4646_p8 = por %p4645_p7, %p4644_p6 }
  0x34   :  { %p4647_p9 = pnand %p4646_p8, %p4640_p5 }
  0x36   :  { %4650 = shalt.err (!%p4647_p9)
}
  0x37   :  { %50 = dma.hbm_to_vmem [thread:$0]  %s6177_s2, 64, %s48_s30, [#allocation6]  }
  0x38   :  { %s4651_s20 = scalar_lea.hbm %s6178_s3, 32768 }
  0x39   :  { %p4652_p10 = scmp.ne.s32.totalorder %s6178_s3, %s4651_s20  ;;  %p4655_p11 = scmp.lt.u32.totalorder %s4651_s20, %s6178_s3 }
  0x3b   :  { %p4657_p12 = pnand %p4655_p11, %p4652_p10 }
  0x3d   :  { %4660 = shalt.err (!%p4657_p12)
}
  0x3e   :  { %s4661_s25 = scalar_lea.vmem %s4757_s9, 32768  ;;  %p4666_p0 = scmp.lt.s32.totalorder %s4757_s9, %s4757_s9 }
  0x3f   :  { %p4662_p13 = scmp.ne.s32.totalorder %s4757_s9, %s4661_s25  ;;  %p4667_p1 = scmp.lt.s32.totalorder %s4661_s25, %s4661_s25 }
  0x41   :  { %p4668_p2 = por %p4667_p1, %p4666_p0 }
  0x43   :  { %p4669_p3 = pnand %p4668_p2, %p4662_p13 }
  0x45   :  { %4672 = shalt.err (!%p4669_p3)
}
  0x46   :  { %s4687_s2 = smov 512   ;;  %s4688_s1 = smov 32  }
  0x47   :  { %62 = dma.hbm_to_vmem [thread:$0]  %s6178_s3, 32768, %s4757_s9, [#allocation9], %s4687_s2, %s4687_s2, %s4688_s1  }
  0x48   :  { %4673 = dma.done.wait [#allocation4], 2048  }
  0x49   :  { %4674 = vsyncadd [#allocation4], 4294965248 }
  0x4a   :  { %4675 = dma.done.wait [#allocation6], 4160  }
  0x4b   :  { %4676 = vsyncadd [#allocation6], 4294963136 }
  0x4c   :  { %4677 = dma.done.wait [#allocation9], 32768  }
  0x4d   :  { %4678 = vsyncadd [#allocation9], 4294934528  ;;  %v4689_v1 = vmov 0   ;;  %v4473_v2 = vld [vmem:[#allocation5 + $0x4] ss:$16 sps:$4 sm:$0xff]   ;;  %v83_v29 = vld [vmem:[#allocation3 + $0x8] sm:$0xff] }
  0x4e   :  { %352 = vmatprep.mubr.bf16.mxu0 %v4689_v1  ;;  %465 = vmatprep.mubr.bf16.mxu1 %v4689_v1  ;;  %v4475_v3 = vld [vmem:[#allocation5] ss:$16 sps:$4 sm:$0xff]   ;;  %v4476_v4 = vld [vmem:[#allocation5 + $0x24] ss:$16 sps:$4 sm:$0xff]   ;;  %v4497_v11 = vld [vmem:[#allocation5 + $0xc] ss:$16 sps:$4 sm:$0xff]  }
  0x4f   :  { %320 = vmatprep.subr.bf16.mxu0 %v4473_v2  ;;  %v4478_v5 = vld [vmem:[#allocation5 + $0x20] ss:$16 sps:$4 sm:$0xff]   ;;  %v4479_v6 = vld [vmem:[#allocation5 + $0x44] ss:$16 sps:$4 sm:$0xff]   ;;  %v4499_v12 = vld [vmem:[#allocation5 + $0x8] ss:$16 sps:$4 sm:$0xff]   ;;  %433 = vmatprep.subr.bf16.mxu1 %v4497_v11 }
  0x50   :  { %321 = vmatpush1.bf16.msra.mxu0 %v4475_v3  ;;  %v4481_v7 = vld [vmem:[#allocation5 + $0x40] ss:$16 sps:$4 sm:$0xff]   ;;  %v4482_v8 = vld [vmem:[#allocation5 + $0x64] ss:$16 sps:$4 sm:$0xff]   ;;  %v4500_v14 = vld [vmem:[#allocation5 + $0x2c] ss:$16 sps:$4 sm:$0xff]   ;;  %434 = vmatpush1.bf16.msra.mxu1 %v4499_v12 }
  0x51   :  { %322 = vmatprep.subr.bf16.mxu0 %v4476_v4  ;;  %v4484_v9 = vld [vmem:[#allocation5 + $0x60] ss:$16 sps:$4 sm:$0xff]   ;;  %v4485_v10 = vld [vmem:[#allocation5 + $0x84] ss:$16 sps:$4 sm:$0xff]   ;;  %v4502_v16 = vld [vmem:[#allocation5 + $0x28] ss:$16 sps:$4 sm:$0xff]   ;;  %435 = vmatprep.subr.bf16.mxu1 %v4500_v14 }
  0x52   :  { %v4487_v13 = vld [vmem:[#allocation5 + $0x80] ss:$16 sps:$4 sm:$0xff]   ;;  %v4488_v15 = vld [vmem:[#allocation5 + $0xa4] ss:$16 sps:$4 sm:$0xff]   ;;  %v4503_v17 = vld [vmem:[#allocation5 + $0x4c] ss:$16 sps:$4 sm:$0xff]  }
  0x53   :  { %v4490_v18 = vld [vmem:[#allocation5 + $0xa0] ss:$16 sps:$4 sm:$0xff]   ;;  %v4491_v19 = vld [vmem:[#allocation5 + $0xc4] ss:$16 sps:$4 sm:$0xff]   ;;  %v4505_v20 = vld [vmem:[#allocation5 + $0x48] ss:$16 sps:$4 sm:$0xff]  }
  0x54   :  { %323 = vmatpush1.bf16.msra.mxu0 %v4478_v5  ;;  %436 = vmatpush1.bf16.msra.mxu1 %v4502_v16  ;;  %v4506_v21 = vld [vmem:[#allocation5 + $0x6c] ss:$16 sps:$4 sm:$0xff]   ;;  %v4493_v22 = vld [vmem:[#allocation5 + $0xc0] ss:$16 sps:$4 sm:$0xff]   ;;  %v4494_v23 = vld [vmem:[#allocation5 + $0xe4] ss:$16 sps:$4 sm:$0xff]  }
  0x55   :  { %324 = vmatprep.subr.bf16.mxu0 %v4479_v6  ;;  %437 = vmatprep.subr.bf16.mxu1 %v4503_v17  ;;  %v4508_v24 = vld [vmem:[#allocation5 + $0x68] ss:$16 sps:$4 sm:$0xff]   ;;  %v4496_v25 = vld [vmem:[#allocation5 + $0xe0] ss:$16 sps:$4 sm:$0xff]   ;;  %v4509_v26 = vld [vmem:[#allocation5 + $0x8c] ss:$16 sps:$4 sm:$0xff]  }
  0x56   :  { %v706_v27 = vld [vmem:[#allocation8] sm:$0xff]  ;;  %v4512_v36 = vld [vmem:[#allocation5 + $0xac] ss:$16 sps:$4 sm:$0xff]   ;;  %v84_v43 = vld [vmem:[#allocation3 + $0x10] sm:$0xff]  ;;  %vm3877_vm0 = vcmask 7168  }
  0x57   :  { %v82_v28 = vld [vmem:[#allocation3] sm:$0xff]  ;;  %v4511_v32 = vld [vmem:[#allocation5 + $0x88] ss:$16 sps:$4 sm:$0xff]   ;;  %v4515_v42 = vld [vmem:[#allocation5 + $0xcc] ss:$16 sps:$4 sm:$0xff]  }
  0x58   :  { %325 = vmatpush1.bf16.msra.mxu0 %v4481_v7  ;;  %438 = vmatpush1.bf16.msra.mxu1 %v4505_v20  ;;  %v710_v30 = vld [vmem:[#allocation8 + $0x20] sm:$0xff]  ;;  %v98_v35 = vpack.c.bf16 %v83_v29, %v82_v28  ;;  %v85_v44 = vld [vmem:[#allocation3 + $0x18] sm:$0xff]  ;;  %v707_v52 = vld [vmem:[#allocation8 + $0x8] sm:$0xff] }
  0x59   :  { %326 = vmatprep.subr.bf16.mxu0 %v4482_v8  ;;  %439 = vmatprep.subr.bf16.mxu1 %v4506_v21  ;;  %v3934_v31 = vcombine.high %v706_v27, %v710_v30  ;;  %v714_v33 = vld [vmem:[#allocation8 + $0x40] sm:$0xff]  ;;  %v3933_v37 = vcombine.low %v706_v27, %v710_v30  ;;  %v4791_v50 = vpack.c.bf16 %v85_v44, %v84_v43  ;;  %v4518_v51 = vld [vmem:[#allocation5 + $0xec] ss:$16 sps:$4 sm:$0xff]  }
  0x5a   :  { %v718_v34 = vld [vmem:[#allocation8 + $0x60] sm:$0xff]  ;;  %v711_v53 = vld [vmem:[#allocation8 + $0x28] sm:$0xff]  ;;  %v89_v17 = vld [vmem:[#allocation3 + $0x38] sm:$0xff] }
  0x5b   :  { %v3942_v38 = vcombine.high %v714_v33, %v718_v34  ;;  %v4514_v39 = vld [vmem:[#allocation5 + $0xa8] ss:$16 sps:$4 sm:$0xff]   ;;  %v3941_v45 = vcombine.low %v714_v33, %v718_v34  ;;  %v86_v59 = vld [vmem:[#allocation3 + $0x20] sm:$0xff]  ;;  %v3936_v60 = vcombine.high %v707_v52, %v711_v53  ;;  %v715_v62 = vld [vmem:[#allocation8 + $0x48] sm:$0xff]  ;;  %v3935_v3 = vcombine.low %v707_v52, %v711_v53 }
  0x5c   :  { %327 = vmatpush1.bf16.msra.mxu0 %v4484_v9  ;;  %440 = vmatpush1.bf16.msra.mxu1 %v4508_v24  ;;  %v722_v40 = vld [vmem:[#allocation8 + $0x80] sm:$0xff]  ;;  %v719_v63 = vld [vmem:[#allocation8 + $0x68] sm:$0xff] }
  0x5d   :  { %328 = vmatprep.subr.bf16.mxu0 %v4485_v10  ;;  %441 = vmatprep.subr.bf16.mxu1 %v4509_v26  ;;  %v726_v41 = vld [vmem:[#allocation8 + $0xa0] sm:$0xff]  ;;  %v3944_v7 = vcombine.high %v715_v62, %v719_v63  ;;  %v723_v8 = vld [vmem:[#allocation8 + $0x88] sm:$0xff]  ;;  %v3943_v12 = vcombine.low %v715_v62, %v719_v63 }
  0x5e   :  { %v3950_v46 = vcombine.high %v722_v40, %v726_v41  ;;  %v4517_v47 = vld [vmem:[#allocation5 + $0xc8] ss:$16 sps:$4 sm:$0xff]   ;;  %v3949_v54 = vcombine.low %v722_v40, %v726_v41  ;;  %v727_v9 = vld [vmem:[#allocation8 + $0xa8] sm:$0xff]  ;;  %v90_v34 = vld [vmem:[#allocation3 + $0x40] sm:$0xff] }
  0x5f   :  { %v730_v48 = vld [vmem:[#allocation8 + $0xc0] sm:$0xff]  ;;  %v3952_v16 = vcombine.high %v723_v8, %v727_v9  ;;  %v739_v27 = vld [vmem:[#allocation8 + $0x108] sm:$0xff] }
  0x60   :  { %329 = vmatpush1.bf16.msra.mxu0 %v4487_v13  ;;  %442 = vmatpush1.bf16.msra.mxu1 %v4511_v32  ;;  %v734_v49 = vld [vmem:[#allocation8 + $0xe0] sm:$0xff]  ;;  %v743_v28 = vld [vmem:[#allocation8 + $0x128] sm:$0xff] }
  0x61   :  { %330 = vmatprep.subr.bf16.mxu0 %v4488_v15  ;;  %443 = vmatprep.subr.bf16.mxu1 %v4512_v36  ;;  %v3958_v55 = vcombine.high %v730_v48, %v734_v49  ;;  %v4520_v56 = vld [vmem:[#allocation5 + $0xe8] ss:$16 sps:$4 sm:$0xff]   ;;  %v3957_v0 = vcombine.low %v730_v48, %v734_v49  ;;  %v88_v15 = vld [vmem:[#allocation3 + $0x30] sm:$0xff]  ;;  %v3967_v41 = vcombine.low %v739_v27, %v743_v28 }
  0x62   :  { %v738_v57 = vld [vmem:[#allocation8 + $0x100] sm:$0xff]  ;;  %v92_v53 = vld [vmem:[#allocation3 + $0x50] sm:$0xff] }
  0x63   :  { %v742_v58 = vld [vmem:[#allocation8 + $0x120] sm:$0xff] }
  0x64   :  { %331 = vmatpush1.bf16.msra.mxu0 %v4490_v18  ;;  %444 = vmatpush1.bf16.msra.mxu1 %v4514_v39  ;;  %v87_v61 = vld [vmem:[#allocation3 + $0x28] sm:$0xff]  ;;  %v3966_v2 = vcombine.high %v738_v57, %v742_v58  ;;  %v3965_v10 = vcombine.low %v738_v57, %v742_v58 }
  0x65   :  { %332 = vmatprep.subr.bf16.mxu0 %v4491_v19  ;;  %445 = vmatprep.subr.bf16.mxu1 %v4515_v42  ;;  %v746_v4 = vld [vmem:[#allocation8 + $0x140] sm:$0xff]  ;;  %v4795_v6 = vpack.c.bf16 %v87_v61, %v86_v59  ;;  %v731_v18 = vld [vmem:[#allocation8 + $0xc8] sm:$0xff] }
  0x66   :  { %v750_v5 = vld [vmem:[#allocation8 + $0x160] sm:$0xff]  ;;  %v735_v19 = vld [vmem:[#allocation8 + $0xe8] sm:$0xff] }
  0x67   :  { %v3974_v11 = vcombine.high %v746_v4, %v750_v5  ;;  %v754_v13 = vld [vmem:[#allocation8 + $0x180] sm:$0xff]  ;;  %v3973_v20 = vcombine.low %v746_v4, %v750_v5  ;;  %v3960_v26 = vcombine.high %v731_v18, %v735_v19  ;;  %v767_v57 = vld [vmem:[#allocation8 + $0x1e8] sm:$0xff] }
  0x68   :  { %333 = vmatpush1.bf16.msra.mxu0 %v4493_v22  ;;  %446 = vmatpush1.bf16.msra.mxu1 %v4517_v47  ;;  %v758_v14 = vld [vmem:[#allocation8 + $0x1a0] sm:$0xff]  ;;  %v3951_v22 = vcombine.low %v723_v8, %v727_v9  ;;  %v759_v47 = vld [vmem:[#allocation8 + $0x1a8] sm:$0xff] }
  0x69   :  { %334 = vmatprep.subr.bf16.mxu0 %v4494_v23  ;;  %447 = vmatprep.subr.bf16.mxu1 %v4518_v51  ;;  %v3982_v21 = vcombine.high %v754_v13, %v758_v14  ;;  %v762_v23 = vld [vmem:[#allocation8 + $0x1c0] sm:$0xff]  ;;  %v3981_v29 = vcombine.low %v754_v13, %v758_v14  ;;  %v783_v13 = vld [vmem:[#allocation8 + $0x268] sm:$0xff] }
  0x6a   :  { %v766_v24 = vld [vmem:[#allocation8 + $0x1e0] sm:$0xff] }
  0x6b   :  { %v3990_v30 = vcombine.high %v762_v23, %v766_v24  ;;  %v770_v32 = vld [vmem:[#allocation8 + $0x200] sm:$0xff]  ;;  %v3989_v39 = vcombine.low %v762_v23, %v766_v24  ;;  %v96_v23 = vld [vmem:[#allocation3 + $0x70] sm:$0xff] }
  0x6c   :  { %335 = vmatpush1.bf16.msra.mxu0 %v4496_v25  ;;  %448 = vmatpush1.bf16.msra.mxu1 %v4520_v56  ;;  %v4800_v25 = vpack.c.bf16 %v89_v17, %v88_v15  ;;  %v774_v33 = vld [vmem:[#allocation8 + $0x220] sm:$0xff]  ;;  %v763_v56 = vld [vmem:[#allocation8 + $0x1c8] sm:$0xff] }
  0x6d   :  { %2284 = vmatprep.subr.bf16.mxu0 %v3934_v31  ;;  %2510 = vmatprep.subr.bf16.mxu1 %v3936_v60  ;;  %v3959_v31 = vcombine.low %v731_v18, %v735_v19  ;;  %v91_v36 = vld [vmem:[#allocation3 + $0x48] sm:$0xff]  ;;  %v3998_v40 = vcombine.high %v770_v32, %v774_v33  ;;  %v3997_v48 = vcombine.low %v770_v32, %v774_v33  ;;  %v94_v9 = vld [vmem:[#allocation3 + $0x60] sm:$0xff] }
  0x6e   :  { %v778_v42 = vld [vmem:[#allocation8 + $0x240] sm:$0xff]  ;;  %v4806_v44 = vpack.c.bf16 %v91_v36, %v90_v34  ;;  %v787_v19 = vld [vmem:[#allocation8 + $0x288] sm:$0xff] }
  0x6f   :  { %353 = vmatmul.mubr.bf16.vlgmr.msra.gmra.mrb[0].mxu0 %v98_v35  ;;  %466 = vmatmul.mubr.bf16.vlgmr.msra.gmra.mrb[0].mxu1 %v98_v35  ;;  %v3968_v35 = vcombine.high %v739_v27, %v743_v28  ;;  %v782_v43 = vld [vmem:[#allocation8 + $0x260] sm:$0xff]  ;;  %v799_v27 = vld [vmem:[#allocation8 + $0x2e8] sm:$0xff] }
  0x70   :  { %362 = vmatprep.mubr.bf16.mxu0 %v4689_v1  ;;  %2285 = vmatpush1.bf16.msra.mxu0 %v3933_v37  ;;  %v747_v37 = vld [vmem:[#allocation8 + $0x148] sm:$0xff]  ;;  %v4006_v49 = vcombine.high %v778_v42, %v782_v43  ;;  %v786_v51 = vld [vmem:[#allocation8 + $0x280] sm:$0xff]  ;;  %v4005_v58 = vcombine.low %v778_v42, %v782_v43 }
  0x71   :  { %2286 = vmatprep.subr.bf16.mxu0 %v3942_v38  ;;  %475 = vmatprep.mubr.bf16.mxu1 %v4689_v1  ;;  %v751_v38 = vld [vmem:[#allocation8 + $0x168] sm:$0xff]  ;;  %v790_v52 = vld [vmem:[#allocation8 + $0x2a0] sm:$0xff] }
  0x72   :  { %2511 = vmatpush1.bf16.msra.mxu1 %v3935_v3  ;;  %v4014_v59 = vcombine.high %v786_v51, %v790_v52  ;;  %v794_v61 = vld [vmem:[#allocation8 + $0x2c0] sm:$0xff]  ;;  %v775_v3 = vld [vmem:[#allocation8 + $0x228] sm:$0xff]  ;;  %v4013_v4 = vcombine.low %v786_v51, %v790_v52 }
  0x73   :  { %2512 = vmatprep.subr.bf16.mxu1 %v3944_v7  ;;  %v798_v62 = vld [vmem:[#allocation8 + $0x2e0] sm:$0xff]  ;;  %v807_v32 = vld [vmem:[#allocation8 + $0x328] sm:$0xff] }
  0x74   :  { %2287 = vmatpush1.bf16.msra.mxu0 %v3941_v45  ;;  %v3976_v45 = vcombine.high %v747_v37, %v751_v38  ;;  %v4022_v5 = vcombine.high %v794_v61, %v798_v62  ;;  %v802_v7 = vld [vmem:[#allocation8 + $0x300] sm:$0xff]  ;;  %v4021_v14 = vcombine.low %v794_v61, %v798_v62  ;;  %v4824_v61 = vld [vmem:[#allocation8 + $0x408] sm:$0xff] }
  0x75   :  { %2288 = vmatprep.subr.bf16.mxu0 %v3950_v46  ;;  %v755_v46 = vld [vmem:[#allocation8 + $0x188] sm:$0xff]  ;;  %v806_v8 = vld [vmem:[#allocation8 + $0x320] sm:$0xff] }
  0x76   :  { %2513 = vmatpush1.bf16.msra.mxu1 %v3943_v12  ;;  %v3983_v60 = vcombine.low %v755_v46, %v759_v47  ;;  %v779_v12 = vld [vmem:[#allocation8 + $0x248] sm:$0xff]  ;;  %v4030_v15 = vcombine.high %v802_v7, %v806_v8  ;;  %v810_v36 = vld [vmem:[#allocation8 + $0x340] sm:$0xff] }
  0x77   :  { %363 = vmatmul.mubr.bf16.gmra.mrb[4].mxu0 %v4791_v50  ;;  %2514 = vmatprep.subr.bf16.mxu1 %v3952_v16  ;;  %v4008_v18 = vcombine.high %v779_v12, %v783_v13  ;;  %v826_v51 = vld [vmem:[#allocation8 + $0x3c0] sm:$0xff] }
  0x78   :  { %372 = vmatprep.mubr.bf16.mxu0 %v4689_v1  ;;  %2289 = vmatpush1.bf16.msra.mxu0 %v3949_v54  ;;  %v3984_v54 = vcombine.high %v755_v46, %v759_v47  ;;  %v819_v46 = vld [vmem:[#allocation8 + $0x388] sm:$0xff]  ;;  %v830_v52 = vld [vmem:[#allocation8 + $0x3e0] sm:$0xff] }
  0x79   :  { %2290 = vmatprep.subr.bf16.mxu0 %v3958_v55  ;;  %476 = vmatmul.mubr.bf16.gmra.mrb[4].mxu1 %v4791_v50  ;;  %v3975_v50 = vcombine.low %v747_v37, %v751_v38  ;;  %v93_v55 = vld [vmem:[#allocation3 + $0x58] sm:$0xff]  ;;  %v814_v37 = vld [vmem:[#allocation8 + $0x360] sm:$0xff]  ;;  %v811_v38 = vld [vmem:[#allocation8 + $0x348] sm:$0xff] }
  0x7a   :  { %485 = vmatprep.mubr.bf16.mxu1 %v4689_v1  ;;  %2515 = vmatpush1.bf16.msra.mxu1 %v3951_v22  ;;  %v103_v63 = vpack.c.bf16 %v93_v55, %v92_v53  ;;  %v4007_v22 = vcombine.low %v779_v12, %v783_v13  ;;  %v827_v53 = vld [vmem:[#allocation8 + $0x3c8] sm:$0xff] }
  0x7b   :  { %2516 = vmatprep.subr.bf16.mxu1 %v3960_v26  ;;  %v795_v26 = vld [vmem:[#allocation8 + $0x2c8] sm:$0xff] }
  0x7c   :  { %2291 = vmatpush1.bf16.msra.mxu0 %v3957_v0  ;;  %v3992_v0 = vcombine.high %v763_v56, %v767_v57  ;;  %v4023_v33 = vcombine.low %v795_v26, %v799_v27  ;;  %v831_v55 = vld [vmem:[#allocation8 + $0x3e8] sm:$0xff] }
  0x7d   :  { %2292 = vmatprep.subr.bf16.mxu0 %v3966_v2  ;;  %v771_v2 = vld [vmem:[#allocation8 + $0x208] sm:$0xff] }
  0x7e   :  { %2517 = vmatpush1.bf16.msra.mxu1 %v3959_v31  ;;  %v3999_v16 = vcombine.low %v771_v2, %v775_v3  ;;  %v803_v31 = vld [vmem:[#allocation8 + $0x308] sm:$0xff] }
  0x7f   :  { %373 = vmatmul.mubr.bf16.gmra.mrb[8].mxu0 %v4795_v6  ;;  %2518 = vmatprep.subr.bf16.mxu1 %v3968_v35  ;;  %v4032_v34 = vcombine.high %v803_v31, %v807_v32  ;;  %v4031_v35 = vcombine.low %v803_v31, %v807_v32  ;;  %v4856_v13 = vld [vmem:[#allocation8 + $0x468] sm:$0xff] }
  0x80   :  { %382 = vmatprep.mubr.bf16.mxu0 %v4689_v1  ;;  %2293 = vmatpush1.bf16.msra.mxu0 %v3965_v10  ;;  %v4000_v10 = vcombine.high %v771_v2, %v775_v3 }
  0x81   :  { %2294 = vmatprep.subr.bf16.mxu0 %v3974_v11  ;;  %486 = vmatmul.mubr.bf16.gmra.mrb[8].mxu1 %v4795_v6  ;;  %v3991_v6 = vcombine.low %v763_v56, %v767_v57  ;;  %v95_v11 = vld [vmem:[#allocation3 + $0x68] sm:$0xff]  ;;  %v4053_v56 = vcombine.low %v826_v51, %v830_v52  ;;  %v4055_v57 = vcombine.low %v827_v53, %v831_v55 }
  0x82   :  { %495 = vmatprep.mubr.bf16.mxu1 %v4689_v1  ;;  %2519 = vmatpush1.bf16.msra.mxu1 %v3967_v41  ;;  %v104_v17 = vpack.c.bf16 %v95_v11, %v94_v9  ;;  %v4037_v41 = vcombine.low %v810_v36, %v814_v37  ;;  %v4846_v9 = vld [vmem:[#allocation8 + $0x440] sm:$0xff]  ;;  %v4850_v11 = vld [vmem:[#allocation8 + $0x448] sm:$0xff] }
  0x83   :  { %2520 = vmatprep.subr.bf16.mxu1 %v3976_v45  ;;  %v822_v45 = vld [vmem:[#allocation8 + $0x3a0] sm:$0xff] }
  0x84   :  { %2295 = vmatpush1.bf16.msra.mxu0 %v3973_v20  ;;  %v791_v20 = vld [vmem:[#allocation8 + $0x2a8] sm:$0xff] }
  0x85   :  { %2296 = vmatprep.subr.bf16.mxu0 %v3982_v21  ;;  %v4029_v21 = vcombine.low %v802_v7, %v806_v8  ;;  %v4016_v24 = vcombine.high %v787_v19, %v791_v20  ;;  %v4015_v28 = vcombine.low %v787_v19, %v791_v20  ;;  %v4841_v7 = vld [vmem:[#allocation7] sm:$0xf]  ;;  %v4870_v19 = vld [vmem:[#allocation8 + $0x4c0] sm:$0xff] }
  0x86   :  { %2521 = vmatpush1.bf16.msra.mxu1 %v3975_v50 }
  0x87   :  { %383 = vmatmul.mubr.bf16.gmra.mrb[12].mxu0 %v4800_v25  ;;  %2522 = vmatprep.subr.bf16.mxu1 %v3984_v54  ;;  %v4054_v54 = vcombine.high %v826_v51, %v830_v52  ;;  %v4923_v51 = vld [vmem:[#allocation8 + $0x580] sm:$0xff] }
  0x88   :  { %392 = vmatprep.mubr.bf16.mxu0 %v4689_v1  ;;  %2297 = vmatpush1.bf16.msra.mxu0 %v3981_v29  ;;  %v4925_v52 = vld [vmem:[#allocation8 + $0x5a0] sm:$0xff] }
  0x89   :  { %2298 = vmatprep.subr.bf16.mxu0 %v3990_v30  ;;  %496 = vmatmul.mubr.bf16.gmra.mrb[12].mxu1 %v4800_v25  ;;  %v97_v25 = vld [vmem:[#allocation3 + $0x78] sm:$0xff]  ;;  %v4024_v30 = vcombine.high %v795_v26, %v799_v27 }
  0x8a   :  { %505 = vmatprep.mubr.bf16.mxu1 %v4689_v1  ;;  %2523 = vmatpush1.bf16.msra.mxu1 %v3983_v60  ;;  %v105_v29 = vpack.c.bf16 %v97_v25, %v96_v23  ;;  %v4822_v60 = vld [vmem:[#allocation8 + $0x420] sm:$0xff]  ;;  %v4878_v23 = vld [vmem:[#allocation8 + $0x4e8] sm:$0xff] }
  0x8b   :  { %2524 = vmatprep.subr.bf16.mxu1 %v3992_v0 }
  0x8c   :  { %2299 = vmatpush1.bf16.msra.mxu0 %v3989_v39  ;;  %v4038_v39 = vcombine.high %v810_v36, %v814_v37  ;;  %v4899_v36 = vld [vmem:[#allocation8 + $0x508] sm:$0xff] }
  0x8d   :  { %2300 = vmatprep.subr.bf16.mxu0 %v3998_v40  ;;  %v815_v40 = vld [vmem:[#allocation8 + $0x368] sm:$0xff] }
  0x8e   :  { %2525 = vmatpush1.bf16.msra.mxu1 %v3991_v6  ;;  %v4039_v42 = vcombine.low %v811_v38, %v815_v40  ;;  %v4040_v43 = vcombine.high %v811_v38, %v815_v40  ;;  %v4901_v37 = vld [vmem:[#allocation8 + $0x528] sm:$0xff] }
  0x8f   :  { %393 = vmatmul.mubr.bf16.gmra.mrb[16].mxu0 %v4806_v44  ;;  %2526 = vmatprep.subr.bf16.mxu1 %v4000_v10  ;;  %v4848_v10 = vld [vmem:[#allocation8 + $0x460] sm:$0xff]  ;;  %v4956_v40 = vld [vmem:[#allocation8 + $0x5e8] sm:$0xff] }
  0x90   :  { %402 = vmatprep.mubr.bf16.mxu0 %v4689_v1  ;;  %2301 = vmatpush1.bf16.msra.mxu0 %v3997_v48  ;;  %v823_v48 = vld [vmem:[#allocation8 + $0x3a8] sm:$0xff] }
  0x91   :  { %2302 = vmatprep.subr.bf16.mxu0 %v4006_v49  ;;  %506 = vmatmul.mubr.bf16.gmra.mrb[16].mxu1 %v4806_v44  ;;  %v818_v44 = vld [vmem:[#allocation8 + $0x380] sm:$0xff]  ;;  %v4047_v49 = vcombine.low %v819_v46, %v823_v48  ;;  %v4048_v50 = vcombine.high %v819_v46, %v823_v48 }
  0x92   :  { %515 = vmatprep.mubr.bf16.mxu1 %v4689_v1  ;;  %2527 = vmatpush1.bf16.msra.mxu1 %v3999_v16  ;;  %v4046_v47 = vcombine.high %v818_v44, %v822_v45 }
  0x93   :  { %2528 = vmatprep.subr.bf16.mxu1 %v4008_v18  ;;  %v4868_v18 = vld [vmem:[#allocation8 + $0x4a8] sm:$0xff] }
  0x94   :  { %2303 = vmatpush1.bf16.msra.mxu0 %v4005_v58  ;;  %v4056_v58 = vcombine.high %v827_v53, %v831_v55  ;;  %v4948_v55 = vld [vmem:[#allocation8 + $0x5c0] sm:$0xff] }
  0x95   :  { %2304 = vmatprep.subr.bf16.mxu0 %v4014_v59  ;;  %v4820_v59 = vld [vmem:[#allocation8 + $0x400] sm:$0xff] }
  0x96   :  { %2529 = vmatpush1.bf16.msra.mxu1 %v4007_v22  ;;  %v4062_v62 = vcombine.high %v4820_v59, %v4822_v60  ;;  %v4876_v22 = vld [vmem:[#allocation8 + $0x4c8] sm:$0xff] }
  0x97   :  { %403 = vmatmul.mubr.bf16.gmra.mrb[20].mxu0 %v103_v63  ;;  %2530 = vmatprep.subr.bf16.mxu1 %v4016_v24 }
  0x98   :  { %412 = vmatprep.mubr.bf16.mxu0 %v4689_v1  ;;  %2305 = vmatpush1.bf16.msra.mxu0 %v4013_v4  ;;  %v140_v4 = vlaneseq }
  0x99   :  { %2306 = vmatprep.subr.bf16.mxu0 %v4022_v5  ;;  %516 = vmatmul.mubr.bf16.gmra.mrb[20].mxu1 %v103_v63  ;;  %v4828_v63 = vld [vmem:[#allocation8 + $0x428] sm:$0xff] }
  0x9a   :  { %525 = vmatprep.mubr.bf16.mxu1 %v4689_v1  ;;  %2531 = vmatpush1.bf16.msra.mxu1 %v4015_v28  ;;  %v4064_v3 = vcombine.high %v4824_v61, %v4828_v63  ;;  %v4836_v5 = vshrl.u32 %v140_v4, 7  ;;  %v4938_v4 = vld [vmem:[#allocation8 + $0x588] sm:$0xff] }
  0x9b   :  { %2532 = vmatprep.subr.bf16.mxu1 %v4024_v30  ;;  %v4890_v30 = vld [vmem:[#allocation8 + $0x520] sm:$0xff]  ;;  %v4995_v28 = vld [vmem:[#allocation8 + $0x648] sm:$0xff] }
  0x9c   :  { %2307 = vmatpush1.bf16.msra.mxu0 %v4021_v14  ;;  %6199 = vst [vmem:[#allocation13_spill] sm:$0xff] %v4836_v5  ;;  %v4839_v6 = vsub.s32 0, %v4836_v5  ;;  %v4844_v8 = vsub.s32 1, %v4836_v5  ;;  %v4858_v14 = vld [vmem:[#allocation8 + $0x480] sm:$0xff] }
  0x9d   :  { %2308 = vmatprep.subr.bf16.mxu0 %v4030_v15  ;;  %v4860_v15 = vld [vmem:[#allocation8 + $0x4a0] sm:$0xff] }
  0x9e   :  { %2533 = vmatpush1.bf16.msra.mxu1 %v4023_v33  ;;  %6200 = vst [vmem:[#allocation14_spill] sm:$0xff] %v4839_v6  ;;  %6201 = vst [vmem:[#allocation15_spill] sm:$0xff] %v4844_v8  ;;  %v4854_v12 = vrot.slane %v4841_v7, %v4839_v6  ;;  %v4864_v16 = vrot.slane %v4841_v7, %v4844_v8 }
  0x9f   :  { %413 = vmatmul.mubr.bf16.gmra.mrb[24].mxu0 %v104_v17  ;;  %2534 = vmatprep.subr.bf16.mxu1 %v4032_v34  ;;  %v4964_v34 = vsub.s32 3, %v4836_v5 }
  0xa0   :  { %422 = vmatprep.mubr.bf16.mxu0 %v4689_v1  ;;  %2309 = vmatpush1.bf16.msra.mxu0 %v4029_v21  ;;  %v4874_v21 = vld [vmem:[#allocation8 + $0x4e0] sm:$0xff] }
  0xa1   :  { %526 = vmatmul.mubr.bf16.gmra.mrb[24].mxu1 %v104_v17  ;;  %2310 = vmatprep.subr.bf16.mxu0 %v4038_v39  ;;  %v4866_v17 = vld [vmem:[#allocation8 + $0x488] sm:$0xff]  ;;  %6203 = vst [vmem:[#allocation17_spill] sm:$0xff] %v4964_v34 }
  0xa2   :  { %535 = vmatprep.mubr.bf16.mxu1 %v4689_v1  ;;  %2535 = vmatpush1.bf16.msra.mxu1 %v4031_v35  ;;  %v4045_v1 = vcombine.low %v818_v44, %v822_v45  ;;  %v4912_v44 = vld [vmem:[#allocation8 + $0x560] sm:$0xff]  ;;  %v4914_v45 = vld [vmem:[#allocation8 + $0x548] sm:$0xff] }
  0xa3   :  { %2536 = vmatprep.subr.bf16.mxu1 %v4040_v43  ;;  %v4910_v43 = vld [vmem:[#allocation8 + $0x540] sm:$0xff] }
  0xa4   :  { %2311 = vmatpush1.bf16.msra.mxu0 %v4037_v41 }
  0xa5   :  { %2312 = vmatprep.subr.bf16.mxu0 %v4046_v47 }
  0xa6   :  { %2537 = vmatpush1.bf16.msra.mxu1 %v4039_v42  ;;  %v4954_v42 = vld [vmem:[#allocation8 + $0x5c8] sm:$0xff] }
  0xa7   :  { %423 = vmatmul.mubr.bf16.gmra.mrb[28].mxu0 %v105_v29  ;;  %2538 = vmatprep.subr.bf16.mxu1 %v4048_v50  ;;  %v4921_v50 = vld [vmem:[#allocation8 + $0x568] sm:$0xff] }
  0xa8   :  { %2313 = vmatpush1.bf16.msra.mxu0 %v4045_v1 }
  0xa9   :  { %536 = vmatmul.mubr.bf16.gmra.mrb[28].mxu1 %v105_v29  ;;  %2314 = vmatprep.subr.bf16.mxu0 %v4054_v54  ;;  %v4888_v29 = vld [vmem:[#allocation8 + $0x500] sm:$0xff] }
  0xaa   :  { %2539 = vmatpush1.bf16.msra.mxu1 %v4047_v49  ;;  %v4988_v49 = vld [vmem:[#allocation8 + $0x640] sm:$0xff] }
  0xab   :  { %2540 = vmatprep.subr.bf16.mxu1 %v4056_v58 }
  0xac   :  { %2315 = vmatpush1.bf16.msra.mxu0 %v4053_v56 }
  0xad   :  { %2397 = vmatprep.subr.bf16.mxu0 %v4062_v62  ;;  %v4950_v62 = vld [vmem:[#allocation8 + $0x5e0] sm:$0xff] }
  0xae   :  { %2541 = vmatpush1.bf16.msra.mxu1 %v4055_v57 }
  0xaf   :  { %2623 = vmatprep.subr.bf16.mxu1 %v4064_v3 }
 0x142   :  { %v354_v24 = vpop.f32.mrb[0].mxu0 }
 0x143   :  { %v355_v31 = vadd.f32 %v354_v24, %v4854_v12  ;;  %v356_v32 = vpop.f32.mrb[1].mxu0  ;;  %v4940_v24 = vld [vmem:[#allocation8 + $0x5a8] sm:$0xff] }
 0x144   :  { %v357_v38 = vadd.f32 %v356_v32, %v4864_v16  ;;  %v358_v39 = vpop.f32.mrb[2].mxu0 }
 0x145   :  { %v546_v46 = vmul.f32 0.01, %v355_v31  ;;  %v359_v47 = vadd.f32 %v358_v39, %v4854_v12  ;;  %v360_v48 = vpop.f32.mrb[3].mxu0  ;;  %v4959_v39 = vsub.s32 2, %v4836_v5 }
 0x146   :  { %v547_v53 = vmul.f32 0.01, %v357_v38  ;;  %v361_v54 = vadd.f32 %v360_v48, %v4864_v16 }
 0x147   :  { %v550_v57 = vmul.f32 0.01, %v359_v47  ;;  %v610_v58 = vmax.f32 %v355_v31, %v546_v46  ;;  %6202 = vst [vmem:[#allocation16_spill] sm:$0xff] %v4959_v39 }
 0x148   :  { %v551_v32 = vmul.f32 0.01, %v361_v54  ;;  %v611_v48 = vmax.f32 %v357_v38, %v547_v53  ;;  %v4973_v38 = vld [vmem:[#allocation8 + $0x600] sm:$0xff] }
 0x149   :  { %v614_v3 = vmax.f32 %v359_v47, %v550_v57  ;;  %v4975_v53 = vld [vmem:[#allocation8 + $0x620] sm:$0xff]  ;;  %v4986_v57 = vld [vmem:[#allocation8 + $0x628] sm:$0xff] }
 0x14a   :  { %v615_v1 = vmax.f32 %v361_v54, %v551_v32  ;;  %v364_v41 = vpop.f32.mrb[4].mxu0 }
 0x14b   :  { %v4966_v31 = vpack.c.bf16 %v614_v3, %v610_v58  ;;  %v365_v46 = vadd.f32 %v364_v41, %v4854_v12  ;;  %v366_v47 = vpop.f32.mrb[5].mxu0  ;;  %v4984_v3 = vld [vmem:[#allocation8 + $0x608] sm:$0xff]  ;;  %v5001_v41 = vrot.slane %v4841_v7, %v4959_v39 }
 0x14c   :  { %v4977_v54 = vpack.c.bf16 %v615_v1, %v611_v48  ;;  %v367_v32 = vadd.f32 %v366_v47, %v4864_v16  ;;  %v368_v56 = vpop.f32.mrb[6].mxu0  ;;  %v4993_v47 = vld [vmem:[#allocation8 + $0x660] sm:$0xff]  ;;  %v4997_v58 = vld [vmem:[#allocation8 + $0x668] sm:$0xff]  ;;  %v5010_v48 = vrot.slane %v4841_v7, %v4964_v34  ;;  %v6206_v7 = vcombine.low %v4824_v61, %v4828_v63  ;;  %v467_v34 = vpop.f32.mrb[0].mxu1 }
 0x14d   :  { %6204 = vst [vmem:[#allocation18_spill] sm:$0xff] %v4966_v31  ;;  %v554_v33 = vmul.f32 0.01, %v365_v46  ;;  %v369_v35 = vadd.f32 %v368_v56, %v4854_v12  ;;  %v370_v1 = vpop.f32.mrb[7].mxu0  ;;  %v6205_v56 = vcombine.low %v4820_v59, %v4822_v60  ;;  %v6207_v59 = vcombine.high %v4846_v9, %v4848_v10  ;;  %v469_v63 = vpop.f32.mrb[1].mxu1 }
 0x14e   :  { %v555_v26 = vmul.f32 0.01, %v367_v32  ;;  %v371_v25 = vadd.f32 %v370_v1, %v4864_v16  ;;  %2316 = vmatprep.mubr.bf16.mxu0 %v4977_v54  ;;  %2542 = vmatprep.mubr.bf16.mxu1 %v4977_v54  ;;  %v6208_v60 = vcombine.high %v4850_v11, %v4856_v13  ;;  %v468_v61 = vadd.f32 %v467_v34, %v5001_v41 }
 0x14f   :  { %v558_v27 = vmul.f32 0.01, %v369_v35  ;;  %2317 = vmatmul.mubr.bf16.vlgmr.msra.gmra.mrb[32].mxu0 %v4966_v31  ;;  %2543 = vmatmul.mubr.bf16.vlgmr.msra.gmra.mrb[32].mxu1 %v4966_v31  ;;  %v618_v2 = vmax.f32 %v365_v46, %v554_v33  ;;  %v470_v33 = vadd.f32 %v469_v63, %v5010_v48  ;;  %v6215_v31 = vcombine.low %v4858_v14, %v4860_v15 }
 0x150   :  { %v559_v0 = vmul.f32 0.01, %v371_v25  ;;  %2398 = vmatpush1.bf16.msra.mxu0 %v6205_v56  ;;  %2624 = vmatpush1.bf16.msra.mxu1 %v6206_v7  ;;  %v619_v56 = vmax.f32 %v367_v32, %v555_v26  ;;  %v548_v20 = vmul.f32 0.01, %v468_v61  ;;  %v5059_v32 = vld [vmem:[#allocation8 + $0x688] sm:$0xff] }
 0x151   :  { %v622_v8 = vmax.f32 %v369_v35, %v558_v27  ;;  %2399 = vmatprep.subr.bf16.mxu0 %v6207_v59  ;;  %2625 = vmatprep.subr.bf16.mxu1 %v6208_v60  ;;  %v471_v27 = vpop.f32.mrb[2].mxu1  ;;  %v549_v63 = vmul.f32 0.01, %v470_v33 }
 0x152   :  { %v623_v7 = vmax.f32 %v371_v25, %v559_v0  ;;  %v374_v5 = vpop.f32.mrb[8].mxu0  ;;  %v472_v60 = vadd.f32 %v471_v27, %v5001_v41  ;;  %v473_v39 = vpop.f32.mrb[3].mxu1  ;;  %v6211_v25 = vcombine.low %v4846_v9, %v4848_v10  ;;  %v6213_v9 = vcombine.high %v4858_v14, %v4860_v15 }
 0x153   :  { %v5042_v35 = vpack.c.bf16 %v622_v8, %v618_v2  ;;  %v375_v46 = vadd.f32 %v374_v5, %v4854_v12  ;;  %v376_v59 = vpop.f32.mrb[9].mxu0  ;;  %v6212_v2 = vcombine.low %v4850_v11, %v4856_v13  ;;  %v5055_v8 = vld [vmem:[#allocation8 + $0x680] sm:$0xff]  ;;  %v6214_v10 = vcombine.high %v4866_v17, %v4868_v18  ;;  %v5069_v11 = vld [vmem:[#allocation8 + $0x6a8] sm:$0xff] }
 0x154   :  { %v5046_v34 = vpack.c.bf16 %v623_v7, %v619_v56  ;;  %v377_v0 = vadd.f32 %v376_v59, %v4864_v16  ;;  %2400 = vmatpush1.bf16.msra.mxu0 %v6211_v25  ;;  %v378_v26 = vpop.f32.mrb[10].mxu0  ;;  %v5057_v5 = vld [vmem:[#allocation8 + $0x6a0] sm:$0xff]  ;;  %v474_v56 = vadd.f32 %v473_v39, %v5010_v48  ;;  %v612_v13 = vmax.f32 %v468_v61, %v548_v20 }
 0x155   :  { %6209 = vst [vmem:[#allocation19_spill] sm:$0xff] %v5042_v35  ;;  %2626 = vmatpush1.bf16.msra.mxu1 %v6212_v2  ;;  %v562_v7 = vmul.f32 0.01, %v375_v46  ;;  %v379_v27 = vadd.f32 %v378_v26, %v4854_v12  ;;  %v380_v59 = vpop.f32.mrb[11].mxu0  ;;  %2401 = vmatprep.subr.bf16.mxu0 %v6213_v9  ;;  %v552_v25 = vmul.f32 0.01, %v472_v60  ;;  %v613_v39 = vmax.f32 %v470_v33, %v549_v63 }
 0x156   :  { %6210 = vst [vmem:[#allocation20_spill] sm:$0xff] %v5046_v34  ;;  %2627 = vmatprep.subr.bf16.mxu1 %v6214_v10  ;;  %v563_v2 = vmul.f32 0.01, %v377_v0  ;;  %v381_v1 = vadd.f32 %v380_v59, %v4864_v16  ;;  %2326 = vmatprep.mubr.bf16.mxu0 %v5046_v34  ;;  %v553_v26 = vmul.f32 0.01, %v474_v56  ;;  %v6216_v33 = vcombine.low %v4866_v17, %v4868_v18 }
 0x157   :  { %2552 = vmatprep.mubr.bf16.mxu1 %v5046_v34  ;;  %v566_v6 = vmul.f32 0.01, %v379_v27  ;;  %2327 = vmatmul.mubr.bf16.gmra.mrb[36].mxu0 %v5042_v35  ;;  %v616_v61 = vmax.f32 %v472_v60, %v552_v25  ;;  %v626_v10 = vmax.f32 %v375_v46, %v562_v7  ;;  %v4143_v63 = vcombine.low %v5059_v32, %v5069_v11  ;;  %v477_v34 = vpop.f32.mrb[4].mxu1 }
 0x158   :  { %2553 = vmatmul.mubr.bf16.gmra.mrb[36].mxu1 %v5042_v35  ;;  %v567_v59 = vmul.f32 0.01, %v381_v1  ;;  %2402 = vmatpush1.bf16.msra.mxu0 %v6215_v31  ;;  %v617_v35 = vmax.f32 %v474_v56, %v553_v26  ;;  %v6217_v20 = vcombine.high %v4870_v19, %v4874_v21  ;;  %v6218_v46 = vcombine.high %v4876_v22, %v4878_v23  ;;  %v479_v17 = vpop.f32.mrb[5].mxu1 }
 0x159   :  { %2628 = vmatpush1.bf16.msra.mxu1 %v6216_v33  ;;  %v630_v9 = vmax.f32 %v379_v27, %v566_v6  ;;  %v5094_v14 = vpack.c.bf16 %v616_v61, %v612_v13  ;;  %v478_v15 = vadd.f32 %v477_v34, %v5001_v41  ;;  %v627_v18 = vmax.f32 %v377_v0, %v563_v2  ;;  %v481_v56 = vpop.f32.mrb[6].mxu1  ;;  %v5113_v2 = vld [vmem:[#allocation8 + $0x6c0] sm:$0xff] }
 0x15a   :  { %2403 = vmatprep.subr.bf16.mxu0 %v6217_v20  ;;  %2629 = vmatprep.subr.bf16.mxu1 %v6218_v46  ;;  %v631_v31 = vmax.f32 %v381_v1, %v567_v59  ;;  %v384_v60 = vpop.f32.mrb[12].mxu0  ;;  %v5097_v7 = vpack.c.bf16 %v617_v35, %v613_v39  ;;  %v480_v6 = vadd.f32 %v479_v17, %v5010_v48  ;;  %v483_v61 = vpop.f32.mrb[7].mxu1  ;;  %v5115_v39 = vld [vmem:[#allocation8 + $0x6e0] sm:$0xff] }
 0x15b   :  { %v5100_v27 = vpack.c.bf16 %v630_v9, %v626_v10  ;;  %v385_v25 = vadd.f32 %v384_v60, %v4854_v12  ;;  %v386_v26 = vpop.f32.mrb[13].mxu0  ;;  %v556_v20 = vmul.f32 0.01, %v478_v15  ;;  %v482_v13 = vadd.f32 %v481_v56, %v5001_v41 }
 0x15c   :  { %v5104_v33 = vpack.c.bf16 %v631_v31, %v627_v18  ;;  %v387_v34 = vadd.f32 %v386_v26, %v4864_v16  ;;  %v6219_v1 = vcombine.low %v4870_v19, %v4874_v21  ;;  %v388_v35 = vpop.f32.mrb[14].mxu0  ;;  %v6220_v0 = vcombine.low %v4876_v22, %v4878_v23 }
 0x15d   :  { %v557_v9 = vmul.f32 0.01, %v480_v6  ;;  %v484_v10 = vadd.f32 %v483_v61, %v5010_v48  ;;  %v570_v59 = vmul.f32 0.01, %v385_v25  ;;  %v389_v46 = vadd.f32 %v388_v35, %v4854_v12  ;;  %v390_v17 = vpop.f32.mrb[15].mxu0 }
 0x15e   :  { %2404 = vmatpush1.bf16.msra.mxu0 %v6219_v1  ;;  %2630 = vmatpush1.bf16.msra.mxu1 %v6220_v0  ;;  %v6221_v19 = vcombine.high %v4888_v29, %v4890_v30  ;;  %v6222_v21 = vcombine.high %v4899_v36, %v4901_v37  ;;  %v620_v22 = vmax.f32 %v478_v15, %v556_v20  ;;  %v560_v23 = vmul.f32 0.01, %v482_v13 }
 0x15f   :  { %v571_v18 = vmul.f32 0.01, %v387_v34  ;;  %v391_v31 = vadd.f32 %v390_v17, %v4864_v16  ;;  %2336 = vmatprep.mubr.bf16.mxu0 %v5104_v33  ;;  %2562 = vmatprep.mubr.bf16.mxu1 %v5104_v33  ;;  %v621_v60 = vmax.f32 %v480_v6, %v557_v9  ;;  %v561_v56 = vmul.f32 0.01, %v484_v10 }
 0x160   :  { %2405 = vmatprep.subr.bf16.mxu0 %v6221_v19  ;;  %2631 = vmatprep.subr.bf16.mxu1 %v6222_v21  ;;  %v574_v26 = vmul.f32 0.01, %v389_v46  ;;  %v4144_v61 = vcombine.high %v5059_v32, %v5069_v11  ;;  %v624_v20 = vmax.f32 %v482_v13, %v560_v23  ;;  %v634_v1 = vmax.f32 %v385_v25, %v570_v59  ;;  %v487_v19 = vpop.f32.mrb[8].mxu1 }
 0x161   :  { %2337 = vmatmul.mubr.bf16.gmra.mrb[40].mxu0 %v5100_v27  ;;  %2563 = vmatmul.mubr.bf16.gmra.mrb[40].mxu1 %v5100_v27  ;;  %v575_v35 = vmul.f32 0.01, %v391_v31  ;;  %v6223_v0 = vcombine.low %v4888_v29, %v4890_v30  ;;  %v6224_v6 = vcombine.low %v4899_v36, %v4901_v37  ;;  %v625_v17 = vmax.f32 %v484_v10, %v561_v56  ;;  %v489_v36 = vpop.f32.mrb[9].mxu1 }
 0x162   :  { %v638_v21 = vmax.f32 %v389_v46, %v574_v26  ;;  %v6225_v15 = vcombine.high %v4910_v43, %v4912_v44  ;;  %v6226_v25 = vcombine.high %v4914_v45, %v4921_v50  ;;  %v5148_v29 = vpack.c.bf16 %v624_v20, %v620_v22  ;;  %v394_v59 = vpop.f32.mrb[16].mxu0  ;;  %v491_v46 = vpop.f32.mrb[10].mxu1 }
 0x163   :  { %2406 = vmatpush1.bf16.msra.mxu0 %v6223_v0  ;;  %2632 = vmatpush1.bf16.msra.mxu1 %v6224_v6  ;;  %v488_v30 = vadd.f32 %v487_v19, %v5001_v41  ;;  %v635_v37 = vmax.f32 %v387_v34, %v571_v18  ;;  %v639_v13 = vmax.f32 %v391_v31, %v575_v35  ;;  %v493_v20 = vpop.f32.mrb[11].mxu1  ;;  %v5169_v35 = vld [vmem:[#allocation8 + $0x6e8] sm:$0xff] }
 0x164   :  { %2407 = vmatprep.subr.bf16.mxu0 %v6225_v15  ;;  %2633 = vmatprep.subr.bf16.mxu1 %v6226_v25  ;;  %v5151_v23 = vpack.c.bf16 %v625_v17, %v621_v60  ;;  %v490_v10 = vadd.f32 %v489_v36, %v5010_v48  ;;  %v5154_v56 = vpack.c.bf16 %v638_v21, %v634_v1  ;;  %v396_v15 = vpop.f32.mrb[17].mxu0  ;;  %v5167_v1 = vld [vmem:[#allocation8 + $0x6c8] sm:$0xff]  ;;  %v5171_v17 = vld [vmem:[#allocation8 + $0x700] sm:$0xff]  ;;  %v497_v9 = vpop.f32.mrb[12].mxu1 }
 0x165   :  { %v395_v26 = vadd.f32 %v394_v59, %v4854_v12  ;;  %v564_v0 = vmul.f32 0.01, %v488_v30  ;;  %v492_v22 = vadd.f32 %v491_v46, %v5001_v41  ;;  %v5158_v6 = vpack.c.bf16 %v639_v13, %v635_v37  ;;  %v398_v31 = vpop.f32.mrb[18].mxu0 }
 0x166   :  { %v397_v34 = vadd.f32 %v396_v15, %v4864_v16  ;;  %v6227_v18 = vcombine.low %v4910_v43, %v4912_v44  ;;  %v6228_v60 = vcombine.low %v4914_v45, %v4921_v50  ;;  %v565_v19 = vmul.f32 0.01, %v490_v10  ;;  %v400_v37 = vpop.f32.mrb[19].mxu0  ;;  %v5181_v45 = vld [vmem:[#allocation8 + $0x720] sm:$0xff] }
 0x167   :  { %v494_v21 = vadd.f32 %v493_v20, %v5010_v48  ;;  %v578_v25 = vmul.f32 0.01, %v395_v26  ;;  %v399_v36 = vadd.f32 %v398_v31, %v4854_v12  ;;  %v6229_v43 = vcombine.high %v4923_v51, %v4925_v52  ;;  %2346 = vmatprep.mubr.bf16.mxu0 %v5158_v6  ;;  %2572 = vmatprep.mubr.bf16.mxu1 %v5158_v6 }
 0x168   :  { %2408 = vmatpush1.bf16.msra.mxu0 %v6227_v18  ;;  %2634 = vmatpush1.bf16.msra.mxu1 %v6228_v60  ;;  %v6230_v44 = vcombine.high %v4938_v4, %v4940_v24  ;;  %v628_v50 = vmax.f32 %v488_v30, %v564_v0  ;;  %v568_v13 = vmul.f32 0.01, %v492_v22  ;;  %v579_v59 = vmul.f32 0.01, %v397_v34 }
 0x169   :  { %2409 = vmatprep.subr.bf16.mxu0 %v6229_v43  ;;  %v401_v46 = vadd.f32 %v400_v37, %v4864_v16  ;;  %v629_v15 = vmax.f32 %v490_v10, %v565_v19  ;;  %v569_v20 = vmul.f32 0.01, %v494_v21  ;;  %v582_v18 = vmul.f32 0.01, %v399_v36  ;;  %2347 = vmatmul.mubr.bf16.gmra.mrb[44].mxu0 %v5154_v56 }
 0x16a   :  { %2635 = vmatprep.subr.bf16.mxu1 %v6230_v44  ;;  %2573 = vmatmul.mubr.bf16.gmra.mrb[44].mxu1 %v5154_v56  ;;  %v632_v0 = vmax.f32 %v492_v22, %v568_v13  ;;  %v642_v60 = vmax.f32 %v395_v26, %v578_v25  ;;  %v6231_v43 = vcombine.low %v4923_v51, %v4925_v52  ;;  %v404_v25 = vpop.f32.mrb[20].mxu0 }
 0x16b   :  { %v583_v37 = vmul.f32 0.01, %v401_v46  ;;  %v6232_v10 = vcombine.low %v4938_v4, %v4940_v24  ;;  %v4158_v19 = vcombine.high %v5171_v17, %v5181_v45  ;;  %v633_v44 = vmax.f32 %v494_v21, %v569_v20  ;;  %v499_v4 = vpop.f32.mrb[13].mxu1 }
 0x16c   :  { %2410 = vmatpush1.bf16.msra.mxu0 %v6231_v43  ;;  %v646_v31 = vmax.f32 %v399_v36, %v582_v18  ;;  %v6233_v30 = vcombine.high %v4948_v55, %v4950_v62  ;;  %v6234_v26 = vcombine.high %v4954_v42, %v4956_v40  ;;  %v5206_v51 = vpack.c.bf16 %v632_v0, %v628_v50  ;;  %v501_v36 = vpop.f32.mrb[14].mxu1 }
 0x16d   :  { %2636 = vmatpush1.bf16.msra.mxu1 %v6232_v10  ;;  %v498_v52 = vadd.f32 %v497_v9, %v5001_v41  ;;  %v643_v24 = vmax.f32 %v397_v34, %v579_v59  ;;  %v647_v22 = vmax.f32 %v401_v46, %v583_v37  ;;  %v5209_v13 = vpack.c.bf16 %v633_v44, %v629_v15  ;;  %v503_v0 = vpop.f32.mrb[15].mxu1  ;;  %v5225_v15 = vld [vmem:[#allocation8 + $0x708] sm:$0xff] }
 0x16e   :  { %2411 = vmatprep.subr.bf16.mxu0 %v6233_v30  ;;  %2637 = vmatprep.subr.bf16.mxu1 %v6234_v26  ;;  %v500_v21 = vadd.f32 %v499_v4, %v5010_v48  ;;  %v5212_v20 = vpack.c.bf16 %v646_v31, %v642_v60  ;;  %v405_v18 = vadd.f32 %v404_v25, %v4854_v12  ;;  %v406_v30 = vpop.f32.mrb[21].mxu0  ;;  %v5227_v31 = vld [vmem:[#allocation8 + $0x728] sm:$0xff] }
 0x16f   :  { %v572_v43 = vmul.f32 0.01, %v498_v52  ;;  %v502_v50 = vadd.f32 %v501_v36, %v5001_v41  ;;  %v5216_v10 = vpack.c.bf16 %v647_v22, %v643_v24  ;;  %v407_v9 = vadd.f32 %v406_v30, %v4864_v16  ;;  %v408_v59 = vpop.f32.mrb[22].mxu0 }
 0x170   :  { %v6235_v34 = vcombine.low %v4948_v55, %v4950_v62  ;;  %v6236_v46 = vcombine.low %v4954_v42, %v4956_v40  ;;  %v573_v60 = vmul.f32 0.01, %v500_v21  ;;  %v504_v37 = vadd.f32 %v503_v0, %v5010_v48  ;;  %v410_v4 = vpop.f32.mrb[23].mxu0 }
 0x171   :  { %v586_v44 = vmul.f32 0.01, %v405_v18  ;;  %v409_v26 = vadd.f32 %v408_v59, %v4854_v12  ;;  %v6237_v55 = vcombine.high %v4973_v38, %v4975_v53  ;;  %v6238_v62 = vcombine.high %v4984_v3, %v4986_v57  ;;  %2356 = vmatprep.mubr.bf16.mxu0 %v5216_v10  ;;  %2582 = vmatprep.mubr.bf16.mxu1 %v5216_v10 }
 0x172   :  { %2412 = vmatpush1.bf16.msra.mxu0 %v6235_v34  ;;  %2638 = vmatpush1.bf16.msra.mxu1 %v6236_v46  ;;  %v636_v40 = vmax.f32 %v498_v52, %v572_v43  ;;  %v576_v42 = vmul.f32 0.01, %v502_v50  ;;  %v587_v24 = vmul.f32 0.01, %v407_v9  ;;  %v411_v22 = vadd.f32 %v410_v4, %v4864_v16 }
 0x173   :  { %2413 = vmatprep.subr.bf16.mxu0 %v6237_v55  ;;  %2639 = vmatprep.subr.bf16.mxu1 %v6238_v62  ;;  %v637_v25 = vmax.f32 %v500_v21, %v573_v60  ;;  %v577_v36 = vmul.f32 0.01, %v504_v37  ;;  %v590_v30 = vmul.f32 0.01, %v409_v26  ;;  %v4157_v0 = vcombine.low %v5171_v17, %v5181_v45  ;;  %v507_v55 = vpop.f32.mrb[16].mxu1 }
 0x174   :  { %2357 = vmatmul.mubr.bf16.gmra.mrb[48].mxu0 %v5212_v20  ;;  %2583 = vmatmul.mubr.bf16.gmra.mrb[48].mxu1 %v5212_v20  ;;  %v640_v43 = vmax.f32 %v502_v50, %v576_v42  ;;  %v650_v34 = vmax.f32 %v405_v18, %v586_v44  ;;  %v591_v59 = vmul.f32 0.01, %v411_v22  ;;  %v6239_v46 = vcombine.low %v4973_v38, %v4975_v53  ;;  %v414_v44 = vpop.f32.mrb[24].mxu0 }
 0x175   :  { %v6240_v21 = vcombine.low %v4984_v3, %v4986_v57  ;;  %v4160_v60 = vcombine.high %v5225_v15, %v5227_v31  ;;  %v641_v4 = vmax.f32 %v504_v37, %v577_v36  ;;  %v654_v62 = vmax.f32 %v409_v26, %v590_v30  ;;  %v509_v57 = vpop.f32.mrb[17].mxu1 }
 0x176   :  { %2414 = vmatpush1.bf16.msra.mxu0 %v6239_v46  ;;  %v6241_v52 = vcombine.high %v4988_v49, %v4993_v47  ;;  %v6242_v18 = vcombine.high %v4995_v28, %v4997_v58  ;;  %v5260_v38 = vpack.c.bf16 %v640_v43, %v636_v40  ;;  %v508_v53 = vadd.f32 %v507_v55, %v5001_v41  ;;  %v511_v26 = vpop.f32.mrb[18].mxu1 }
 0x177   :  { %2640 = vmatpush1.bf16.msra.mxu1 %v6240_v21  ;;  %v651_v3 = vmax.f32 %v407_v9, %v587_v24  ;;  %v655_v50 = vmax.f32 %v411_v22, %v591_v59  ;;  %v5263_v42 = vpack.c.bf16 %v641_v4, %v637_v25  ;;  %v510_v37 = vadd.f32 %v509_v57, %v5010_v48  ;;  %v513_v43 = vpop.f32.mrb[19].mxu1  ;;  %v5281_v59 = vld [vmem:[#allocation8 + $0x760] sm:$0xff]  ;;  %v5283_v4 = vld [vmem:[#allocation8 + $0x748] sm:$0xff] }
 0x178   :  { %2415 = vmatprep.subr.bf16.mxu0 %v6241_v52  ;;  %2641 = vmatprep.subr.bf16.mxu1 %v6242_v18  ;;  %v5266_v36 = vpack.c.bf16 %v654_v62, %v650_v34  ;;  %v415_v30 = vadd.f32 %v414_v44, %v4854_v12  ;;  %v416_v52 = vpop.f32.mrb[25].mxu0  ;;  %v580_v46 = vmul.f32 0.01, %v508_v53  ;;  %v512_v40 = vadd.f32 %v511_v26, %v5001_v41  ;;  %v5279_v34 = vld [vmem:[#allocation8 + $0x740] sm:$0xff] }
 0x179   :  { %v5270_v21 = vpack.c.bf16 %v655_v50, %v651_v3  ;;  %v417_v9 = vadd.f32 %v416_v52, %v4864_v16  ;;  %v6243_v24 = vcombine.low %v4988_v49, %v4993_v47  ;;  %v418_v22 = vpop.f32.mrb[26].mxu0  ;;  %v6244_v25 = vcombine.low %v4995_v28, %v4997_v58  ;;  %v5293_v28 = vld [vmem:[#allocation8 + $0x768] sm:$0xff] }
 0x17a   :  { %v581_v55 = vmul.f32 0.01, %v510_v37  ;;  %v514_v62 = vadd.f32 %v513_v43, %v5010_v48  ;;  %v594_v18 = vmul.f32 0.01, %v415_v30  ;;  %v419_v57 = vadd.f32 %v418_v22, %v4854_v12  ;;  %v420_v3 = vpop.f32.mrb[27].mxu0 }
 0x17b   :  { %2416 = vmatpush1.bf16.msra.mxu0 %v6243_v24  ;;  %2642 = vmatpush1.bf16.msra.mxu1 %v6244_v25  ;;  %v6245_v49 = vcombine.high %v5055_v8, %v5057_v5  ;;  %v644_v58 = vmax.f32 %v508_v53, %v580_v46  ;;  %v584_v47 = vmul.f32 0.01, %v512_v40  ;;  %v595_v50 = vmul.f32 0.01, %v417_v9 }
 0x17c   :  { %2643 = vmatprep.subr.bf16.mxu1 %v4144_v61  ;;  %v421_v44 = vadd.f32 %v420_v3, %v4864_v16  ;;  %2366 = vmatprep.mubr.bf16.mxu0 %v5270_v21  ;;  %v645_v26 = vmax.f32 %v510_v37, %v581_v55  ;;  %v585_v52 = vmul.f32 0.01, %v514_v62  ;;  %v598_v43 = vmul.f32 0.01, %v419_v57  ;;  %v517_v3 = vpop.f32.mrb[20].mxu1 }
 0x17d   :  { %2417 = vmatprep.subr.bf16.mxu0 %v6245_v49  ;;  %2592 = vmatprep.mubr.bf16.mxu1 %v5270_v21  ;;  %v4166_v53 = vcombine.high %v5279_v34, %v5281_v59  ;;  %v648_v46 = vmax.f32 %v512_v40, %v584_v47  ;;  %v658_v24 = vmax.f32 %v415_v30, %v594_v18  ;;  %v519_v32 = vpop.f32.mrb[21].mxu1  ;;  %v424_v40 = vpop.f32.mrb[28].mxu0 }
 0x17e   :  { %2367 = vmatmul.mubr.bf16.gmra.mrb[52].mxu0 %v5266_v36  ;;  %2593 = vmatmul.mubr.bf16.gmra.mrb[52].mxu1 %v5266_v36  ;;  %v599_v22 = vmul.f32 0.01, %v421_v44  ;;  %v6246_v25 = vcombine.low %v5055_v8, %v5057_v5  ;;  %v4168_v37 = vcombine.high %v5283_v4, %v5293_v28  ;;  %v649_v55 = vmax.f32 %v514_v62, %v585_v52 }
 0x17f   :  { %2644 = vmatpush1.bf16.msra.mxu1 %v4143_v63  ;;  %v662_v49 = vmax.f32 %v419_v57, %v598_v43  ;;  %v6247_v61 = vcombine.high %v5113_v2, %v5115_v39  ;;  %v6248_v30 = vcombine.high %v5167_v1, %v5169_v35  ;;  %v5318_v8 = vpack.c.bf16 %v648_v46, %v644_v58  ;;  %v521_v57 = vpop.f32.mrb[22].mxu1  ;;  %v426_v43 = vpop.f32.mrb[29].mxu0 }
 0x180   :  { %2418 = vmatpush1.bf16.msra.mxu0 %v6246_v25  ;;  %v518_v5 = vadd.f32 %v517_v3, %v5001_v41  ;;  %v659_v11 = vmax.f32 %v417_v9, %v595_v50  ;;  %v663_v63 = vmax.f32 %v421_v44, %v599_v22  ;;  %v5321_v18 = vpack.c.bf16 %v649_v55, %v645_v26  ;;  %v523_v46 = vpop.f32.mrb[23].mxu1  ;;  %v428_v44 = vpop.f32.mrb[30].mxu0  ;;  %v5339_v22 = vld [vmem:[#allocation8 + $0x7a0] sm:$0xff]  ;;  %v5341_v55 = vld [vmem:[#allocation8 + $0x788] sm:$0xff] }
 0x181   :  { %2419 = vmatprep.subr.bf16.mxu0 %v6247_v61  ;;  %2645 = vmatprep.subr.bf16.mxu1 %v6248_v30  ;;  %v520_v62 = vadd.f32 %v519_v32, %v5010_v48  ;;  %v5324_v47 = vpack.c.bf16 %v662_v49, %v658_v24  ;;  %v425_v52 = vadd.f32 %v424_v40, %v4854_v12  ;;  %v5337_v24 = vld [vmem:[#allocation8 + $0x780] sm:$0xff] }
 0x182   :  { %v588_v61 = vmul.f32 0.01, %v518_v5  ;;  %v522_v58 = vadd.f32 %v521_v57, %v5001_v41  ;;  %v5328_v25 = vpack.c.bf16 %v663_v63, %v659_v11  ;;  %v427_v9 = vadd.f32 %v426_v43, %v4864_v16  ;;  %v430_v11 = vpop.f32.mrb[31].mxu0 }
 0x183   :  { %v6249_v50 = vcombine.low %v5113_v2, %v5115_v39  ;;  %v6250_v26 = vcombine.low %v5167_v1, %v5169_v35  ;;  %v589_v3 = vmul.f32 0.01, %v520_v62  ;;  %v524_v49 = vadd.f32 %v523_v46, %v5010_v48  ;;  %v5351_v2 = vld [vmem:[#allocation8 + $0x7a8] sm:$0xff] }
 0x184   :  { %v602_v30 = vmul.f32 0.01, %v425_v52  ;;  %v429_v32 = vadd.f32 %v428_v44, %v4854_v12  ;;  %v652_v39 = vmax.f32 %v518_v5, %v588_v61  ;;  %v592_v1 = vmul.f32 0.01, %v522_v58  ;;  %2376 = vmatprep.mubr.bf16.mxu0 %v5328_v25  ;;  %2602 = vmatprep.mubr.bf16.mxu1 %v5328_v25 }
 0x185   :  { %2420 = vmatpush1.bf16.msra.mxu0 %v6249_v50  ;;  %2646 = vmatpush1.bf16.msra.mxu1 %v6250_v26  ;;  %v603_v35 = vmul.f32 0.01, %v427_v9  ;;  %v431_v63 = vadd.f32 %v430_v11, %v4864_v16  ;;  %v653_v12 = vmax.f32 %v520_v62, %v589_v3  ;;  %v593_v40 = vmul.f32 0.01, %v524_v49  ;;  %v527_v50 = vpop.f32.mrb[24].mxu1 }
 0x186   :  { %2421 = vmatprep.subr.bf16.mxu0 %v4158_v19  ;;  %2647 = vmatprep.subr.bf16.mxu1 %v4160_v60  ;;  %v606_v57 = vmul.f32 0.01, %v429_v32  ;;  %v4167_v19 = vcombine.low %v5283_v4, %v5293_v28  ;;  %v4174_v60 = vcombine.high %v5337_v24, %v5339_v22  ;;  %v656_v5 = vmax.f32 %v522_v58, %v592_v1  ;;  %v529_v45 = vpop.f32.mrb[25].mxu1 }
 0x187   :  { %2377 = vmatmul.mubr.bf16.gmra.mrb[56].mxu0 %v5324_v47  ;;  %2603 = vmatmul.mubr.bf16.gmra.mrb[56].mxu1 %v5324_v47  ;;  %v666_v43 = vmax.f32 %v425_v52, %v602_v30  ;;  %v607_v16 = vmul.f32 0.01, %v431_v63  ;;  %v6251_v62 = vcombine.low %v5225_v15, %v5227_v31  ;;  %v4176_v61 = vcombine.high %v5341_v55, %v5351_v2  ;;  %v954_v15 = vld [vmem:[#allocation8 + $0x7c0] sm:$0xff]  ;;  %v531_v44 = vpop.f32.mrb[26].mxu1 }
 0x188   :  { %v657_v46 = vmax.f32 %v524_v49, %v593_v40  ;;  %v670_v4 = vmax.f32 %v429_v32, %v606_v57  ;;  %v5373_v28 = vpack.c.bf16 %v656_v5, %v652_v39  ;;  %v528_v17 = vadd.f32 %v527_v50, %v5001_v41  ;;  %v959_v49 = vld [vmem:[#allocation8 + $0x7e8] sm:$0xff]  ;;  %v533_v11 = vpop.f32.mrb[27].mxu1 }
 0x189   :  { %2422 = vmatpush1.bf16.msra.mxu0 %v4157_v0  ;;  %2648 = vmatpush1.bf16.msra.mxu1 %v6251_v62  ;;  %v667_v0 = vmax.f32 %v427_v9, %v603_v35  ;;  %v671_v52 = vmax.f32 %v431_v63, %v607_v16  ;;  %v530_v58 = vadd.f32 %v529_v45, %v5010_v48  ;;  %v712_v63 = vld [vmem:[#allocation8 + $0x30] sm:$0xff] }
 0x18a   :  { %2423 = vmatprep.subr.bf16.mxu0 %v4166_v53  ;;  %2649 = vmatprep.subr.bf16.mxu1 %v4168_v37  ;;  %v5376_v31 = vpack.c.bf16 %v657_v46, %v653_v12  ;;  %v5379_v26 = vpack.c.bf16 %v670_v4, %v666_v43  ;;  %v4173_v3 = vcombine.low %v5337_v24, %v5339_v22  ;;  %v958_v53 = vld [vmem:[#allocation8 + $0x7e0] sm:$0xff]  ;;  %v955_v37 = vld [vmem:[#allocation8 + $0x7c8] sm:$0xff]  ;;  %v596_v30 = vmul.f32 0.01, %v528_v17  ;;  %v708_v22 = vld [vmem:[#allocation8 + $0x10] sm:$0xff] }
 0x18b   :  { %v532_v32 = vadd.f32 %v531_v44, %v5001_v41  ;;  %v5384_v9 = vpack.c.bf16 %v671_v52, %v667_v0  ;;  %v6252_v39 = vcombine.low %v5279_v34, %v5281_v59  ;;  %v4175_v1 = vcombine.low %v5341_v55, %v5351_v2  ;;  %v709_v59 = vld [vmem:[#allocation8 + $0x18] sm:$0xff]  ;;  %v716_v45 = vld [vmem:[#allocation8 + $0x50] sm:$0xff] }
 0x18c   :  { %v597_v35 = vmul.f32 0.01, %v530_v58  ;;  %v534_v24 = vadd.f32 %v533_v11, %v5010_v48  ;;  %v660_v12 = vmax.f32 %v528_v17, %v596_v30  ;;  %v4182_v57 = vcombine.high %v954_v15, %v958_v53  ;;  %v717_v44 = vld [vmem:[#allocation8 + $0x58] sm:$0xff] }
 0x18d   :  { %2424 = vmatpush1.bf16.msra.mxu0 %v6252_v39  ;;  %2650 = vmatpush1.bf16.msra.mxu1 %v4167_v19  ;;  %v600_v40 = vmul.f32 0.01, %v532_v32  ;;  %v4184_v34 = vcombine.high %v955_v37, %v959_v49  ;;  %v713_v19 = vld [vmem:[#allocation8 + $0x38] sm:$0xff]  ;;  %v4181_v55 = vcombine.low %v954_v15, %v958_v53  ;;  %v3938_v16 = vcombine.high %v708_v22, %v712_v63 }
 0x18e   :  { %2425 = vmatprep.subr.bf16.mxu0 %v4174_v60  ;;  %2651 = vmatprep.subr.bf16.mxu1 %v4176_v61  ;;  %v661_v5 = vmax.f32 %v530_v58, %v597_v35  ;;  %v601_v43 = vmul.f32 0.01, %v534_v24  ;;  %v4183_v60 = vcombine.low %v955_v37, %v959_v49  ;;  %v537_v61 = vpop.f32.mrb[28].mxu1  ;;  %v3940_v46 = vcombine.high %v709_v59, %v713_v19  ;;  %v720_v58 = vld [vmem:[#allocation8 + $0x70] sm:$0xff] }
 0x18f   :  { %2386 = vmatprep.mubr.bf16.mxu0 %v5384_v9  ;;  %2612 = vmatprep.mubr.bf16.mxu1 %v5384_v9  ;;  %v664_v2 = vmax.f32 %v532_v32, %v600_v40  ;;  %v538_v4 = vadd.f32 %v537_v61, %v5001_v41  ;;  %v539_v17 = vpop.f32.mrb[29].mxu1  ;;  %v3937_v30 = vcombine.low %v708_v22, %v712_v63  ;;  %v733_v61 = vld [vmem:[#allocation8 + $0xd8] sm:$0xff] }
 0x190   :  { %2387 = vmatmul.mubr.bf16.gmra.mrb[60].mxu0 %v5379_v26  ;;  %2613 = vmatmul.mubr.bf16.gmra.mrb[60].mxu1 %v5379_v26  ;;  %v665_v62 = vmax.f32 %v534_v24, %v601_v43  ;;  %v540_v52 = vadd.f32 %v539_v17, %v5010_v48  ;;  %v541_v15 = vpop.f32.mrb[30].mxu1  ;;  %v3939_v32 = vcombine.low %v709_v59, %v713_v19 }
 0x191   :  { %2426 = vmatpush1.bf16.msra.mxu0 %v4173_v3  ;;  %2652 = vmatpush1.bf16.msra.mxu1 %v4175_v1  ;;  %v5398_v50 = vpack.c.bf16 %v664_v2, %v660_v12  ;;  %v721_v3 = vld [vmem:[#allocation8 + $0x78] sm:$0xff]  ;;  %v604_v53 = vmul.f32 0.01, %v538_v4  ;;  %v542_v37 = vadd.f32 %v541_v15, %v5001_v41  ;;  %v543_v49 = vpop.f32.mrb[31].mxu1  ;;  %v724_v1 = vld [vmem:[#allocation8 + $0x90] sm:$0xff]  ;;  %v3946_v12 = vcombine.high %v716_v45, %v720_v58 }
 0x192   :  { %2429 = vmatprep.mubr.bf16.mxu0 %v5097_v7  ;;  %2655 = vmatprep.mubr.bf16.mxu1 %v5097_v7  ;;  %v5401_v0 = vpack.c.bf16 %v665_v62, %v661_v5  ;;  %v605_v11 = vmul.f32 0.01, %v540_v52  ;;  %v544_v39 = vadd.f32 %v543_v49, %v5010_v48  ;;  %v3948_v40 = vcombine.high %v717_v44, %v721_v3  ;;  %v729_v5 = vld [vmem:[#allocation8 + $0xb8] sm:$0xff]  ;;  %v736_v62 = vld [vmem:[#allocation8 + $0xf0] sm:$0xff] }
 0x193   :  { %2427 = vmatprep.subr.bf16.mxu0 %v4182_v57  ;;  %2653 = vmatprep.subr.bf16.mxu1 %v4184_v34  ;;  %v668_v35 = vmax.f32 %v538_v4, %v604_v53  ;;  %v608_v24 = vmul.f32 0.01, %v542_v37  ;;  %v728_v57 = vld [vmem:[#allocation8 + $0xb0] sm:$0xff]  ;;  %v725_v34 = vld [vmem:[#allocation8 + $0x98] sm:$0xff]  ;;  %v3945_v48 = vcombine.low %v716_v45, %v720_v58  ;;  %v3947_v63 = vcombine.low %v717_v44, %v721_v3 }
 0x194   :  { %v669_v43 = vmax.f32 %v540_v52, %v605_v11  ;;  %v609_v41 = vmul.f32 0.01, %v544_v39  ;;  %v3954_v19 = vcombine.high %v724_v1, %v728_v57  ;;  %v3953_v4 = vcombine.low %v724_v1, %v728_v57  ;;  %v740_v45 = vld [vmem:[#allocation8 + $0x110] sm:$0xff]  ;;  %v741_v44 = vld [vmem:[#allocation8 + $0x118] sm:$0xff] }
 0x195   :  { %2428 = vmatpush1.bf16.msra.mxu0 %v4181_v55  ;;  %2654 = vmatpush1.bf16.msra.mxu1 %v4183_v60  ;;  %v672_v22 = vmax.f32 %v542_v37, %v608_v24  ;;  %v3956_v55 = vcombine.high %v725_v34, %v729_v5  ;;  %v732_v60 = vld [vmem:[#allocation8 + $0xd0] sm:$0xff]  ;;  %v3955_v17 = vcombine.low %v725_v34, %v729_v5  ;;  %v745_v3 = vld [vmem:[#allocation8 + $0x138] sm:$0xff] }
 0x196   :  { %2736 = vmatprep.subr.bf16.mxu0 %v3938_v16  ;;  %2962 = vmatprep.subr.bf16.mxu1 %v3940_v46  ;;  %v673_v59 = vmax.f32 %v544_v39, %v609_v41  ;;  %v737_v46 = vld [vmem:[#allocation8 + $0xf8] sm:$0xff]  ;;  %v3962_v52 = vcombine.high %v732_v60, %v736_v62  ;;  %v744_v58 = vld [vmem:[#allocation8 + $0x130] sm:$0xff]  ;;  %v3961_v53 = vcombine.low %v732_v60, %v736_v62 }
 0x197   :  { %v5410_v2 = vpack.c.bf16 %v672_v22, %v668_v35  ;;  %v3964_v15 = vcombine.high %v733_v61, %v737_v46  ;;  %v3963_v37 = vcombine.low %v733_v61, %v737_v46  ;;  %v3970_v49 = vcombine.high %v740_v45, %v744_v58  ;;  %v752_v11 = vld [vmem:[#allocation8 + $0x170] sm:$0xff]  ;;  %v749_v39 = vld [vmem:[#allocation8 + $0x158] sm:$0xff] }
 0x198   :  { %2430 = vmatmul.mubr.bf16.vlgmr.msra.gmra.mrb[32].mxu0 %v5094_v14  ;;  %2656 = vmatmul.mubr.bf16.vlgmr.msra.gmra.mrb[32].mxu1 %v5094_v14  ;;  %v5412_v16 = vpack.c.bf16 %v673_v59, %v669_v43  ;;  %v753_v1 = vld [vmem:[#allocation8 + $0x178] sm:$0xff]  ;;  %v3969_v35 = vcombine.low %v740_v45, %v744_v58  ;;  %v3971_v24 = vcombine.low %v741_v44, %v745_v3  ;;  %v760_v34 = vld [vmem:[#allocation8 + $0x1b0] sm:$0xff] }
 0x199   :  { %2737 = vmatpush1.bf16.msra.mxu0 %v3937_v30  ;;  %2963 = vmatpush1.bf16.msra.mxu1 %v3939_v32  ;;  %v3972_v30 = vcombine.high %v741_v44, %v745_v3  ;;  %v748_v32 = vld [vmem:[#allocation8 + $0x150] sm:$0xff]  ;;  %v3980_v57 = vcombine.high %v749_v39, %v753_v1  ;;  %v757_v5 = vld [vmem:[#allocation8 + $0x198] sm:$0xff]  ;;  %v3979_v22 = vcombine.low %v749_v39, %v753_v1 }
 0x19a   :  { %2439 = vmatprep.mubr.bf16.mxu0 %v5151_v23  ;;  %2665 = vmatprep.mubr.bf16.mxu1 %v5151_v23  ;;  %v761_v43 = vld [vmem:[#allocation8 + $0x1b8] sm:$0xff]  ;;  %v3977_v41 = vcombine.low %v748_v32, %v752_v11  ;;  %v764_v59 = vld [vmem:[#allocation8 + $0x1d0] sm:$0xff] }
 0x19b   :  { %2738 = vmatprep.subr.bf16.mxu0 %v3946_v12  ;;  %2964 = vmatprep.subr.bf16.mxu1 %v3948_v40  ;;  %v756_v12 = vld [vmem:[#allocation8 + $0x190] sm:$0xff]  ;;  %v3978_v40 = vcombine.high %v748_v32, %v752_v11  ;;  %v769_v60 = vld [vmem:[#allocation8 + $0x1f8] sm:$0xff]  ;;  %v3987_v61 = vcombine.low %v757_v5, %v761_v43 }
 0x19c   :  { %v3985_v62 = vcombine.low %v756_v12, %v760_v34  ;;  %v772_v46 = vld [vmem:[#allocation8 + $0x210] sm:$0xff]  ;;  %v785_v32 = vld [vmem:[#allocation8 + $0x278] sm:$0xff] }
 0x19d   :  { %2739 = vmatpush1.bf16.msra.mxu0 %v3945_v48  ;;  %2965 = vmatpush1.bf16.msra.mxu1 %v3947_v63  ;;  %v3986_v48 = vcombine.high %v756_v12, %v760_v34  ;;  %v3988_v63 = vcombine.high %v757_v5, %v761_v43  ;;  %v776_v45 = vld [vmem:[#allocation8 + $0x230] sm:$0xff] }
 0x19e   :  { %2740 = vmatprep.subr.bf16.mxu0 %v3954_v19  ;;  %2966 = vmatprep.subr.bf16.mxu1 %v3956_v55  ;;  %v768_v19 = vld [vmem:[#allocation8 + $0x1f0] sm:$0xff]  ;;  %v765_v55 = vld [vmem:[#allocation8 + $0x1d8] sm:$0xff]  ;;  %v4002_v3 = vcombine.high %v772_v46, %v776_v45  ;;  %v4001_v11 = vcombine.low %v772_v46, %v776_v45 }
 0x19f   :  { %v3993_v58 = vcombine.low %v764_v59, %v768_v19  ;;  %v3995_v44 = vcombine.low %v765_v55, %v769_v60  ;;  %v788_v1 = vld [vmem:[#allocation8 + $0x290] sm:$0xff] }
 0x1a0   :  { %2440 = vmatmul.mubr.bf16.gmra.mrb[36].mxu0 %v5148_v29  ;;  %2666 = vmatmul.mubr.bf16.gmra.mrb[36].mxu1 %v5148_v29  ;;  %v792_v12 = vld [vmem:[#allocation8 + $0x2b0] sm:$0xff] }
 0x1a1   :  { %2741 = vmatpush1.bf16.msra.mxu0 %v3953_v4  ;;  %2967 = vmatpush1.bf16.msra.mxu1 %v3955_v17  ;;  %v3994_v4 = vcombine.high %v764_v59, %v768_v19  ;;  %v3996_v17 = vcombine.high %v765_v55, %v769_v60  ;;  %v4018_v43 = vcombine.high %v788_v1, %v792_v12  ;;  %v801_v59 = vld [vmem:[#allocation8 + $0x2f8] sm:$0xff]  ;;  %v804_v60 = vld [vmem:[#allocation8 + $0x310] sm:$0xff] }
 0x1a2   :  { %2449 = vmatprep.mubr.bf16.mxu0 %v5209_v13  ;;  %2675 = vmatprep.mubr.bf16.mxu1 %v5209_v13  ;;  %v4017_v19 = vcombine.low %v788_v1, %v792_v12  ;;  %v808_v46 = vld [vmem:[#allocation8 + $0x330] sm:$0xff] }
 0x1a3   :  { %2742 = vmatprep.subr.bf16.mxu0 %v3962_v52  ;;  %2968 = vmatprep.subr.bf16.mxu1 %v3964_v15  ;;  %v773_v52 = vld [vmem:[#allocation8 + $0x218] sm:$0xff]  ;;  %v824_v1 = vld [vmem:[#allocation8 + $0x3b0] sm:$0xff] }
 0x1a4   :  { %v777_v15 = vld [vmem:[#allocation8 + $0x238] sm:$0xff] }
 0x1a5   :  { %2743 = vmatpush1.bf16.msra.mxu0 %v3961_v53  ;;  %2969 = vmatpush1.bf16.msra.mxu1 %v3963_v37  ;;  %v4004_v53 = vcombine.high %v773_v52, %v777_v15  ;;  %v780_v37 = vld [vmem:[#allocation8 + $0x250] sm:$0xff]  ;;  %v4003_v39 = vcombine.low %v773_v52, %v777_v15  ;;  %v4034_v15 = vcombine.high %v804_v60, %v808_v46 }
 0x1a6   :  { %2744 = vmatprep.subr.bf16.mxu0 %v3970_v49  ;;  %2970 = vmatprep.subr.bf16.mxu1 %v3972_v30  ;;  %v784_v49 = vld [vmem:[#allocation8 + $0x270] sm:$0xff]  ;;  %v781_v30 = vld [vmem:[#allocation8 + $0x258] sm:$0xff] }
 0x1a7   :  { %v4009_v34 = vcombine.low %v780_v37, %v784_v49  ;;  %v4011_v5 = vcombine.low %v781_v30, %v785_v32 }
 0x1a8   :  { %2450 = vmatmul.mubr.bf16.gmra.mrb[40].mxu0 %v5206_v51  ;;  %2676 = vmatmul.mubr.bf16.gmra.mrb[40].mxu1 %v5206_v51 }
 0x1a9   :  { %2745 = vmatpush1.bf16.msra.mxu0 %v3969_v35  ;;  %2971 = vmatpush1.bf16.msra.mxu1 %v3971_v24  ;;  %v4010_v35 = vcombine.high %v780_v37, %v784_v49  ;;  %v4012_v24 = vcombine.high %v781_v30, %v785_v32  ;;  %v817_v37 = vld [vmem:[#allocation8 + $0x378] sm:$0xff]  ;;  %v4033_v49 = vcombine.low %v804_v60, %v808_v46  ;;  %v820_v32 = vld [vmem:[#allocation8 + $0x390] sm:$0xff] }
 0x1aa   :  { %2459 = vmatprep.mubr.bf16.mxu0 %v5263_v42  ;;  %2685 = vmatprep.mubr.bf16.mxu1 %v5263_v42  ;;  %v840_v60 = vld [vmem:[#allocation8 + $0x430] sm:$0xff] }
 0x1ab   :  { %2746 = vmatprep.subr.bf16.mxu0 %v3978_v40  ;;  %2972 = vmatprep.subr.bf16.mxu1 %v3980_v57  ;;  %v789_v40 = vld [vmem:[#allocation8 + $0x298] sm:$0xff] }
 0x1ac   :  { %v793_v57 = vld [vmem:[#allocation8 + $0x2b8] sm:$0xff] }
 0x1ad   :  { %2747 = vmatpush1.bf16.msra.mxu0 %v3977_v41  ;;  %2973 = vmatpush1.bf16.msra.mxu1 %v3979_v22  ;;  %v4020_v41 = vcombine.high %v789_v40, %v793_v57  ;;  %v796_v22 = vld [vmem:[#allocation8 + $0x2d0] sm:$0xff]  ;;  %v4019_v55 = vcombine.low %v789_v40, %v793_v57  ;;  %v4050_v57 = vcombine.high %v820_v32, %v824_v1 }
 0x1ae   :  { %2748 = vmatprep.subr.bf16.mxu0 %v3986_v48  ;;  %2974 = vmatprep.subr.bf16.mxu1 %v3988_v63  ;;  %v800_v48 = vld [vmem:[#allocation8 + $0x2f0] sm:$0xff]  ;;  %v797_v63 = vld [vmem:[#allocation8 + $0x2d8] sm:$0xff] }
 0x1af   :  { %v4025_v45 = vcombine.low %v796_v22, %v800_v48  ;;  %v4027_v52 = vcombine.low %v797_v63, %v801_v59 }
 0x1b0   :  { %2460 = vmatmul.mubr.bf16.gmra.mrb[44].mxu0 %v5260_v38  ;;  %2686 = vmatmul.mubr.bf16.gmra.mrb[44].mxu1 %v5260_v38 }
 0x1b1   :  { %2749 = vmatpush1.bf16.msra.mxu0 %v3985_v62  ;;  %2975 = vmatpush1.bf16.msra.mxu1 %v3987_v61  ;;  %v4026_v62 = vcombine.high %v796_v22, %v800_v48  ;;  %v4028_v61 = vcombine.high %v797_v63, %v801_v59  ;;  %v833_v22 = vld [vmem:[#allocation8 + $0x3f8] sm:$0xff]  ;;  %v4049_v48 = vcombine.low %v820_v32, %v824_v1  ;;  %v6253_v32 = vld [vmem:[#allocation18_spill] sm:$0xff] }
 0x1b2   :  { %2469 = vmatprep.mubr.bf16.mxu0 %v5321_v18  ;;  %2695 = vmatprep.mubr.bf16.mxu1 %v5321_v18  ;;  %v857_v1 = vld [vmem:[#allocation8 + $0x4b8] sm:$0xff] }
 0x1b3   :  { %2750 = vmatprep.subr.bf16.mxu0 %v3994_v4  ;;  %2976 = vmatprep.subr.bf16.mxu1 %v3996_v17  ;;  %v805_v4 = vld [vmem:[#allocation8 + $0x318] sm:$0xff] }
 0x1b4   :  { %v809_v17 = vld [vmem:[#allocation8 + $0x338] sm:$0xff] }
 0x1b5   :  { %2751 = vmatpush1.bf16.msra.mxu0 %v3993_v58  ;;  %2977 = vmatpush1.bf16.msra.mxu1 %v3995_v44  ;;  %v4036_v58 = vcombine.high %v805_v4, %v809_v17  ;;  %v812_v44 = vld [vmem:[#allocation8 + $0x350] sm:$0xff]  ;;  %v4035_v30 = vcombine.low %v805_v4, %v809_v17 }
 0x1b6   :  { %2752 = vmatprep.subr.bf16.mxu0 %v4002_v3  ;;  %2978 = vmatprep.subr.bf16.mxu1 %v4004_v53  ;;  %v816_v3 = vld [vmem:[#allocation8 + $0x370] sm:$0xff]  ;;  %v813_v53 = vld [vmem:[#allocation8 + $0x358] sm:$0xff] }
 0x1b7   :  { %v4041_v12 = vcombine.low %v812_v44, %v816_v3  ;;  %v4043_v40 = vcombine.low %v813_v53, %v817_v37 }
 0x1b8   :  { %2470 = vmatmul.mubr.bf16.gmra.mrb[48].mxu0 %v5318_v8  ;;  %2696 = vmatmul.mubr.bf16.gmra.mrb[48].mxu1 %v5318_v8 }
 0x1b9   :  { %2753 = vmatpush1.bf16.msra.mxu0 %v4001_v11  ;;  %2979 = vmatpush1.bf16.msra.mxu1 %v4003_v39  ;;  %v4042_v11 = vcombine.high %v812_v44, %v816_v3  ;;  %v4044_v39 = vcombine.high %v813_v53, %v817_v37  ;;  %v845_v44 = vld [vmem:[#allocation8 + $0x458] sm:$0xff] }
 0x1ba   :  { %2479 = vmatprep.mubr.bf16.mxu0 %v5376_v31  ;;  %2705 = vmatprep.mubr.bf16.mxu1 %v5376_v31  ;;  %v849_v3 = vld [vmem:[#allocation8 + $0x478] sm:$0xff] }
 0x1bb   :  { %2754 = vmatprep.subr.bf16.mxu0 %v4010_v35  ;;  %2980 = vmatprep.subr.bf16.mxu1 %v4012_v24  ;;  %v821_v35 = vld [vmem:[#allocation8 + $0x398] sm:$0xff] }
 0x1bc   :  { %v825_v24 = vld [vmem:[#allocation8 + $0x3b8] sm:$0xff] }
 0x1bd   :  { %2755 = vmatpush1.bf16.msra.mxu0 %v4009_v34  ;;  %2981 = vmatpush1.bf16.msra.mxu1 %v4011_v5  ;;  %v4052_v34 = vcombine.high %v821_v35, %v825_v24  ;;  %v828_v5 = vld [vmem:[#allocation8 + $0x3d0] sm:$0xff]  ;;  %v4051_v63 = vcombine.low %v821_v35, %v825_v24  ;;  %v6254_v35 = vld [vmem:[#allocation20_spill] sm:$0xff] }
 0x1be   :  { %2756 = vmatprep.subr.bf16.mxu0 %v4018_v43  ;;  %2982 = vmatprep.subr.bf16.mxu1 %v4020_v41  ;;  %v832_v43 = vld [vmem:[#allocation8 + $0x3f0] sm:$0xff]  ;;  %v829_v41 = vld [vmem:[#allocation8 + $0x3d8] sm:$0xff] }
 0x1bf   :  { %v4058_v59 = vcombine.high %v828_v5, %v832_v43  ;;  %v4057_v46 = vcombine.low %v828_v5, %v832_v43  ;;  %v4059_v4 = vcombine.low %v829_v41, %v833_v22  ;;  %v861_v43 = vld [vmem:[#allocation8 + $0x4d8] sm:$0xff] }
 0x1c0   :  { %2480 = vmatmul.mubr.bf16.gmra.mrb[52].mxu0 %v5373_v28  ;;  %2706 = vmatmul.mubr.bf16.gmra.mrb[52].mxu1 %v5373_v28 }
 0x1c1   :  { %2757 = vmatpush1.bf16.msra.mxu0 %v4017_v19  ;;  %2983 = vmatpush1.bf16.msra.mxu1 %v4019_v55  ;;  %v4060_v19 = vcombine.high %v829_v41, %v833_v22  ;;  %v836_v55 = vld [vmem:[#allocation8 + $0x410] sm:$0xff]  ;;  %v865_v41 = vld [vmem:[#allocation8 + $0x4f8] sm:$0xff] }
 0x1c2   :  { %2489 = vmatprep.mubr.bf16.mxu0 %v5401_v0  ;;  %2715 = vmatprep.mubr.bf16.mxu1 %v5401_v0  ;;  %v4066_v17 = vcombine.high %v836_v55, %v840_v60 }
 0x1c3   :  { %2758 = vmatprep.subr.bf16.mxu0 %v4026_v62  ;;  %2984 = vmatprep.subr.bf16.mxu1 %v4028_v61  ;;  %v837_v62 = vld [vmem:[#allocation8 + $0x418] sm:$0xff] }
 0x1c4   :  { %v841_v61 = vld [vmem:[#allocation8 + $0x438] sm:$0xff] }
 0x1c5   :  { %2759 = vmatpush1.bf16.msra.mxu0 %v4025_v45  ;;  %2985 = vmatpush1.bf16.msra.mxu1 %v4027_v52  ;;  %v4068_v45 = vcombine.high %v837_v62, %v841_v61  ;;  %v844_v52 = vld [vmem:[#allocation8 + $0x450] sm:$0xff]  ;;  %v4067_v53 = vcombine.low %v837_v62, %v841_v61  ;;  %v869_v62 = vld [vmem:[#allocation8 + $0x518] sm:$0xff] }
 0x1c6   :  { %2760 = vmatprep.subr.bf16.mxu0 %v4034_v15  ;;  %2986 = vmatprep.subr.bf16.mxu1 %v4036_v58  ;;  %v848_v15 = vld [vmem:[#allocation8 + $0x470] sm:$0xff]  ;;  %v4065_v58 = vcombine.low %v836_v55, %v840_v60  ;;  %v4092_v55 = vcombine.high %v861_v43, %v865_v41  ;;  %v873_v61 = vld [vmem:[#allocation8 + $0x538] sm:$0xff] }
 0x1c7   :  { %v4074_v37 = vcombine.high %v844_v52, %v848_v15 }
 0x1c8   :  { %2490 = vmatmul.mubr.bf16.gmra.mrb[56].mxu0 %v5398_v50  ;;  %2716 = vmatmul.mubr.bf16.gmra.mrb[56].mxu1 %v5398_v50 }
 0x1c9   :  { %2761 = vmatpush1.bf16.msra.mxu0 %v4033_v49  ;;  %2987 = vmatpush1.bf16.msra.mxu1 %v4035_v30  ;;  %v852_v49 = vld [vmem:[#allocation8 + $0x490] sm:$0xff] }
 0x1ca   :  { %2499 = vmatprep.mubr.bf16.mxu0 %v5412_v16  ;;  %2725 = vmatprep.mubr.bf16.mxu1 %v5412_v16  ;;  %v856_v30 = vld [vmem:[#allocation8 + $0x4b0] sm:$0xff] }
 0x1cb   :  { %2762 = vmatprep.subr.bf16.mxu0 %v4042_v11  ;;  %2988 = vmatprep.subr.bf16.mxu1 %v4044_v39  ;;  %v4073_v11 = vcombine.low %v844_v52, %v848_v15  ;;  %v853_v39 = vld [vmem:[#allocation8 + $0x498] sm:$0xff]  ;;  %v4082_v24 = vcombine.high %v852_v49, %v856_v30  ;;  %v4081_v5 = vcombine.low %v852_v49, %v856_v30  ;;  %v880_v52 = vld [vmem:[#allocation8 + $0x570] sm:$0xff] }
 0x1cc   :  { %v4083_v22 = vcombine.low %v853_v39, %v857_v1  ;;  %v888_v49 = vld [vmem:[#allocation8 + $0x5b0] sm:$0xff] }
 0x1cd   :  { %2763 = vmatpush1.bf16.msra.mxu0 %v4041_v12  ;;  %2989 = vmatpush1.bf16.msra.mxu1 %v4043_v40  ;;  %v4075_v12 = vcombine.low %v845_v44, %v849_v3  ;;  %v4084_v40 = vcombine.high %v853_v39, %v857_v1 }
 0x1ce   :  { %2764 = vmatprep.subr.bf16.mxu0 %v4050_v57  ;;  %2990 = vmatprep.subr.bf16.mxu1 %v4052_v34  ;;  %v860_v57 = vld [vmem:[#allocation8 + $0x4d0] sm:$0xff] }
 0x1cf   :  { %v864_v34 = vld [vmem:[#allocation8 + $0x4f0] sm:$0xff] }
 0x1d0   :  { %2500 = vmatmul.mubr.bf16.gmra.mrb[60].mxu0 %v5410_v2  ;;  %2726 = vmatmul.mubr.bf16.gmra.mrb[60].mxu1 %v5410_v2  ;;  %v4089_v60 = vcombine.low %v860_v57, %v864_v34 }
 0x1d1   :  { %2765 = vmatpush1.bf16.msra.mxu0 %v4049_v48  ;;  %2768 = vmatprep.mubr.bf16.mxu0 %v4977_v54  ;;  %v4090_v48 = vcombine.high %v860_v57, %v864_v34  ;;  %v897_v57 = vld [vmem:[#allocation8 + $0x5f8] sm:$0xff] }
 0x1d2   :  { %2991 = vmatpush1.bf16.msra.mxu1 %v4051_v63  ;;  %2994 = vmatprep.mubr.bf16.mxu1 %v4977_v54  ;;  %v4076_v54 = vcombine.high %v845_v44, %v849_v3  ;;  %v868_v63 = vld [vmem:[#allocation8 + $0x510] sm:$0xff]  ;;  %v881_v44 = vld [vmem:[#allocation8 + $0x578] sm:$0xff]  ;;  %v4099_v3 = vcombine.low %v869_v62, %v873_v61 }
 0x1d3   :  { %2766 = vmatprep.subr.bf16.mxu0 %v4058_v59  ;;  %2992 = vmatprep.subr.bf16.mxu1 %v4060_v19  ;;  %v872_v59 = vld [vmem:[#allocation8 + $0x530] sm:$0xff] }
 0x1d4   :  { %v6255_v19 = vld [vmem:[#allocation19_spill] sm:$0xff]  ;;  %v4097_v15 = vcombine.low %v868_v63, %v872_v59 }
 0x1d5   :  { %2767 = vmatpush1.bf16.msra.mxu0 %v4057_v46  ;;  %v4098_v46 = vcombine.high %v868_v63, %v872_v59 }
 0x1d6   :  { %2993 = vmatpush1.bf16.msra.mxu1 %v4059_v4  ;;  %2849 = vmatprep.subr.bf16.mxu0 %v4066_v17  ;;  %v4091_v4 = vcombine.low %v861_v43, %v865_v41  ;;  %v4100_v17 = vcombine.high %v869_v62, %v873_v61  ;;  %v904_v43 = vld [vmem:[#allocation8 + $0x630] sm:$0xff]  ;;  %v909_v61 = vld [vmem:[#allocation8 + $0x658] sm:$0xff] }
 0x1d7   :  { %3075 = vmatprep.subr.bf16.mxu1 %v4068_v45  ;;  %v876_v45 = vld [vmem:[#allocation8 + $0x550] sm:$0xff] }
 0x1d8   :  { %2769 = vmatmul.mubr.bf16.vlgmr.msra.gmra.mrb[64].mxu0 %v6253_v32  ;;  %v4105_v30 = vcombine.low %v876_v45, %v880_v52 }
 0x1d9   :  { %2850 = vmatpush1.bf16.msra.mxu0 %v4065_v58  ;;  %2995 = vmatmul.mubr.bf16.vlgmr.msra.gmra.mrb[64].mxu1 %v6253_v32  ;;  %v877_v58 = vld [vmem:[#allocation8 + $0x558] sm:$0xff] }
 0x1da   :  { %2778 = vmatprep.mubr.bf16.mxu0 %v6254_v35  ;;  %3004 = vmatprep.mubr.bf16.mxu1 %v6254_v35  ;;  %v885_v32 = vld [vmem:[#allocation8 + $0x598] sm:$0xff]  ;;  %v4107_v39 = vcombine.low %v877_v58, %v881_v44  ;;  %v892_v35 = vld [vmem:[#allocation8 + $0x5d0] sm:$0xff] }
 0x1db   :  { %3076 = vmatpush1.bf16.msra.mxu1 %v4067_v53  ;;  %2851 = vmatprep.subr.bf16.mxu0 %v4074_v37  ;;  %v4106_v53 = vcombine.high %v876_v45, %v880_v52  ;;  %v884_v37 = vld [vmem:[#allocation8 + $0x590] sm:$0xff] }
 0x1dc   :  { %3077 = vmatprep.subr.bf16.mxu1 %v4076_v54  ;;  %v889_v54 = vld [vmem:[#allocation8 + $0x5b8] sm:$0xff]  ;;  %v920_v45 = vld [vmem:[#allocation8 + $0x6b0] sm:$0xff] }
 0x1dd   :  { %2852 = vmatpush1.bf16.msra.mxu0 %v4073_v11  ;;  %v4114_v11 = vcombine.high %v884_v37, %v888_v49  ;;  %v4116_v1 = vcombine.high %v885_v32, %v889_v54 }
 0x1de   :  { %2853 = vmatprep.subr.bf16.mxu0 %v4082_v24  ;;  %v896_v24 = vld [vmem:[#allocation8 + $0x5f0] sm:$0xff] }
 0x1df   :  { %3078 = vmatpush1.bf16.msra.mxu1 %v4075_v12  ;;  %v4113_v12 = vcombine.low %v884_v37, %v888_v49  ;;  %v4122_v34 = vcombine.high %v892_v35, %v896_v24  ;;  %v4121_v41 = vcombine.low %v892_v35, %v896_v24  ;;  %v924_v37 = vld [vmem:[#allocation8 + $0x6d0] sm:$0xff]  ;;  %v933_v35 = vld [vmem:[#allocation8 + $0x718] sm:$0xff] }
 0x1e0   :  { %2779 = vmatmul.mubr.bf16.gmra.mrb[68].mxu0 %v6255_v19  ;;  %3079 = vmatprep.subr.bf16.mxu1 %v4084_v40  ;;  %v893_v40 = vld [vmem:[#allocation8 + $0x5d8] sm:$0xff]  ;;  %v928_v49 = vld [vmem:[#allocation8 + $0x6f0] sm:$0xff] }
 0x1e1   :  { %2854 = vmatpush1.bf16.msra.mxu0 %v4081_v5  ;;  %3005 = vmatmul.mubr.bf16.gmra.mrb[68].mxu1 %v6255_v19  ;;  %v900_v5 = vld [vmem:[#allocation8 + $0x610] sm:$0xff]  ;;  %v4123_v59 = vcombine.low %v893_v40, %v897_v57  ;;  %v937_v24 = vld [vmem:[#allocation8 + $0x738] sm:$0xff] }
 0x1e2   :  { %2788 = vmatprep.mubr.bf16.mxu0 %v5104_v33  ;;  %3014 = vmatprep.mubr.bf16.mxu1 %v5104_v33  ;;  %v4108_v33 = vcombine.high %v877_v58, %v881_v44  ;;  %v4130_v63 = vcombine.high %v900_v5, %v904_v43  ;;  %v4129_v62 = vcombine.low %v900_v5, %v904_v43  ;;  %v921_v58 = vld [vmem:[#allocation8 + $0x6b8] sm:$0xff] }
 0x1e3   :  { %3080 = vmatpush1.bf16.msra.mxu1 %v4083_v22  ;;  %2855 = vmatprep.subr.bf16.mxu0 %v4090_v48  ;;  %v901_v22 = vld [vmem:[#allocation8 + $0x618] sm:$0xff] }
 0x1e4   :  { %3081 = vmatprep.subr.bf16.mxu1 %v4092_v55  ;;  %v905_v48 = vld [vmem:[#allocation8 + $0x638] sm:$0xff]  ;;  %v908_v55 = vld [vmem:[#allocation8 + $0x650] sm:$0xff] }
 0x1e5   :  { %2856 = vmatpush1.bf16.msra.mxu0 %v4089_v60  ;;  %v4132_v19 = vcombine.high %v901_v22, %v905_v48  ;;  %v912_v60 = vld [vmem:[#allocation8 + $0x670] sm:$0xff]  ;;  %v941_v43 = vld [vmem:[#allocation8 + $0x758] sm:$0xff] }
 0x1e6   :  { %2857 = vmatprep.subr.bf16.mxu0 %v4098_v46  ;;  %v913_v46 = vld [vmem:[#allocation8 + $0x678] sm:$0xff]  ;;  %v4137_v52 = vcombine.low %v908_v55, %v912_v60 }
 0x1e7   :  { %3082 = vmatpush1.bf16.msra.mxu1 %v4091_v4  ;;  %v4138_v4 = vcombine.high %v908_v55, %v912_v60 }
 0x1e8   :  { %2789 = vmatmul.mubr.bf16.gmra.mrb[72].mxu0 %v5100_v27  ;;  %3083 = vmatprep.subr.bf16.mxu1 %v4100_v17  ;;  %v916_v17 = vld [vmem:[#allocation8 + $0x690] sm:$0xff] }
 0x1e9   :  { %2858 = vmatpush1.bf16.msra.mxu0 %v4097_v15  ;;  %3015 = vmatmul.mubr.bf16.gmra.mrb[72].mxu1 %v5100_v27  ;;  %v4115_v27 = vcombine.low %v885_v32, %v889_v54  ;;  %v917_v15 = vld [vmem:[#allocation8 + $0x698] sm:$0xff]  ;;  %v4146_v44 = vcombine.high %v916_v17, %v920_v45  ;;  %v4154_v54 = vcombine.high %v924_v37, %v928_v49 }
 0x1ea   :  { %2798 = vmatprep.mubr.bf16.mxu0 %v5158_v6  ;;  %3024 = vmatprep.mubr.bf16.mxu1 %v5158_v6  ;;  %v4124_v6 = vcombine.high %v893_v40, %v897_v57  ;;  %v929_v32 = vld [vmem:[#allocation8 + $0x6f8] sm:$0xff]  ;;  %v4164_v57 = vcombine.high %v933_v35, %v937_v24 }
 0x1eb   :  { %3084 = vmatpush1.bf16.msra.mxu1 %v4099_v3  ;;  %2859 = vmatprep.subr.bf16.mxu0 %v4106_v53  ;;  %v4139_v3 = vcombine.low %v909_v61, %v913_v46  ;;  %v4148_v53 = vcombine.high %v917_v15, %v921_v58 }
 0x1ec   :  { %3085 = vmatprep.subr.bf16.mxu1 %v4108_v33  ;;  %v4145_v33 = vcombine.low %v916_v17, %v920_v45  ;;  %v961_v17 = vld [vmem:[#allocation8 + $0x7f8] sm:$0xff] }
 0x1ed   :  { %2860 = vmatpush1.bf16.msra.mxu0 %v4105_v30  ;;  %v925_v30 = vld [vmem:[#allocation8 + $0x6d8] sm:$0xff] }
 0x1ee   :  { %2861 = vmatprep.subr.bf16.mxu0 %v4114_v11  ;;  %v932_v11 = vld [vmem:[#allocation8 + $0x710] sm:$0xff]  ;;  %v4155_v40 = vcombine.low %v925_v30, %v929_v32 }
 0x1ef   :  { %3086 = vmatpush1.bf16.msra.mxu1 %v4107_v39  ;;  %v936_v39 = vld [vmem:[#allocation8 + $0x730] sm:$0xff] }
 0x1f0   :  { %2799 = vmatmul.mubr.bf16.gmra.mrb[76].mxu0 %v5154_v56  ;;  %3087 = vmatprep.subr.bf16.mxu1 %v4116_v1  ;;  %v4153_v1 = vcombine.low %v924_v37, %v928_v49  ;;  %v4161_v5 = vcombine.low %v932_v11, %v936_v39 }
 0x1f1   :  { %2862 = vmatpush1.bf16.msra.mxu0 %v4113_v12  ;;  %3025 = vmatmul.mubr.bf16.gmra.mrb[76].mxu1 %v5154_v56  ;;  %v4131_v56 = vcombine.low %v901_v22, %v905_v48  ;;  %v4162_v12 = vcombine.high %v932_v11, %v936_v39  ;;  %v948_v22 = vld [vmem:[#allocation8 + $0x790] sm:$0xff] }
 0x1f2   :  { %2808 = vmatprep.mubr.bf16.mxu0 %v5216_v10  ;;  %3034 = vmatprep.mubr.bf16.mxu1 %v5216_v10  ;;  %v4140_v10 = vcombine.high %v909_v61, %v913_v46  ;;  %v952_v48 = vld [vmem:[#allocation8 + $0x7b0] sm:$0xff] }
 0x1f3   :  { %3088 = vmatpush1.bf16.msra.mxu1 %v4115_v27  ;;  %2863 = vmatprep.subr.bf16.mxu0 %v4122_v34  ;;  %v940_v27 = vld [vmem:[#allocation8 + $0x750] sm:$0xff]  ;;  %v4178_v55 = vcombine.high %v948_v22, %v952_v48 }
 0x1f4   :  { %3089 = vmatprep.subr.bf16.mxu1 %v4124_v6  ;;  %v944_v34 = vld [vmem:[#allocation8 + $0x770] sm:$0xff]  ;;  %v945_v6 = vld [vmem:[#allocation8 + $0x778] sm:$0xff] }
 0x1f5   :  { %2864 = vmatpush1.bf16.msra.mxu0 %v4121_v41  ;;  %v4170_v41 = vcombine.high %v940_v27, %v944_v34  ;;  %v4171_v60 = vcombine.low %v941_v43, %v945_v6  ;;  %v956_v61 = vld [vmem:[#allocation8 + $0x7d0] sm:$0xff] }
 0x1f6   :  { %2865 = vmatprep.subr.bf16.mxu0 %v4130_v63  ;;  %v4169_v63 = vcombine.low %v940_v27, %v944_v34  ;;  %v960_v46 = vld [vmem:[#allocation8 + $0x7f0] sm:$0xff] }
 0x1f7   :  { %3090 = vmatpush1.bf16.msra.mxu1 %v4123_v59  ;;  %v949_v59 = vld [vmem:[#allocation8 + $0x798] sm:$0xff]  ;;  %v4186_v45 = vcombine.high %v956_v61, %v960_v46 }
 0x1f8   :  { %2809 = vmatmul.mubr.bf16.gmra.mrb[80].mxu0 %v5212_v20  ;;  %3091 = vmatprep.subr.bf16.mxu1 %v4132_v19  ;;  %v953_v19 = vld [vmem:[#allocation8 + $0x7b8] sm:$0xff] }
 0x1f9   :  { %2866 = vmatpush1.bf16.msra.mxu0 %v4129_v62  ;;  %3035 = vmatmul.mubr.bf16.gmra.mrb[80].mxu1 %v5212_v20  ;;  %v4147_v20 = vcombine.low %v917_v15, %v921_v58  ;;  %v4180_v62 = vcombine.high %v949_v59, %v953_v19 }
 0x1fa   :  { %2818 = vmatprep.mubr.bf16.mxu0 %v5270_v21  ;;  %3044 = vmatprep.mubr.bf16.mxu1 %v5270_v21  ;;  %v4156_v21 = vcombine.high %v925_v30, %v929_v32 }
 0x1fb   :  { %3092 = vmatpush1.bf16.msra.mxu1 %v4131_v56  ;;  %2867 = vmatprep.subr.bf16.mxu0 %v4138_v4  ;;  %v4177_v56 = vcombine.low %v948_v22, %v952_v48  ;;  %v957_v4 = vld [vmem:[#allocation8 + $0x7d8] sm:$0xff] }
 0x1fc   :  { %3093 = vmatprep.subr.bf16.mxu1 %v4140_v10  ;;  %v4185_v10 = vcombine.low %v956_v61, %v960_v46 }
 0x1fd   :  { %2868 = vmatpush1.bf16.msra.mxu0 %v4137_v52  ;;  %v4187_v52 = vcombine.low %v957_v4, %v961_v17 }
 0x1fe   :  { %2869 = vmatprep.subr.bf16.mxu0 %v4146_v44 }
 0x1ff   :  { %3094 = vmatpush1.bf16.msra.mxu1 %v4139_v3 }
 0x200   :  { %2819 = vmatmul.mubr.bf16.gmra.mrb[84].mxu0 %v5266_v36  ;;  %3095 = vmatprep.subr.bf16.mxu1 %v4148_v53 }
 0x201   :  { %2870 = vmatpush1.bf16.msra.mxu0 %v4145_v33  ;;  %3045 = vmatmul.mubr.bf16.gmra.mrb[84].mxu1 %v5266_v36  ;;  %v4163_v36 = vcombine.low %v933_v35, %v937_v24 }
 0x202   :  { %2828 = vmatprep.mubr.bf16.mxu0 %v5328_v25  ;;  %3054 = vmatprep.mubr.bf16.mxu1 %v5328_v25  ;;  %v4172_v25 = vcombine.high %v941_v43, %v945_v6 }
 0x203   :  { %3096 = vmatpush1.bf16.msra.mxu1 %v4147_v20  ;;  %2871 = vmatprep.subr.bf16.mxu0 %v4154_v54 }
 0x204   :  { %3097 = vmatprep.subr.bf16.mxu1 %v4156_v21 }
 0x205   :  { %2872 = vmatpush1.bf16.msra.mxu0 %v4153_v1 }
 0x206   :  { %2873 = vmatprep.subr.bf16.mxu0 %v4162_v12 }
 0x207   :  { %3098 = vmatpush1.bf16.msra.mxu1 %v4155_v40 }
 0x208   :  { %2829 = vmatmul.mubr.bf16.gmra.mrb[88].mxu0 %v5324_v47  ;;  %3099 = vmatprep.subr.bf16.mxu1 %v4164_v57 }
 0x209   :  { %2874 = vmatpush1.bf16.msra.mxu0 %v4161_v5  ;;  %3055 = vmatmul.mubr.bf16.gmra.mrb[88].mxu1 %v5324_v47  ;;  %v4179_v47 = vcombine.low %v949_v59, %v953_v19 }
 0x20a   :  { %2838 = vmatprep.mubr.bf16.mxu0 %v5384_v9  ;;  %3064 = vmatprep.mubr.bf16.mxu1 %v5384_v9  ;;  %v4188_v9 = vcombine.high %v957_v4, %v961_v17 }
 0x20b   :  { %3100 = vmatpush1.bf16.msra.mxu1 %v4163_v36  ;;  %2875 = vmatprep.subr.bf16.mxu0 %v4170_v41 }
 0x20c   :  { %3101 = vmatprep.subr.bf16.mxu1 %v4172_v25 }
 0x20d   :  { %2876 = vmatpush1.bf16.msra.mxu0 %v4169_v63 }
 0x20e   :  { %2877 = vmatprep.subr.bf16.mxu0 %v4178_v55 }
 0x20f   :  { %3102 = vmatpush1.bf16.msra.mxu1 %v4171_v60 }
 0x210   :  { %2839 = vmatmul.mubr.bf16.gmra.mrb[92].mxu0 %v5379_v26  ;;  %3103 = vmatprep.subr.bf16.mxu1 %v4180_v62 }
 0x211   :  { %2878 = vmatpush1.bf16.msra.mxu0 %v4177_v56  ;;  %3065 = vmatmul.mubr.bf16.gmra.mrb[92].mxu1 %v5379_v26 }
 0x212   :  { %2881 = vmatprep.mubr.bf16.mxu0 %v5097_v7  ;;  %3107 = vmatprep.mubr.bf16.mxu1 %v5097_v7  ;;  %v6256_v7 = vld [vmem:[#allocation14_spill] sm:$0xff] }
 0x213   :  { %3104 = vmatpush1.bf16.msra.mxu1 %v4179_v47  ;;  %2879 = vmatprep.subr.bf16.mxu0 %v4186_v45 }
 0x214   :  { %3105 = vmatprep.subr.bf16.mxu1 %v4188_v9 }
 0x215   :  { %2880 = vmatpush1.bf16.msra.mxu0 %v4185_v10 }
 0x217   :  { %3106 = vmatpush1.bf16.msra.mxu1 %v4187_v52 }
 0x218   :  { %2882 = vmatmul.mubr.bf16.vlgmr.msra.gmra.mrb[64].mxu0 %v5094_v14 }
 0x219   :  { %2891 = vmatprep.mubr.bf16.mxu0 %v5151_v23 }
 0x21a   :  { %3108 = vmatmul.mubr.bf16.vlgmr.msra.gmra.mrb[64].mxu1 %v5094_v14  ;;  %v5507_v14 = vld [vmem:[%s6179_s4] sm:$0xff] }
 0x21b   :  { %3117 = vmatprep.mubr.bf16.mxu1 %v5151_v23  ;;  %v6257_v23 = vld [vmem:[#allocation16_spill] sm:$0xff] }
 0x220   :  { %2892 = vmatmul.mubr.bf16.gmra.mrb[68].mxu0 %v5148_v29 }
 0x221   :  { %2901 = vmatprep.mubr.bf16.mxu0 %v5209_v13 }
 0x222   :  { %3118 = vmatmul.mubr.bf16.gmra.mrb[68].mxu1 %v5148_v29  ;;  %v5511_v29 = vrot.slane %v5507_v14, %v6256_v7 }
 0x223   :  { %3127 = vmatprep.mubr.bf16.mxu1 %v5209_v13  ;;  %v5520_v13 = vld [vmem:[%s6180_s5] sm:$0xff] }
 0x228   :  { %2902 = vmatmul.mubr.bf16.gmra.mrb[72].mxu0 %v5206_v51 }
 0x229   :  { %2911 = vmatprep.mubr.bf16.mxu0 %v5263_v42 }
 0x22a   :  { %3128 = vmatmul.mubr.bf16.gmra.mrb[72].mxu1 %v5206_v51  ;;  %v5515_v51 = vrot.slane %v5507_v14, %v6257_v23 }
 0x22b   :  { %3137 = vmatprep.mubr.bf16.mxu1 %v5263_v42 }
 0x230   :  { %2912 = vmatmul.mubr.bf16.gmra.mrb[76].mxu0 %v5260_v38 }
 0x231   :  { %2921 = vmatprep.mubr.bf16.mxu0 %v5321_v18 }
 0x232   :  { %3138 = vmatmul.mubr.bf16.gmra.mrb[76].mxu1 %v5260_v38  ;;  %v6258_v38 = vld [vmem:[#allocation15_spill] sm:$0xff] }
 0x233   :  { %3147 = vmatprep.mubr.bf16.mxu1 %v5321_v18  ;;  %v5524_v42 = vrot.slane %v5507_v14, %v6258_v38  ;;  %v5543_v44 = vrot.slane %v5520_v13, %v6258_v38 }
 0x238   :  { %2922 = vmatmul.mubr.bf16.gmra.mrb[80].mxu0 %v5318_v8 }
 0x239   :  { %2931 = vmatprep.mubr.bf16.mxu0 %v5376_v31 }
 0x23a   :  { %3148 = vmatmul.mubr.bf16.gmra.mrb[80].mxu1 %v5318_v8  ;;  %v6259_v8 = vld [vmem:[#allocation17_spill] sm:$0xff] }
 0x23b   :  { %3157 = vmatprep.mubr.bf16.mxu1 %v5376_v31  ;;  %v5528_v18 = vrot.slane %v5507_v14, %v6259_v8  ;;  %v5548_v53 = vrot.slane %v5520_v13, %v6259_v8 }
 0x240   :  { %2932 = vmatmul.mubr.bf16.gmra.mrb[84].mxu0 %v5373_v28 }
 0x241   :  { %2941 = vmatprep.mubr.bf16.mxu0 %v5401_v0 }
 0x242   :  { %3158 = vmatmul.mubr.bf16.gmra.mrb[84].mxu1 %v5373_v28 }
 0x243   :  { %3167 = vmatprep.mubr.bf16.mxu1 %v5401_v0 }
 0x248   :  { %2942 = vmatmul.mubr.bf16.gmra.mrb[88].mxu0 %v5398_v50 }
 0x249   :  { %2951 = vmatprep.mubr.bf16.mxu0 %v5412_v16 }
 0x24a   :  { %3168 = vmatmul.mubr.bf16.gmra.mrb[88].mxu1 %v5398_v50  ;;  %v5533_v50 = vrot.slane %v5520_v13, %v6256_v7 }
 0x24b   :  { %3177 = vmatprep.mubr.bf16.mxu1 %v5412_v16 }
 0x250   :  { %2952 = vmatmul.mubr.bf16.gmra.mrb[92].mxu0 %v5410_v2 }
 0x252   :  { %3178 = vmatmul.mubr.bf16.gmra.mrb[92].mxu1 %v5410_v2  ;;  %v5538_v2 = vrot.slane %v5520_v13, %v6257_v23 }
 0x26b   :  { %v2431_v28 = vpop.f32.mrb[32].mxu0  ;;  %v2657_v31 = vpop.f32.mrb[32].mxu1 }
 0x26c   :  { %v4206_v26 = vadd.f32 %v2431_v28, %v5511_v29  ;;  %v4238_v0 = vadd.f32 %v2657_v31, %v5515_v51  ;;  %v2433_v16 = vpop.f32.mrb[33].mxu0  ;;  %v2659_v15 = vpop.f32.mrb[33].mxu1 }
 0x26d   :  { %v4207_v58 = vadd.f32 %v2433_v16, %v5524_v42  ;;  %v4239_v3 = vadd.f32 %v2659_v15, %v5528_v18  ;;  %v2435_v37 = vpop.f32.mrb[34].mxu0  ;;  %v2661_v49 = vpop.f32.mrb[34].mxu1 }
 0x26e   :  { %v3188_v33 = vmul.f32 0.01, %v4206_v26  ;;  %v3190_v30 = vmul.f32 0.01, %v4238_v0  ;;  %v4208_v32 = vadd.f32 %v2435_v37, %v5511_v29  ;;  %v4240_v20 = vadd.f32 %v2661_v49, %v5515_v51  ;;  %v2437_v54 = vpop.f32.mrb[35].mxu0  ;;  %v2663_v11 = vpop.f32.mrb[35].mxu1 }
 0x26f   :  { %v3189_v39 = vmul.f32 0.01, %v4207_v58  ;;  %v3191_v21 = vmul.f32 0.01, %v4239_v3  ;;  %v4209_v1 = vadd.f32 %v2437_v54, %v5524_v42  ;;  %v4241_v35 = vadd.f32 %v2663_v11, %v5528_v18 }
 0x270   :  { %v3316_v24 = vmax.f32 %v4206_v26, %v3188_v33  ;;  %v3318_v12 = vmax.f32 %v4238_v0, %v3190_v30  ;;  %v3196_v40 = vmul.f32 0.01, %v4208_v32  ;;  %v3198_v57 = vmul.f32 0.01, %v4240_v20 }
 0x271   :  { %v3317_v27 = vmax.f32 %v4207_v58, %v3189_v39  ;;  %v3319_v34 = vmax.f32 %v4239_v3, %v3191_v21  ;;  %v3197_v5 = vmul.f32 0.01, %v4209_v1  ;;  %v3199_v43 = vmul.f32 0.01, %v4241_v35 }
 0x272   :  { %v3486_v6 = vmul.f32 %v5533_v50, %v3316_v24  ;;  %v3488_v36 = vmul.f32 %v5538_v2, %v3318_v12  ;;  %v3324_v41 = vmax.f32 %v4208_v32, %v3196_v40  ;;  %v3326_v22 = vmax.f32 %v4240_v20, %v3198_v57 }
 0x273   :  { %v3487_v48 = vmul.f32 %v5543_v44, %v3317_v27  ;;  %v3489_v25 = vmul.f32 %v5548_v53, %v3319_v34  ;;  %v3325_v63 = vmax.f32 %v4209_v1, %v3197_v5  ;;  %v3327_v59 = vmax.f32 %v4241_v35, %v3199_v43  ;;  %v2441_v19 = vpop.f32.mrb[36].mxu0  ;;  %v2667_v55 = vpop.f32.mrb[36].mxu1 }
 0x274   :  { %v3494_v60 = vmul.f32 %v5533_v50, %v3324_v41  ;;  %v3496_v62 = vmul.f32 %v5538_v2, %v3326_v22  ;;  %v4210_v61 = vadd.f32 %v2441_v19, %v5511_v29  ;;  %v4242_v46 = vadd.f32 %v2667_v55, %v5515_v51  ;;  %v2443_v56 = vpop.f32.mrb[37].mxu0  ;;  %v2669_v4 = vpop.f32.mrb[37].mxu1 }
 0x275   :  { %v3614_v17 = vadd.f32 %v3487_v48, %v3486_v6  ;;  %v3495_v47 = vmul.f32 %v5543_v44, %v3325_v63  ;;  %v3497_v45 = vmul.f32 %v5548_v53, %v3327_v59  ;;  %v4211_v9 = vadd.f32 %v2443_v56, %v5524_v42  ;;  %v2445_v10 = vpop.f32.mrb[38].mxu0  ;;  %v2671_v52 = vpop.f32.mrb[38].mxu1 }
 0x276   :  { %v3204_v7 = vmul.f32 0.01, %v4210_v61  ;;  %v3206_v23 = vmul.f32 0.01, %v4242_v46  ;;  %v4243_v38 = vadd.f32 %v2669_v4, %v5528_v18  ;;  %v4212_v8 = vadd.f32 %v2445_v10, %v5511_v29  ;;  %v2447_v28 = vpop.f32.mrb[39].mxu0  ;;  %v2673_v31 = vpop.f32.mrb[39].mxu1 }
 0x277   :  { %v3615_v26 = vadd.f32 %v3614_v17, %v3488_v36  ;;  %v3623_v0 = vadd.f32 %v3495_v47, %v3494_v60  ;;  %v3205_v16 = vmul.f32 0.01, %v4211_v9  ;;  %v4244_v15 = vadd.f32 %v2671_v52, %v5515_v51 }
 0x278   :  { %v3332_v58 = vmax.f32 %v4210_v61, %v3204_v7  ;;  %v3334_v3 = vmax.f32 %v4242_v46, %v3206_v23  ;;  %v3207_v37 = vmul.f32 0.01, %v4243_v38  ;;  %v3212_v49 = vmul.f32 0.01, %v4212_v8 }
 0x279   :  { %v5568_v33 = vadd.f32 %v3615_v26, %v3489_v25  ;;  %v3624_v30 = vadd.f32 %v3623_v0, %v3496_v62  ;;  %v3333_v32 = vmax.f32 %v4211_v9, %v3205_v16  ;;  %v3214_v20 = vmul.f32 0.01, %v4244_v15 }
 0x27a   :  { %v3502_v54 = vmul.f32 %v5533_v50, %v3332_v58  ;;  %v3504_v11 = vmul.f32 %v5538_v2, %v3334_v3  ;;  %v3335_v39 = vmax.f32 %v4243_v38, %v3207_v37  ;;  %v3340_v21 = vmax.f32 %v4212_v8, %v3212_v49 }
 0x27b   :  { %v5572_v1 = vadd.f32 %v3624_v30, %v3497_v45  ;;  %v3503_v35 = vmul.f32 %v5543_v44, %v3333_v32  ;;  %v3342_v24 = vmax.f32 %v4244_v15, %v3214_v20  ;;  %v4213_v12 = vadd.f32 %v2447_v28, %v5524_v42  ;;  %v2451_v40 = vpop.f32.mrb[40].mxu0  ;;  %v2677_v57 = vpop.f32.mrb[40].mxu1 }
 0x27c   :  { %v3505_v27 = vmul.f32 %v5548_v53, %v3335_v39  ;;  %v3510_v34 = vmul.f32 %v5533_v50, %v3340_v21  ;;  %v4245_v5 = vadd.f32 %v2673_v31, %v5528_v18  ;;  %v4214_v43 = vadd.f32 %v2451_v40, %v5511_v29  ;;  %v2453_v6 = vpop.f32.mrb[41].mxu0  ;;  %v2679_v36 = vpop.f32.mrb[41].mxu1 }
 0x27d   :  { %v3632_v41 = vadd.f32 %v3503_v35, %v3502_v54  ;;  %v3512_v22 = vmul.f32 %v5538_v2, %v3342_v24  ;;  %v3213_v48 = vmul.f32 0.01, %v4213_v12  ;;  %v4246_v25 = vadd.f32 %v2677_v57, %v5515_v51  ;;  %v2455_v63 = vpop.f32.mrb[42].mxu0  ;;  %v2681_v59 = vpop.f32.mrb[42].mxu1 }
 0x27e   :  { %v3215_v19 = vmul.f32 0.01, %v4245_v5  ;;  %v3220_v55 = vmul.f32 0.01, %v4214_v43  ;;  %v4215_v60 = vadd.f32 %v2453_v6, %v5524_v42  ;;  %v4247_v62 = vadd.f32 %v2679_v36, %v5528_v18  ;;  %v2457_v61 = vpop.f32.mrb[43].mxu0  ;;  %v2683_v46 = vpop.f32.mrb[43].mxu1 }
 0x27f   :  { %v3633_v56 = vadd.f32 %v3632_v41, %v3504_v11  ;;  %v3341_v4 = vmax.f32 %v4213_v12, %v3213_v48  ;;  %v3222_v17 = vmul.f32 0.01, %v4246_v25  ;;  %v4216_v47 = vadd.f32 %v2455_v63, %v5511_v29 }
 0x280   :  { %v3343_v45 = vmax.f32 %v4245_v5, %v3215_v19  ;;  %v3348_v9 = vmax.f32 %v4214_v43, %v3220_v55  ;;  %v3221_v10 = vmul.f32 0.01, %v4215_v60  ;;  %v3223_v52 = vmul.f32 0.01, %v4247_v62 }
 0x281   :  { %v5585_v7 = vadd.f32 %v3633_v56, %v3505_v27  ;;  %v3511_v23 = vmul.f32 %v5543_v44, %v3341_v4  ;;  %v3350_v38 = vmax.f32 %v4246_v25, %v3222_v17  ;;  %v3228_v8 = vmul.f32 0.01, %v4216_v47 }
 0x282   :  { %v3513_v28 = vmul.f32 %v5548_v53, %v3343_v45  ;;  %v3518_v31 = vmul.f32 %v5533_v50, %v3348_v9  ;;  %v3349_v26 = vmax.f32 %v4215_v60, %v3221_v10  ;;  %v3351_v0 = vmax.f32 %v4247_v62, %v3223_v52 }
 0x283   :  { %v3641_v16 = vadd.f32 %v3511_v23, %v3510_v34  ;;  %v3520_v15 = vmul.f32 %v5538_v2, %v3350_v38  ;;  %v3356_v58 = vmax.f32 %v4216_v47, %v3228_v8  ;;  %v4248_v3 = vadd.f32 %v2681_v59, %v5515_v51  ;;  %v2461_v37 = vpop.f32.mrb[44].mxu0  ;;  %v2687_v49 = vpop.f32.mrb[44].mxu1 }
 0x284   :  { %v3519_v30 = vmul.f32 %v5543_v44, %v3349_v26  ;;  %v3521_v32 = vmul.f32 %v5548_v53, %v3351_v0  ;;  %v4217_v20 = vadd.f32 %v2457_v61, %v5524_v42  ;;  %v4249_v54 = vadd.f32 %v2683_v46, %v5528_v18  ;;  %v2463_v11 = vpop.f32.mrb[45].mxu0  ;;  %v2689_v39 = vpop.f32.mrb[45].mxu1 }
 0x285   :  { %v3642_v21 = vadd.f32 %v3641_v16, %v3512_v22  ;;  %v3526_v35 = vmul.f32 %v5533_v50, %v3356_v58  ;;  %v3230_v24 = vmul.f32 0.01, %v4248_v3  ;;  %v4218_v12 = vadd.f32 %v2461_v37, %v5511_v29  ;;  %v2465_v40 = vpop.f32.mrb[46].mxu0  ;;  %v2691_v57 = vpop.f32.mrb[46].mxu1 }
 0x286   :  { %v3650_v27 = vadd.f32 %v3519_v30, %v3518_v31  ;;  %v3229_v34 = vmul.f32 0.01, %v4217_v20  ;;  %v3231_v5 = vmul.f32 0.01, %v4249_v54  ;;  %v4250_v43 = vadd.f32 %v2687_v49, %v5515_v51  ;;  %v2467_v6 = vpop.f32.mrb[47].mxu0  ;;  %v2693_v36 = vpop.f32.mrb[47].mxu1 }
 0x287   :  { %v5599_v41 = vadd.f32 %v3642_v21, %v3513_v28  ;;  %v3358_v48 = vmax.f32 %v4248_v3, %v3230_v24  ;;  %v3236_v25 = vmul.f32 0.01, %v4218_v12  ;;  %v4219_v22 = vadd.f32 %v2463_v11, %v5524_v42 }
 0x288   :  { %v3651_v63 = vadd.f32 %v3650_v27, %v3520_v15  ;;  %v3357_v59 = vmax.f32 %v4217_v20, %v3229_v34  ;;  %v3359_v19 = vmax.f32 %v4249_v54, %v3231_v5  ;;  %v3238_v55 = vmul.f32 0.01, %v4250_v43 }
 0x289   :  { %v3528_v60 = vmul.f32 %v5538_v2, %v3358_v48  ;;  %v3364_v62 = vmax.f32 %v4218_v12, %v3236_v25  ;;  %v3237_v61 = vmul.f32 0.01, %v4219_v22  ;;  %v4251_v46 = vadd.f32 %v2689_v39, %v5528_v18 }
 0x28a   :  { %v5604_v56 = vadd.f32 %v3651_v63, %v3521_v32  ;;  %v3527_v4 = vmul.f32 %v5543_v44, %v3357_v59  ;;  %v3529_v17 = vmul.f32 %v5548_v53, %v3359_v19  ;;  %v3366_v47 = vmax.f32 %v4250_v43, %v3238_v55 }
 0x28b   :  { %v3534_v45 = vmul.f32 %v5533_v50, %v3364_v62  ;;  %v3365_v9 = vmax.f32 %v4219_v22, %v3237_v61  ;;  %v3239_v10 = vmul.f32 0.01, %v4251_v46  ;;  %v4220_v52 = vadd.f32 %v2465_v40, %v5511_v29  ;;  %v2471_v23 = vpop.f32.mrb[48].mxu0  ;;  %v2697_v38 = vpop.f32.mrb[48].mxu1 }
 0x28c   :  { %v3659_v8 = vadd.f32 %v3527_v4, %v3526_v35  ;;  %v3536_v28 = vmul.f32 %v5538_v2, %v3366_v47  ;;  %v4252_v31 = vadd.f32 %v2691_v57, %v5515_v51  ;;  %v4221_v26 = vadd.f32 %v2467_v6, %v5524_v42  ;;  %v2473_v0 = vpop.f32.mrb[49].mxu0  ;;  %v2699_v16 = vpop.f32.mrb[49].mxu1 }
 0x28d   :  { %v3535_v15 = vmul.f32 %v5543_v44, %v3365_v9  ;;  %v3367_v58 = vmax.f32 %v4251_v46, %v3239_v10  ;;  %v3244_v3 = vmul.f32 0.01, %v4220_v52  ;;  %v4253_v37 = vadd.f32 %v2693_v36, %v5528_v18  ;;  %v2475_v49 = vpop.f32.mrb[50].mxu0  ;;  %v2701_v30 = vpop.f32.mrb[50].mxu1 }
 0x28e   :  { %v3660_v32 = vadd.f32 %v3659_v8, %v3528_v60  ;;  %v3246_v20 = vmul.f32 0.01, %v4252_v31  ;;  %v3245_v54 = vmul.f32 0.01, %v4221_v26  ;;  %v4222_v11 = vadd.f32 %v2471_v23, %v5511_v29  ;;  %v2477_v39 = vpop.f32.mrb[51].mxu0  ;;  %v2703_v21 = vpop.f32.mrb[51].mxu1 }
 0x28f   :  { %v3668_v35 = vadd.f32 %v3535_v15, %v3534_v45  ;;  %v3537_v24 = vmul.f32 %v5548_v53, %v3367_v58  ;;  %v3372_v12 = vmax.f32 %v4220_v52, %v3244_v3  ;;  %v3247_v40 = vmul.f32 0.01, %v4253_v37 }
 0x290   :  { %v5617_v57 = vadd.f32 %v3660_v32, %v3529_v17  ;;  %v3374_v27 = vmax.f32 %v4252_v31, %v3246_v20  ;;  %v3373_v34 = vmax.f32 %v4221_v26, %v3245_v54  ;;  %v3252_v5 = vmul.f32 0.01, %v4222_v11 }
 0x291   :  { %v3669_v43 = vadd.f32 %v3668_v35, %v3536_v28  ;;  %v3542_v6 = vmul.f32 %v5533_v50, %v3372_v12  ;;  %v3375_v36 = vmax.f32 %v4253_v37, %v3247_v40  ;;  %v4254_v48 = vadd.f32 %v2697_v38, %v5515_v51 }
 0x292   :  { %v3544_v25 = vmul.f32 %v5538_v2, %v3374_v27  ;;  %v3543_v22 = vmul.f32 %v5543_v44, %v3373_v34  ;;  %v3380_v63 = vmax.f32 %v4222_v11, %v3252_v5  ;;  %v4223_v59 = vadd.f32 %v2473_v0, %v5524_v42 }
 0x293   :  { %v5624_v19 = vadd.f32 %v3669_v43, %v3537_v24  ;;  %v3545_v55 = vmul.f32 %v5548_v53, %v3375_v36  ;;  %v3254_v60 = vmul.f32 0.01, %v4254_v48  ;;  %v4255_v62 = vadd.f32 %v2699_v16, %v5528_v18  ;;  %v2481_v61 = vpop.f32.mrb[52].mxu0  ;;  %v2707_v46 = vpop.f32.mrb[52].mxu1 }
 0x294   :  { %v3677_v4 = vadd.f32 %v3543_v22, %v3542_v6  ;;  %v3550_v17 = vmul.f32 %v5533_v50, %v3380_v63  ;;  %v3253_v47 = vmul.f32 0.01, %v4223_v59  ;;  %v4224_v45 = vadd.f32 %v2475_v49, %v5511_v29  ;;  %v2483_v9 = vpop.f32.mrb[53].mxu0  ;;  %v2709_v10 = vpop.f32.mrb[53].mxu1 }
 0x295   :  { %v3382_v52 = vmax.f32 %v4254_v48, %v3254_v60  ;;  %v3255_v23 = vmul.f32 0.01, %v4255_v62  ;;  %v4256_v38 = vadd.f32 %v2701_v30, %v5515_v51  ;;  %v4225_v8 = vadd.f32 %v2477_v39, %v5524_v42  ;;  %v2485_v28 = vpop.f32.mrb[54].mxu0  ;;  %v2711_v31 = vpop.f32.mrb[54].mxu1 }
 0x296   :  { %v3678_v26 = vadd.f32 %v3677_v4, %v3544_v25  ;;  %v3381_v0 = vmax.f32 %v4223_v59, %v3253_v47  ;;  %v3260_v16 = vmul.f32 0.01, %v4224_v45  ;;  %v4257_v15 = vadd.f32 %v2703_v21, %v5528_v18  ;;  %v2487_v58 = vpop.f32.mrb[55].mxu0  ;;  %v2713_v3 = vpop.f32.mrb[55].mxu1 }
 0x297   :  { %v3552_v37 = vmul.f32 %v5538_v2, %v3382_v52  ;;  %v3383_v49 = vmax.f32 %v4255_v62, %v3255_v23  ;;  %v3262_v32 = vmul.f32 0.01, %v4256_v38  ;;  %v3261_v20 = vmul.f32 0.01, %v4225_v8 }
 0x298   :  { %v5634_v54 = vadd.f32 %v3678_v26, %v3545_v55  ;;  %v3551_v30 = vmul.f32 %v5543_v44, %v3381_v0  ;;  %v3388_v11 = vmax.f32 %v4224_v45, %v3260_v16  ;;  %v3263_v39 = vmul.f32 0.01, %v4257_v15 }
 0x299   :  { %v3553_v35 = vmul.f32 %v5548_v53, %v3383_v49  ;;  %v3390_v24 = vmax.f32 %v4256_v38, %v3262_v32  ;;  %v3389_v12 = vmax.f32 %v4225_v8, %v3261_v20  ;;  %v4226_v40 = vadd.f32 %v2481_v61, %v5511_v29 }
 0x29a   :  { %v3686_v21 = vadd.f32 %v3551_v30, %v3550_v17  ;;  %v3558_v27 = vmul.f32 %v5533_v50, %v3388_v11  ;;  %v3391_v34 = vmax.f32 %v4257_v15, %v3263_v39  ;;  %v4258_v5 = vadd.f32 %v2707_v46, %v5515_v51 }
 0x29b   :  { %v3560_v43 = vmul.f32 %v5538_v2, %v3390_v24  ;;  %v3559_v6 = vmul.f32 %v5543_v44, %v3389_v12  ;;  %v3268_v36 = vmul.f32 0.01, %v4226_v40  ;;  %v4227_v48 = vadd.f32 %v2483_v9, %v5524_v42  ;;  %v2491_v25 = vpop.f32.mrb[56].mxu0  ;;  %v2717_v22 = vpop.f32.mrb[56].mxu1 }
 0x29c   :  { %v3687_v63 = vadd.f32 %v3686_v21, %v3552_v37  ;;  %v3561_v59 = vmul.f32 %v5548_v53, %v3391_v34  ;;  %v3270_v55 = vmul.f32 0.01, %v4258_v5  ;;  %v4259_v60 = vadd.f32 %v2709_v10, %v5528_v18  ;;  %v2493_v62 = vpop.f32.mrb[57].mxu0  ;;  %v2719_v61 = vpop.f32.mrb[57].mxu1 }
 0x29d   :  { %v3695_v4 = vadd.f32 %v3559_v6, %v3558_v27  ;;  %v3396_v17 = vmax.f32 %v4226_v40, %v3268_v36  ;;  %v3269_v46 = vmul.f32 0.01, %v4227_v48  ;;  %v4228_v47 = vadd.f32 %v2485_v28, %v5511_v29  ;;  %v2495_v45 = vpop.f32.mrb[58].mxu0  ;;  %v2721_v52 = vpop.f32.mrb[58].mxu1 }
 0x29e   :  { %v5647_v23 = vadd.f32 %v3687_v63, %v3553_v35  ;;  %v3398_v9 = vmax.f32 %v4258_v5, %v3270_v55  ;;  %v3271_v38 = vmul.f32 0.01, %v4259_v60  ;;  %v4260_v8 = vadd.f32 %v2711_v31, %v5515_v51  ;;  %v2497_v26 = vpop.f32.mrb[59].mxu0  ;;  %v2723_v0 = vpop.f32.mrb[59].mxu1 }
 0x29f   :  { %v3696_v16 = vadd.f32 %v3695_v4, %v3560_v43  ;;  %v3566_v10 = vmul.f32 %v5533_v50, %v3396_v17  ;;  %v3397_v15 = vmax.f32 %v4227_v48, %v3269_v46  ;;  %v3276_v37 = vmul.f32 0.01, %v4228_v47 }
 0x2a0   :  { %v3399_v49 = vmax.f32 %v4259_v60, %v3271_v38  ;;  %v3278_v32 = vmul.f32 0.01, %v4260_v8  ;;  %v4229_v20 = vadd.f32 %v2487_v58, %v5524_v42  ;;  %v4261_v39 = vadd.f32 %v2713_v3, %v5528_v18 }
 0x2a1   :  { %v5652_v28 = vadd.f32 %v3696_v16, %v3561_v59  ;;  %v3567_v30 = vmul.f32 %v5543_v44, %v3397_v15  ;;  %v3404_v11 = vmax.f32 %v4228_v47, %v3276_v37  ;;  %v3568_v31 = vmul.f32 %v5538_v2, %v3398_v9 }
 0x2a2   :  { %v3569_v35 = vmul.f32 %v5548_v53, %v3399_v49  ;;  %v3277_v24 = vmul.f32 0.01, %v4229_v20  ;;  %v4230_v12 = vadd.f32 %v2491_v25, %v5511_v29  ;;  %v3406_v21 = vmax.f32 %v4260_v8, %v3278_v32 }
 0x2a3   :  { %v3704_v40 = vadd.f32 %v3567_v30, %v3566_v10  ;;  %v3279_v27 = vmul.f32 0.01, %v4261_v39  ;;  %v4262_v34 = vadd.f32 %v2717_v22, %v5515_v51  ;;  %v2501_v58 = vpop.f32.mrb[60].mxu0  ;;  %v2727_v5 = vpop.f32.mrb[60].mxu1  ;;  %v3574_v43 = vmul.f32 %v5533_v50, %v3404_v11 }
 0x2a4   :  { %v3405_v6 = vmax.f32 %v4229_v20, %v3277_v24  ;;  %v3284_v36 = vmul.f32 0.01, %v4230_v12  ;;  %v4231_v3 = vadd.f32 %v2493_v62, %v5524_v42  ;;  %v2503_v48 = vpop.f32.mrb[61].mxu0  ;;  %v2729_v63 = vpop.f32.mrb[61].mxu1  ;;  %v4263_v25 = vadd.f32 %v2719_v61, %v5528_v18 }
 0x2a5   :  { %v3705_v59 = vadd.f32 %v3704_v40, %v3568_v31  ;;  %v3407_v55 = vmax.f32 %v4261_v39, %v3279_v27  ;;  %v3286_v60 = vmul.f32 0.01, %v4262_v34  ;;  %v2505_v4 = vpop.f32.mrb[62].mxu0  ;;  %v2731_v17 = vpop.f32.mrb[62].mxu1  ;;  %v4232_v9 = vadd.f32 %v2495_v45, %v5511_v29 }
 0x2a6   :  { %v3575_v46 = vmul.f32 %v5543_v44, %v3405_v6  ;;  %v3412_v22 = vmax.f32 %v4230_v12, %v3284_v36  ;;  %v3285_v47 = vmul.f32 0.01, %v4231_v3  ;;  %v2507_v38 = vpop.f32.mrb[63].mxu0  ;;  %v2733_v8 = vpop.f32.mrb[63].mxu1  ;;  %v3576_v62 = vmul.f32 %v5538_v2, %v3406_v21 }
 0x2a7   :  { %v5665_v16 = vadd.f32 %v3705_v59, %v3569_v35  ;;  %v3414_v10 = vmax.f32 %v4262_v34, %v3286_v60  ;;  %v3287_v15 = vmul.f32 0.01, %v4263_v25  ;;  %v3292_v32 = vmul.f32 0.01, %v4232_v9 }
 0x2a8   :  { %v3713_v37 = vadd.f32 %v3575_v46, %v3574_v43  ;;  %v3582_v49 = vmul.f32 %v5533_v50, %v3412_v22  ;;  %v3413_v61 = vmax.f32 %v4231_v3, %v3285_v47  ;;  %v3577_v20 = vmul.f32 %v5548_v53, %v3407_v55 }
 0x2a9   :  { %v3415_v30 = vmax.f32 %v4263_v25, %v3287_v15  ;;  %v4264_v11 = vadd.f32 %v2721_v52, %v5515_v51  ;;  %v4233_v45 = vadd.f32 %v2497_v26, %v5524_v42  ;;  %v3420_v35 = vmax.f32 %v4232_v9, %v3292_v32 }
 0x2aa   :  { %v3714_v39 = vadd.f32 %v3713_v37, %v3576_v62  ;;  %v3583_v31 = vmul.f32 %v5543_v44, %v3413_v61  ;;  %v4265_v24 = vadd.f32 %v2723_v0, %v5528_v18  ;;  %v3584_v12 = vmul.f32 %v5538_v2, %v3414_v10 }
 0x2ab   :  { %v3294_v40 = vmul.f32 0.01, %v4264_v11  ;;  %v3293_v21 = vmul.f32 0.01, %v4233_v45  ;;  %v4234_v27 = vadd.f32 %v2501_v58, %v5511_v29  ;;  %v3590_v6 = vmul.f32 %v5533_v50, %v3420_v35 }
 0x2ac   :  { %v5676_v34 = vadd.f32 %v3714_v39, %v3577_v20  ;;  %v3722_v43 = vadd.f32 %v3583_v31, %v3582_v49  ;;  %v3295_v52 = vmul.f32 0.01, %v4265_v24  ;;  %v4266_v59 = vadd.f32 %v2727_v5, %v5515_v51 }
 0x2ad   :  { %v3422_v36 = vmax.f32 %v4264_v11, %v3294_v40  ;;  %v3421_v26 = vmax.f32 %v4233_v45, %v3293_v21  ;;  %v3300_v3 = vmul.f32 0.01, %v4234_v27  ;;  %v3585_v55 = vmul.f32 %v5548_v53, %v3415_v30 }
 0x2ae   :  { %v3723_v0 = vadd.f32 %v3722_v43, %v3584_v12  ;;  %v4235_v60 = vadd.f32 %v2503_v48, %v5524_v42  ;;  %v4267_v25 = vadd.f32 %v2729_v63, %v5528_v18  ;;  %v3423_v46 = vmax.f32 %v4265_v24, %v3295_v52 }
 0x2af   :  { %v3591_v58 = vmul.f32 %v5543_v44, %v3421_v26  ;;  %v3428_v22 = vmax.f32 %v4234_v27, %v3300_v3  ;;  %v3302_v47 = vmul.f32 0.01, %v4266_v59  ;;  %v3592_v15 = vmul.f32 %v5538_v2, %v3422_v36 }
 0x2b0   :  { %v5684_v9 = vadd.f32 %v3723_v0, %v3585_v55  ;;  %v3301_v62 = vmul.f32 0.01, %v4235_v60  ;;  %v3303_v10 = vmul.f32 0.01, %v4267_v25  ;;  %v4236_v49 = vadd.f32 %v2505_v4, %v5511_v29 }
 0x2b1   :  { %v3731_v37 = vadd.f32 %v3591_v58, %v3590_v6  ;;  %v3598_v5 = vmul.f32 %v5533_v50, %v3428_v22  ;;  %v3430_v61 = vmax.f32 %v4266_v59, %v3302_v47  ;;  %v4268_v63 = vadd.f32 %v2731_v17, %v5515_v51  ;;  %v6260_v59 = vld [vmem:[#allocation13_spill] sm:$0xff] }
 0x2b2   :  { %v3429_v48 = vmax.f32 %v4235_v60, %v3301_v62  ;;  %v4237_v32 = vadd.f32 %v2507_v38, %v5524_v42  ;;  %v3593_v20 = vmul.f32 %v5548_v53, %v3423_v46  ;;  %v3308_v11 = vmul.f32 0.01, %v4236_v49 }
 0x2b3   :  { %v3732_v30 = vadd.f32 %v3731_v37, %v3592_v15  ;;  %v4269_v45 = vadd.f32 %v2733_v8, %v5528_v18  ;;  %v3431_v31 = vmax.f32 %v4267_v25, %v3303_v10  ;;  %v3310_v35 = vmul.f32 0.01, %v4268_v63 }
 0x2b4   :  { %v3599_v39 = vmul.f32 %v5543_v44, %v3429_v48  ;;  %v3309_v24 = vmul.f32 0.01, %v4237_v32  ;;  %v3436_v29 = vmax.f32 %v4236_v49, %v3308_v11  ;;  %v3600_v40 = vmul.f32 %v5538_v2, %v3430_v61 }
 0x2b5   :  { %v5694_v12 = vadd.f32 %v3732_v30, %v3593_v20  ;;  %v3311_v4 = vmul.f32 0.01, %v4269_v45  ;;  %v3438_v17 = vmax.f32 %v4268_v63, %v3310_v35  ;;  %v3601_v21 = vmul.f32 %v5548_v53, %v3431_v31 }
 0x2b6   :  { %v3740_v51 = vadd.f32 %v3599_v39, %v3598_v5  ;;  %v3437_v42 = vmax.f32 %v4237_v32, %v3309_v24  ;;  %v3606_v38 = vmul.f32 %v5533_v50, %v3436_v29  ;;  %v982_v55 = vsub.s32 4, %v6260_v59 }
 0x2b7   :  { %v3439_v8 = vmax.f32 %v4269_v45, %v3311_v4  ;;  %v3608_v6 = vmul.f32 %v5538_v2, %v3438_v17  ;;  %v986_v50 = vsub.s32 5, %v6260_v59  ;;  %v990_v0 = vsub.s32 6, %v6260_v59 }
 0x2b8   :  { %v3741_v27 = vadd.f32 %v3740_v51, %v3600_v40  ;;  %v3607_v18 = vmul.f32 %v5543_v44, %v3437_v42  ;;  %v994_v60 = vsub.s32 7, %v6260_v59  ;;  %v5711_v44 = vrot.slane %v5507_v14, %v982_v55 }
 0x2b9   :  { %v3609_v36 = vmul.f32 %v5548_v53, %v3439_v8  ;;  %v5714_v25 = vrot.slane %v5507_v14, %v986_v50  ;;  %v5717_v2 = vrot.slane %v5507_v14, %v990_v0  ;;  %v5724_v47 = vrot.slane %v5520_v13, %v982_v55 }
 0x2ba   :  { %v5700_v43 = vadd.f32 %v3741_v27, %v3601_v21  ;;  %v3749_v52 = vadd.f32 %v3607_v18, %v3606_v38  ;;  %v5720_v58 = vrot.slane %v5507_v14, %v994_v60  ;;  %v5729_v49 = vrot.slane %v5520_v13, %v986_v50 }
 0x2bb   :  { %v5734_v30 = vrot.slane %v5520_v13, %v990_v0  ;;  %v5743_v8 = vrot.slane %v5520_v13, %v994_v60 }
 0x2bc   :  { %v3750_v26 = vadd.f32 %v3749_v52, %v3608_v6 }
 0x2be   :  { %v5704_v3 = vadd.f32 %v3750_v26, %v3609_v36 }
 0x2eb   :  { %v2883_v53 = vpop.f32.mrb[64].mxu0 }
 0x2ec   :  { %v4270_v46 = vadd.f32 %v2883_v53, %v5711_v44  ;;  %v2885_v22 = vpop.f32.mrb[65].mxu0 }
 0x2ed   :  { %v3109_v62 = vpop.f32.mrb[64].mxu1  ;;  %v4271_v10 = vadd.f32 %v2885_v22, %v5714_v25  ;;  %v2887_v15 = vpop.f32.mrb[66].mxu0 }
 0x2ee   :  { %v3192_v37 = vmul.f32 0.01, %v4270_v46  ;;  %v4302_v5 = vadd.f32 %v3109_v62, %v5717_v2  ;;  %v3111_v61 = vpop.f32.mrb[65].mxu1  ;;  %v4272_v14 = vadd.f32 %v2887_v15, %v5711_v44  ;;  %v2889_v48 = vpop.f32.mrb[67].mxu0 }
 0x2ef   :  { %v3193_v63 = vmul.f32 0.01, %v4271_v10  ;;  %v4303_v32 = vadd.f32 %v3111_v61, %v5720_v58  ;;  %v3113_v20 = vpop.f32.mrb[66].mxu1  ;;  %v4273_v11 = vadd.f32 %v2889_v48, %v5714_v25 }
 0x2f0   :  { %v3320_v45 = vmax.f32 %v4270_v46, %v3192_v37  ;;  %v3194_v39 = vmul.f32 0.01, %v4302_v5  ;;  %v3200_v31 = vmul.f32 0.01, %v4272_v14  ;;  %v4304_v35 = vadd.f32 %v3113_v20, %v5717_v2  ;;  %v3115_v24 = vpop.f32.mrb[67].mxu1 }
 0x2f1   :  { %v3321_v29 = vmax.f32 %v4271_v10, %v3193_v63  ;;  %v3195_v4 = vmul.f32 0.01, %v4303_v32  ;;  %v3201_v40 = vmul.f32 0.01, %v4273_v11  ;;  %v5739_v51 = vadd.f32 %v3115_v24, %v5720_v58 }
 0x2f2   :  { %v3322_v17 = vmax.f32 %v4302_v5, %v3194_v39  ;;  %v3328_v42 = vmax.f32 %v4272_v14, %v3200_v31  ;;  %v3202_v38 = vmul.f32 0.01, %v4304_v35  ;;  %v3490_v21 = vmul.f32 %v5724_v47, %v3320_v45 }
 0x2f3   :  { %v3329_v27 = vmax.f32 %v4273_v11, %v3201_v40  ;;  %v2893_v18 = vpop.f32.mrb[68].mxu0  ;;  %v3491_v6 = vmul.f32 %v5729_v49, %v3321_v29  ;;  %v3323_v52 = vmax.f32 %v4303_v32, %v3195_v4  ;;  %v5749_v50 = vmul.f32 0.01, %v5739_v51 }
 0x2f4   :  { %v3498_v36 = vmul.f32 %v5724_v47, %v3328_v42  ;;  %v4274_v26 = vadd.f32 %v2893_v18, %v5711_v44  ;;  %v2895_v59 = vpop.f32.mrb[69].mxu0  ;;  %v3330_v55 = vmax.f32 %v4304_v35, %v3202_v38  ;;  %v3492_v22 = vmul.f32 %v5734_v30, %v3322_v17 }
 0x2f5   :  { %v3119_v0 = vpop.f32.mrb[68].mxu1  ;;  %v4275_v53 = vadd.f32 %v2895_v59, %v5714_v25  ;;  %v2897_v46 = vpop.f32.mrb[70].mxu0  ;;  %v5757_v60 = vmul.f32 %v5729_v49, %v3329_v27  ;;  %v3617_v45 = vadd.f32 %v5568_v33, %v3490_v21  ;;  %v3331_v29 = vmax.f32 %v5739_v51, %v5749_v50 }
 0x2f6   :  { %v5754_v13 = vadd.f32 %v5572_v1, %v3498_v36  ;;  %v3208_v62 = vmul.f32 0.01, %v4274_v26  ;;  %v5760_v10 = vadd.f32 %v3119_v0, %v5717_v2  ;;  %v3121_v15 = vpop.f32.mrb[69].mxu1  ;;  %v2899_v37 = vpop.f32.mrb[71].mxu0  ;;  %v4276_v14 = vadd.f32 %v2897_v46, %v5711_v44 }
 0x2f7   :  { %v3209_v5 = vmul.f32 0.01, %v4275_v53  ;;  %v5763_v61 = vadd.f32 %v3121_v15, %v5720_v58  ;;  %v3123_v48 = vpop.f32.mrb[70].mxu1  ;;  %v4277_v63 = vadd.f32 %v2899_v37, %v5714_v25  ;;  %v3493_v17 = vmul.f32 %v5743_v8, %v3323_v52 }
 0x2f8   :  { %v3336_v1 = vmax.f32 %v4274_v26, %v3208_v62  ;;  %v5768_v32 = vmul.f32 0.01, %v5760_v10  ;;  %v4308_v20 = vadd.f32 %v3123_v48, %v5717_v2  ;;  %v3125_v11 = vpop.f32.mrb[71].mxu1  ;;  %v3216_v35 = vmul.f32 0.01, %v4276_v14 }
 0x2f9   :  { %v3337_v39 = vmax.f32 %v4275_v53, %v3209_v5  ;;  %v5773_v31 = vmul.f32 0.01, %v5763_v61  ;;  %v3217_v24 = vmul.f32 0.01, %v4277_v63  ;;  %v5778_v40 = vadd.f32 %v3125_v11, %v5720_v58 }
 0x2fa   :  { %v3218_v4 = vmul.f32 0.01, %v4308_v20  ;;  %v5782_v42 = vmul.f32 %v5734_v30, %v3330_v55  ;;  %v5785_v33 = vmul.f32 %v5724_v47, %v3336_v1  ;;  %v3344_v38 = vmax.f32 %v4276_v14, %v3216_v35 }
 0x2fb   :  { %v3345_v21 = vmax.f32 %v4277_v63, %v3217_v24  ;;  %v2903_v27 = vpop.f32.mrb[72].mxu0  ;;  %v5790_v51 = vmul.f32 %v5729_v49, %v3337_v39  ;;  %v3618_v59 = vadd.f32 %v3617_v45, %v3491_v6  ;;  %v5801_v15 = vmul.f32 0.01, %v5778_v40 }
 0x2fc   :  { %v4278_v36 = vadd.f32 %v2903_v27, %v5711_v44  ;;  %v2905_v26 = vpop.f32.mrb[73].mxu0  ;;  %v3514_v55 = vmul.f32 %v5724_v47, %v3344_v38  ;;  %v3346_v50 = vmax.f32 %v4308_v20, %v3218_v4 }
 0x2fd   :  { %v3129_v0 = vpop.f32.mrb[72].mxu1  ;;  %v4279_v53 = vadd.f32 %v2905_v26, %v5714_v25  ;;  %v2907_v46 = vpop.f32.mrb[74].mxu0  ;;  %v5798_v62 = vmul.f32 %v5729_v49, %v3345_v21  ;;  %v3619_v20 = vadd.f32 %v3618_v59, %v3492_v22 }
 0x2fe   :  { %v3224_v37 = vmul.f32 0.01, %v4278_v36  ;;  %v4310_v5 = vadd.f32 %v3129_v0, %v5717_v2  ;;  %v3131_v6 = vpop.f32.mrb[73].mxu1  ;;  %v2909_v14 = vpop.f32.mrb[75].mxu0  ;;  %v5805_v48 = vadd.f32 %v5599_v41, %v3514_v55  ;;  %v4280_v35 = vadd.f32 %v2907_v46, %v5711_v44 }
 0x2ff   :  { %v3225_v63 = vmul.f32 0.01, %v4279_v53  ;;  %v5808_v1 = vadd.f32 %v3131_v6, %v5720_v58  ;;  %v3133_v11 = vpop.f32.mrb[74].mxu1  ;;  %v3620_v21 = vadd.f32 %v3619_v20, %v3493_v17  ;;  %v4281_v27 = vadd.f32 %v2909_v14, %v5714_v25 }
 0x300   :  { %v3352_v45 = vmax.f32 %v4278_v36, %v3224_v37  ;;  %v3226_v39 = vmul.f32 0.01, %v4310_v5  ;;  %v4312_v24 = vadd.f32 %v3133_v11, %v5717_v2  ;;  %v3135_v4 = vpop.f32.mrb[75].mxu1  ;;  %v3501_v41 = vmul.f32 %v5743_v8, %v3331_v29 }
 0x301   :  { %v3353_v38 = vmax.f32 %v4279_v53, %v3225_v63  ;;  %v5815_v26 = vmul.f32 %v5734_v30, %v3346_v50  ;;  %v3232_v22 = vmul.f32 0.01, %v4280_v35  ;;  %v5819_v0 = vmul.f32 0.01, %v5808_v1  ;;  %3621 = vadd.xlane.f32.xlu0 %v3620_v21 }
 0x302   :  { %v3522_v55 = vmul.f32 %v5724_v47, %v3352_v45  ;;  %v3234_v59 = vmul.f32 0.01, %v4312_v24  ;;  %v3354_v36 = vmax.f32 %v4310_v5, %v3226_v39  ;;  %v3233_v46 = vmul.f32 0.01, %v4281_v27 }
 0x303   :  { %v5822_v53 = vadd.f32 %v3135_v4, %v5720_v58  ;;  %v2913_v17 = vpop.f32.mrb[76].mxu0  ;;  %v5830_v37 = vmul.f32 %v5729_v49, %v3353_v38  ;;  %v3360_v6 = vmax.f32 %v4280_v35, %v3232_v22  ;;  %v3627_v20 = vadd.f32 %v5754_v13, %v5757_v60 }
 0x304   :  { %v5827_v50 = vadd.f32 %v5604_v56, %v3522_v55  ;;  %v2915_v5 = vpop.f32.mrb[77].mxu0  ;;  %v3362_v14 = vmax.f32 %v4312_v24, %v3234_v59  ;;  %v3361_v63 = vmax.f32 %v4281_v27, %v3233_v46  ;;  %v4282_v11 = vadd.f32 %v2913_v17, %v5711_v44 }
 0x305   :  { %v3139_v45 = vpop.f32.mrb[76].mxu1  ;;  %v2917_v39 = vpop.f32.mrb[78].mxu0  ;;  %v3530_v4 = vmul.f32 %v5724_v47, %v3360_v6  ;;  %v5837_v21 = vmul.f32 0.01, %v5822_v53  ;;  %v4283_v38 = vadd.f32 %v2915_v5, %v5714_v25  ;;  %v5842_v24 = vmul.f32 %v5734_v30, %v3354_v36 }
 0x306   :  { %v4314_v56 = vadd.f32 %v3139_v45, %v5717_v2  ;;  %v3141_v35 = vpop.f32.mrb[77].mxu1  ;;  %v2919_v55 = vpop.f32.mrb[79].mxu0  ;;  %v3628_v60 = vadd.f32 %v3627_v20, %v5782_v42  ;;  %v3240_v27 = vmul.f32 0.01, %v4282_v11  ;;  %v5854_v45 = vmul.f32 %v5734_v30, %v3362_v14 }
 0x307   :  { %v3143_v22 = vpop.f32.mrb[78].mxu1  ;;  %v5848_v59 = vadd.f32 %v5617_v57, %v3530_v4  ;;  %v3241_v17 = vmul.f32 0.01, %v4283_v38  ;;  %v5851_v6 = vadd.f32 %v3141_v35, %v5720_v58  ;;  %v5857_v36 = vmul.f32 %v5729_v49, %v3361_v63 }
 0x308   :  { %v3242_v46 = vmul.f32 0.01, %v4314_v56  ;;  %v3145_v5 = vpop.f32.mrb[79].mxu1  ;;  %v3629_v13 = vadd.f32 %v3628_v60, %v3501_v41  ;;  %v3368_v29 = vmax.f32 %v4282_v11, %v3240_v27  ;;  %v3363_v42 = vmax.f32 %v5822_v53, %v5837_v21 }
 0x309   :  { %v3369_v57 = vmax.f32 %v4283_v38, %v3241_v17  ;;  %v3635_v4 = vadd.f32 %v5585_v7, %v5785_v33  ;;  %v4284_v52 = vadd.f32 %v2917_v39, %v5711_v44  ;;  %v4316_v14 = vadd.f32 %v3143_v22, %v5717_v2 }
 0x30a   :  { %v3370_v20 = vmax.f32 %v4314_v56, %v3242_v46  ;;  %3630 = vadd.xlane.f32.xlu0 %v3629_v13  ;;  %v3538_v35 = vmul.f32 %v5724_v47, %v3368_v29  ;;  %v4285_v63 = vadd.f32 %v2919_v55, %v5714_v25  ;;  %v5868_v41 = vmul.f32 0.01, %v5851_v6 }
 0x30b   :  { %v2923_v18 = vpop.f32.mrb[80].mxu0  ;;  %v6261_v11 = vmax.f32 %v5760_v10, %v5768_v32  ;;  %v6262_v7 = vmax.f32 %v5763_v61, %v5773_v31  ;;  %v3636_v29 = vadd.f32 %v3635_v4, %v5790_v51  ;;  %v3248_v55 = vmul.f32 0.01, %v4284_v52 }
 0x30c   :  { %v2925_v39 = vpop.f32.mrb[81].mxu0  ;;  %v5880_v38 = vadd.f32 %v5624_v19, %v3538_v35  ;;  %v3250_v13 = vmul.f32 0.01, %v4316_v14  ;;  %v3249_v60 = vmul.f32 0.01, %v4285_v63  ;;  %v5883_v27 = vmul.f32 %v5734_v30, %v3370_v20 }
 0x30d   :  { %v3508_v56 = vmul.f32 %v5734_v30, %v6261_v11  ;;  %v3509_v33 = vmul.f32 %v5743_v8, %v6262_v7  ;;  %v5886_v32 = vadd.f32 %v3145_v5, %v5720_v58  ;;  %v3645_v61 = vadd.f32 %v5805_v48, %v5798_v62  ;;  %v3149_v31 = vpop.f32.mrb[80].mxu1  ;;  %v2927_v22 = vpop.f32.mrb[82].mxu0 }
 0x30e   :  { %v5891_v51 = vmul.f32 %v5729_v49, %v3369_v57  ;;  %v3376_v19 = vmax.f32 %v4284_v52, %v3248_v55  ;;  %v3378_v46 = vmax.f32 %v4316_v14, %v3250_v13  ;;  %v4286_v17 = vadd.f32 %v2923_v18, %v5711_v44  ;;  %v3151_v4 = vpop.f32.mrb[81].mxu1  ;;  %v2929_v35 = vpop.f32.mrb[83].mxu0 }
 0x30f   :  { %v3637_v10 = vadd.f32 %v3636_v29, %v3508_v56  ;;  %v6263_v11 = vmax.f32 %v5778_v40, %v5801_v15  ;;  %v3646_v56 = vadd.f32 %v3645_v61, %v5815_v26  ;;  %v4318_v62 = vadd.f32 %v3149_v31, %v5717_v2  ;;  %v3153_v48 = vpop.f32.mrb[82].mxu1 }
 0x310   :  { %v3546_v52 = vmul.f32 %v5724_v47, %v3376_v19  ;;  %v3377_v14 = vmax.f32 %v4285_v63, %v3249_v60  ;;  %v3256_v18 = vmul.f32 0.01, %v4286_v17  ;;  %v3155_v7 = vpop.f32.mrb[83].mxu1  ;;  %v4287_v29 = vadd.f32 %v2925_v39, %v5714_v25 }
 0x311   :  { %v3638_v20 = vadd.f32 %v3637_v10, %v3509_v33  ;;  %v3517_v5 = vmul.f32 %v5743_v8, %v6263_v11  ;;  %v5904_v33 = vmul.f32 0.01, %v5886_v32  ;;  %v3258_v15 = vmul.f32 0.01, %v4318_v62 }
 0x312   :  { %v5908_v26 = vadd.f32 %v5634_v54, %v3546_v52  ;;  %v5911_v55 = vmul.f32 %v5734_v30, %v3378_v46  ;;  %v3384_v13 = vmax.f32 %v4286_v17, %v3256_v18  ;;  %v5914_v10 = vadd.f32 %v3151_v4, %v5720_v58 }
 0x313   :  { %3639 = vadd.xlane.f32.xlu1 %v3638_v20  ;;  %v3647_v40 = vadd.f32 %v3646_v56, %v3517_v5  ;;  %v2933_v63 = vpop.f32.mrb[84].mxu0  ;;  %v3386_v60 = vmax.f32 %v4318_v62, %v3258_v15  ;;  %v3257_v61 = vmul.f32 0.01, %v4287_v29  ;;  %v3654_v31 = vadd.f32 %v5827_v50, %v5830_v37 }
 0x314   :  { %v4288_v19 = vadd.f32 %v2927_v22, %v5711_v44  ;;  %v2935_v20 = vpop.f32.mrb[85].mxu0  ;;  %v3554_v39 = vmul.f32 %v5724_v47, %v3384_v13  ;;  %v5921_v54 = vmul.f32 0.01, %v5914_v10  ;;  %v4320_v46 = vadd.f32 %v3153_v48, %v5717_v2 }
 0x315   :  { %v4289_v17 = vadd.f32 %v2929_v35, %v5714_v25  ;;  %v3159_v4 = vpop.f32.mrb[84].mxu1  ;;  %v2937_v11 = vpop.f32.mrb[86].mxu0  ;;  %v5926_v5 = vmul.f32 %v5729_v49, %v3377_v14  ;;  %v6264_v50 = vmax.f32 %v5808_v1, %v5819_v0  ;;  %v3655_v22 = vadd.f32 %v3654_v31, %v5842_v24 }
 0x316   :  { %v3264_v56 = vmul.f32 0.01, %v4288_v19  ;;  %v3161_v62 = vpop.f32.mrb[85].mxu1  ;;  %v2939_v52 = vpop.f32.mrb[87].mxu0  ;;  %v3379_v48 = vmax.f32 %v5886_v32, %v5904_v33  ;;  %v5936_v35 = vadd.f32 %v5647_v23, %v3554_v39  ;;  %v3266_v18 = vmul.f32 0.01, %v4320_v46 }
 0x317   :  { %3648 = vadd.xlane.f32.xlu1 %v3647_v40  ;;  %v3525_v37 = vmul.f32 %v5743_v8, %v6264_v50  ;;  %v3265_v14 = vmul.f32 0.01, %v4289_v17  ;;  %v3163_v15 = vpop.f32.mrb[86].mxu1  ;;  %v3385_v40 = vmax.f32 %v4287_v29, %v3257_v61  ;;  %v5939_v1 = vadd.f32 %v3155_v7, %v5720_v58 }
 0x318   :  { %v3392_v57 = vmax.f32 %v4288_v19, %v3264_v56  ;;  %v3165_v0 = vpop.f32.mrb[87].mxu1  ;;  %v5942_v24 = vmul.f32 %v5734_v30, %v3386_v60  ;;  %v3387_v31 = vmax.f32 %v5914_v10, %v5921_v54  ;;  %v3394_v50 = vmax.f32 %v4320_v46, %v3266_v18 }
 0x319   :  { %v3656_v13 = vadd.f32 %v3655_v22, %v3525_v37  ;;  %v3663_v23 = vadd.f32 %v5848_v59, %v5857_v36  ;;  %v3393_v29 = vmax.f32 %v4289_v17, %v3265_v14  ;;  %v4290_v61 = vadd.f32 %v2933_v63, %v5711_v44 }
 0x31a   :  { %v3562_v39 = vmul.f32 %v5724_v47, %v3392_v57  ;;  %v4322_v7 = vadd.f32 %v3159_v4, %v5717_v2  ;;  %v5952_v19 = vmul.f32 0.01, %v5939_v1  ;;  %v3533_v60 = vmul.f32 %v5743_v8, %v3363_v42 }
 0x31b   :  { %3657 = vadd.xlane.f32.xlu0 %v3656_v13  ;;  %v3664_v46 = vadd.f32 %v3663_v23, %v5854_v45  ;;  %v4291_v59 = vadd.f32 %v2935_v20, %v5714_v25  ;;  %v2943_v36 = vpop.f32.mrb[88].mxu0  ;;  %v5961_v57 = vmul.f32 %v5729_v49, %v3385_v40  ;;  %v3272_v17 = vmul.f32 0.01, %v4290_v61 }
 0x31c   :  { %v5964_v63 = vadd.f32 %v5652_v28, %v3562_v39  ;;  %v3274_v4 = vmul.f32 0.01, %v4322_v7  ;;  %v2945_v37 = vpop.f32.mrb[89].mxu0  ;;  %v5967_v22 = vmul.f32 %v5734_v30, %v3394_v50  ;;  %v5970_v42 = vadd.f32 %v3161_v62, %v5720_v58 }
 0x31d   :  { %v3665_v53 = vadd.f32 %v3664_v46, %v3533_v60  ;;  %v3273_v21 = vmul.f32 0.01, %v4291_v59  ;;  %v3169_v45 = vpop.f32.mrb[88].mxu1  ;;  %v2947_v20 = vpop.f32.mrb[90].mxu0  ;;  %v5973_v56 = vmul.f32 %v5729_v49, %v3393_v29  ;;  %v3400_v18 = vmax.f32 %v4290_v61, %v3272_v17 }
 0x31e   :  { %v3672_v28 = vadd.f32 %v5880_v38, %v5891_v51  ;;  %v4292_v14 = vadd.f32 %v2937_v11, %v5711_v44  ;;  %v3171_v40 = vpop.f32.mrb[89].mxu1  ;;  %v2949_v13 = vpop.f32.mrb[91].mxu0  ;;  %v3402_v50 = vmax.f32 %v4322_v7, %v3274_v4  ;;  %v4324_v39 = vadd.f32 %v3163_v15, %v5717_v2 }
 0x31f   :  { %3666 = vadd.xlane.f32.xlu1 %v3665_v53  ;;  %v3401_v23 = vmax.f32 %v4291_v59, %v3273_v21  ;;  %v4293_v62 = vadd.f32 %v2939_v52, %v5714_v25  ;;  %v3173_v60 = vpop.f32.mrb[90].mxu1  ;;  %v3570_v46 = vmul.f32 %v5724_v47, %v3400_v18  ;;  %v6265_v29 = vmax.f32 %v5851_v6, %v5868_v41 }
 0x320   :  { %v3673_v38 = vadd.f32 %v3672_v28, %v5883_v27  ;;  %v3280_v51 = vmul.f32 0.01, %v4292_v14  ;;  %v3175_v11 = vpop.f32.mrb[91].mxu1  ;;  %v3395_v7 = vmax.f32 %v5939_v1, %v5952_v19  ;;  %v5989_v59 = vmul.f32 0.01, %v5970_v42 }
 0x321   :  { %v3541_v61 = vmul.f32 %v5743_v8, %v6265_v29  ;;  %v3282_v15 = vmul.f32 0.01, %v4324_v39  ;;  %v3281_v52 = vmul.f32 0.01, %v4293_v62  ;;  %v5992_v17 = vadd.f32 %v5665_v16, %v3570_v46 }
 0x322   :  { %v3408_v53 = vmax.f32 %v4292_v14, %v3280_v51  ;;  %v5995_v6 = vadd.f32 %v3165_v0, %v5720_v58  ;;  %v5998_v41 = vmul.f32 %v5734_v30, %v3402_v50  ;;  %v6001_v27 = vmul.f32 %v5729_v49, %v3401_v23 }
 0x323   :  { %v3674_v4 = vadd.f32 %v3673_v38, %v3541_v61  ;;  %v3410_v21 = vmax.f32 %v4324_v39, %v3282_v15  ;;  %v3681_v18 = vadd.f32 %v5908_v26, %v5926_v5  ;;  %v2953_v28 = vpop.f32.mrb[92].mxu0  ;;  %v3409_v46 = vmax.f32 %v4293_v62, %v3281_v52 }
 0x324   :  { %v3578_v16 = vmul.f32 %v5724_v47, %v3408_v53  ;;  %v4294_v14 = vadd.f32 %v2943_v36, %v5711_v44  ;;  %v4326_v0 = vadd.f32 %v3169_v45, %v5717_v2  ;;  %v2955_v29 = vpop.f32.mrb[93].mxu0  ;;  %v6009_v50 = vmul.f32 0.01, %v5995_v6 }
 0x325   :  { %3675 = vadd.xlane.f32.xlu0 %v3674_v4  ;;  %v3549_v23 = vmul.f32 %v5743_v8, %v3379_v48  ;;  %v3682_v26 = vadd.f32 %v3681_v18, %v5911_v55  ;;  %v4295_v5 = vadd.f32 %v2945_v37, %v5714_v25  ;;  %v3179_v39 = vpop.f32.mrb[92].mxu1  ;;  %v2957_v61 = vpop.f32.mrb[94].mxu0  ;;  %v3403_v36 = vmax.f32 %v5970_v42, %v5989_v59 }
 0x326   :  { %v6020_v45 = vadd.f32 %v5676_v34, %v3578_v16  ;;  %v3288_v62 = vmul.f32 0.01, %v4294_v14  ;;  %v3290_v38 = vmul.f32 0.01, %v4326_v0  ;;  %v3181_v51 = vpop.f32.mrb[93].mxu1  ;;  %v2959_v15 = vpop.f32.mrb[95].mxu0  ;;  %v6023_v32 = vmul.f32 %v5734_v30, %v3410_v21 }
 0x327   :  { %v3683_v33 = vadd.f32 %v3682_v26, %v3549_v23  ;;  %v3289_v48 = vmul.f32 0.01, %v4295_v5  ;;  %v6026_v55 = vadd.f32 %v3171_v40, %v5720_v58  ;;  %v3183_v37 = vpop.f32.mrb[94].mxu1  ;;  %v6029_v52 = vmul.f32 %v5729_v49, %v3409_v46 }
 0x328   :  { %v3416_v42 = vmax.f32 %v4294_v14, %v3288_v62  ;;  %v3690_v34 = vadd.f32 %v5936_v35, %v5961_v57  ;;  %v4296_v59 = vadd.f32 %v2947_v20, %v5711_v44  ;;  %v3185_v4 = vpop.f32.mrb[95].mxu1  ;;  %v3418_v53 = vmax.f32 %v4326_v0, %v3290_v38 }
 0x329   :  { %3684 = vadd.xlane.f32.xlu1 %v3683_v33  ;;  %v3417_v21 = vmax.f32 %v4295_v5, %v3289_v48  ;;  %v4328_v18 = vadd.f32 %v3173_v60, %v5717_v2  ;;  %v4297_v16 = vadd.f32 %v2949_v13, %v5714_v25  ;;  %v3557_v46 = vmul.f32 %v5743_v8, %v3387_v31 }
 0x32a   :  { %v3586_v40 = vmul.f32 %v5724_v47, %v3416_v42  ;;  %v3691_v14 = vadd.f32 %v3690_v34, %v5942_v24  ;;  %v3296_v35 = vmul.f32 0.01, %v4296_v59  ;;  %v3411_v57 = vmax.f32 %v5995_v6, %v6009_v50 }
 0x32b   :  { %v3291_v20 = vmul.f32 0.01, %v6026_v55  ;;  %v3298_v0 = vmul.f32 0.01, %v4328_v18  ;;  %v3297_v23 = vmul.f32 0.01, %v4297_v16  ;;  %v6047_v5 = vadd.f32 %v3175_v11, %v5720_v58 }
 0x32c   :  { %v3725_v60 = vadd.f32 %v5684_v9, %v3586_v40  ;;  %v3692_v13 = vadd.f32 %v3691_v14, %v3557_v46  ;;  %v3424_v26 = vmax.f32 %v4296_v59, %v3296_v35  ;;  %v3588_v10 = vmul.f32 %v5734_v30, %v3418_v53 }
 0x32d   :  { %v3587_v54 = vmul.f32 %v5729_v49, %v3417_v21  ;;  %v3426_v24 = vmax.f32 %v4328_v18, %v3298_v0  ;;  %v3699_v31 = vadd.f32 %v5964_v63, %v5973_v56  ;;  %v3425_v50 = vmax.f32 %v4297_v16, %v3297_v23 }
 0x32e   :  { %3693 = vadd.xlane.f32.xlu0 %v3692_v13  ;;  %v3594_v6 = vmul.f32 %v5724_v47, %v3424_v26  ;;  %v4298_v62 = vadd.f32 %v2953_v28, %v5711_v44  ;;  %v4330_v9 = vadd.f32 %v3179_v39, %v5717_v2  ;;  %v3419_v38 = vmax.f32 %v6026_v55, %v3291_v20 }
 0x32f   :  { %v3565_v11 = vmul.f32 %v5743_v8, %v3395_v7  ;;  %v3700_v33 = vadd.f32 %v3699_v31, %v5967_v22  ;;  %v4299_v48 = vadd.f32 %v2955_v29, %v5714_v25  ;;  %v3596_v56 = vmul.f32 %v5734_v30, %v3426_v24 }
 0x330   :  { %v3734_v63 = vadd.f32 %v5694_v12, %v3594_v6  ;;  %v3299_v42 = vmul.f32 0.01, %v6047_v5  ;;  %v3304_v28 = vmul.f32 0.01, %v4298_v62  ;;  %v3306_v39 = vmul.f32 0.01, %v4330_v9 }
 0x331   :  { %v3701_v34 = vadd.f32 %v3700_v33, %v3565_v11  ;;  %v3305_v59 = vmul.f32 0.01, %v4299_v48  ;;  %v4331_v55 = vadd.f32 %v3181_v51, %v5720_v58  ;;  %v3595_v1 = vmul.f32 %v5729_v49, %v3425_v50 }
 0x332   :  { %v3432_v19 = vmax.f32 %v4298_v62, %v3304_v28  ;;  %v3708_v22 = vadd.f32 %v5992_v17, %v6001_v27  ;;  %v4300_v7 = vadd.f32 %v2957_v61, %v5711_v44  ;;  %v3573_v29 = vmul.f32 %v5743_v8, %v3403_v36 }
 0x333   :  { %3702 = vadd.xlane.f32.xlu1 %v3701_v34  ;;  %v3433_v12 = vmax.f32 %v4299_v48, %v3305_v59  ;;  %v4332_v53 = vadd.f32 %v3183_v37, %v5717_v2  ;;  %v4301_v21 = vadd.f32 %v2959_v15, %v5714_v25  ;;  %v3307_v16 = vmul.f32 0.01, %v4331_v55 }
 0x334   :  { %v3602_v18 = vmul.f32 %v5724_v47, %v3432_v19  ;;  %v3709_v51 = vadd.f32 %v3708_v22, %v5998_v41  ;;  %v3312_v40 = vmul.f32 0.01, %v4300_v7  ;;  %v3427_v46 = vmax.f32 %v6047_v5, %v3299_v42 }
 0x335   :  { %v3434_v14 = vmax.f32 %v4330_v9, %v3306_v39  ;;  %v3314_v17 = vmul.f32 0.01, %v4332_v53  ;;  %v3313_v27 = vmul.f32 0.01, %v4301_v21  ;;  %v4333_v36 = vadd.f32 %v3185_v4, %v5720_v58 }
 0x336   :  { %v3743_v44 = vadd.f32 %v5700_v43, %v3602_v18  ;;  %v3710_v61 = vadd.f32 %v3709_v51, %v3573_v29  ;;  %v3440_v35 = vmax.f32 %v4300_v7, %v3312_v40  ;;  %v3603_v2 = vmul.f32 %v5729_v49, %v3433_v12 }
 0x337   :  { %v3442_v25 = vmax.f32 %v4332_v53, %v3314_v17  ;;  %v3441_v15 = vmax.f32 %v4301_v21, %v3313_v27  ;;  %v3717_v37 = vadd.f32 %v6020_v45, %v6029_v52  ;;  %v3435_v41 = vmax.f32 %v4331_v55, %v3307_v16 }
 0x338   :  { %3711 = vadd.xlane.f32.xlu0 %v3710_v61  ;;  %v3610_v20 = vmul.f32 %v5724_v47, %v3440_v35  ;;  %v3315_v0 = vmul.f32 0.01, %v4333_v36  ;;  %v3726_v23 = vadd.f32 %v3725_v60, %v3587_v54  ;;  %v3581_v43 = vmul.f32 %v5743_v8, %v3411_v57 }
 0x339   :  { %v3611_v13 = vmul.f32 %v5729_v49, %v3441_v15  ;;  %v3718_v26 = vadd.f32 %v3717_v37, %v6023_v32  ;;  %v3589_v58 = vmul.f32 %v5743_v8, %v3419_v38  ;;  %v3735_v31 = vadd.f32 %v3734_v63, %v3595_v1 }
 0x33a   :  { %v3752_v4 = vadd.f32 %v5704_v3, %v3610_v20  ;;  %v3443_v5 = vmax.f32 %v4333_v36, %v3315_v0  ;;  %v3727_v24 = vadd.f32 %v3726_v23, %v3588_v10  ;;  %v3604_v45 = vmul.f32 %v5734_v30, %v3434_v14 }
 0x33b   :  { %v3612_v52 = vmul.f32 %v5734_v30, %v3442_v25  ;;  %v3719_v47 = vadd.f32 %v3718_v26, %v3581_v43  ;;  %v3744_v6 = vadd.f32 %v3743_v44, %v3603_v2  ;;  %v3597_v49 = vmul.f32 %v5743_v8, %v3427_v46  ;;  %v6093_v30 = vld [vmem:[#allocation2] ss:$0 sm:$0xff] }
 0x33c   :  { %v3728_v60 = vadd.f32 %v3727_v24, %v3589_v58  ;;  %v3736_v54 = vadd.f32 %v3735_v31, %v3596_v56  ;;  %v3753_v57 = vadd.f32 %v3752_v4, %v3611_v13  ;;  %v3605_v32 = vmul.f32 %v5743_v8, %v3435_v41 }
 0x33d   :  { %3720 = vadd.xlane.f32.xlu1 %v3719_v47  ;;  %v3745_v50 = vadd.f32 %v3744_v6, %v3604_v45  ;;  %v3613_v10 = vmul.f32 %v5743_v8, %v3443_v5 }
 0x33e   :  { %3729 = vadd.xlane.f32.xlu0 %v3728_v60  ;;  %v3737_v3 = vadd.f32 %v3736_v54, %v3597_v49  ;;  %v3754_v62 = vadd.f32 %v3753_v57, %v3612_v52 }
 0x33f   :  { %v3746_v9 = vadd.f32 %v3745_v50, %v3605_v32 }
 0x340   :  { %v3755_v38 = vadd.f32 %v3754_v62, %v3613_v10 }
 0x341   :  { %3738 = vadd.xlane.f32.xlu1 %v3737_v3 }
 0x342   :  { %3747 = vadd.xlane.f32.xlu0 %v3746_v9 }
 0x345   :  { %3756 = vadd.xlane.f32.xlu1 %v3755_v38 }
 0x38e   :  { %v3622_v11 = vpop.xlane.xlu0 %3621 }
 0x38f   :  { %v3765_v33 = vadd.f32 %v6093_v30, %v3622_v11 }
 0x391   :  { %v4190_v48 = vmul.f32 -1.442695, %v3765_v33 }
 0x393   :  { %4521 = vpow2.f32 %v4190_v48 }
 0x397   :  { %v3631_v63 = vpop.xlane.xlu0 %3630 }
 0x398   :  { %v3766_v56 = vadd.f32 %v6093_v30, %v3631_v63 }
 0x39a   :  { %v4191_v42 = vmul.f32 -1.442695, %v3766_v56 }
 0x39c   :  { %4523 = vpow2.f32 %v4191_v42 }
 0x39d   :  { %v4522_v28 = vpop.eup %4521 }
 0x39e   :  { %v3829_v34 = vadd.f32 1.0, %v4522_v28 }
 0x3a0   :  { %v3640_v8 = vpop.xlane.xlu1 %3639  ;;  %4525 = vrcp.f32 %v3829_v34 }
 0x3a1   :  { %v3767_v39 = vadd.f32 %v6093_v30, %v3640_v8 }
 0x3a3   :  { %v4192_v59 = vmul.f32 -1.442695, %v3767_v39 }
 0x3a4   :  { %v3649_v55 = vpop.xlane.xlu1 %3648 }
 0x3a5   :  { %4527 = vpow2.f32 %v4192_v59  ;;  %v3768_v1 = vadd.f32 %v6093_v30, %v3649_v55 }
 0x3a6   :  { %v4524_v22 = vpop.eup %4523 }
 0x3a7   :  { %v4193_v19 = vmul.f32 -1.442695, %v3768_v1  ;;  %v3830_v12 = vadd.f32 1.0, %v4524_v22 }
 0x3a8   :  { %v3658_v7 = vpop.xlane.xlu0 %3657 }
 0x3a9   :  { %4529 = vpow2.f32 %v4193_v19  ;;  %v3769_v29 = vadd.f32 %v6093_v30, %v3658_v7 }
 0x3aa   :  { %4531 = vrcp.f32 %v3830_v12  ;;  %v4526_v21 = vpop.eup %4525 }
 0x3ab   :  { %v4194_v53 = vmul.f32 -1.442695, %v3769_v29  ;;  %3878 = vst.msk [vmem:[%s6182_s7] sm:$0xff] %vm3877_vm0, %v4526_v21 }
 0x3ac   :  { %v3667_v18 = vpop.xlane.xlu1 %3666 }
 0x3ad   :  { %4533 = vpow2.f32 %v4194_v53  ;;  %v3770_v16 = vadd.f32 %v6093_v30, %v3667_v18 }
 0x3af   :  { %v4528_v51 = vpop.eup %4527  ;;  %v4195_v46 = vmul.f32 -1.442695, %v3770_v16 }
 0x3b0   :  { %v3831_v40 = vadd.f32 1.0, %v4528_v51 }
 0x3b2   :  { %4535 = vrcp.f32 %v3831_v40  ;;  %v3676_v14 = vpop.xlane.xlu0 %3675 }
 0x3b3   :  { %v4530_v17 = vpop.eup %4529  ;;  %4537 = vpow2.f32 %v4195_v46  ;;  %v3771_v27 = vadd.f32 %v6093_v30, %v3676_v14 }
 0x3b4   :  { %v3832_v44 = vadd.f32 1.0, %v4530_v17  ;;  %v4532_v61 = vpop.eup %4531 }
 0x3b5   :  { %v4196_v35 = vmul.f32 -1.442695, %v3771_v27  ;;  %3879 = vst.msk [vmem:[%s6182_s7 + $0x8] sm:$0xff] %vm3877_vm0, %v4532_v61 }
 0x3b6   :  { %4539 = vrcp.f32 %v3832_v44  ;;  %v3685_v2 = vpop.xlane.xlu1 %3684 }
 0x3b7   :  { %v4534_v36 = vpop.eup %4533  ;;  %4541 = vpow2.f32 %v4196_v35  ;;  %v3772_v15 = vadd.f32 %v6093_v30, %v3685_v2 }
 0x3b8   :  { %v3833_v25 = vadd.f32 1.0, %v4534_v36 }
 0x3b9   :  { %v4197_v37 = vmul.f32 -1.442695, %v3772_v15 }
 0x3ba   :  { %4543 = vrcp.f32 %v3833_v25 }
 0x3bb   :  { %4545 = vpow2.f32 %v4197_v37  ;;  %v3694_v20 = vpop.xlane.xlu0 %3693 }
 0x3bc   :  { %v4536_v41 = vpop.eup %4535  ;;  %v3773_v23 = vadd.f32 %v6093_v30, %v3694_v20 }
 0x3bd   :  { %v4538_v0 = vpop.eup %4537  ;;  %3880 = vst.msk [vmem:[%s6182_s7 + $0x10] sm:$0xff] %vm3877_vm0, %v4536_v41 }
 0x3be   :  { %v3834_v13 = vadd.f32 1.0, %v4538_v0  ;;  %v4198_v43 = vmul.f32 -1.442695, %v3773_v23 }
 0x3c0   :  { %v4540_v26 = vpop.eup %4539  ;;  %4547 = vrcp.f32 %v3834_v13  ;;  %v3703_v4 = vpop.xlane.xlu1 %3702 }
 0x3c1   :  { %v4542_v58 = vpop.eup %4541  ;;  %3881 = vst.msk [vmem:[%s6182_s7 + $0x18] sm:$0xff] %vm3877_vm0, %v4540_v26  ;;  %4549 = vpow2.f32 %v4198_v43  ;;  %v3774_v24 = vadd.f32 %v6093_v30, %v3703_v4 }
 0x3c2   :  { %v3835_v5 = vadd.f32 1.0, %v4542_v58 }
 0x3c3   :  { %v4199_v45 = vmul.f32 -1.442695, %v3774_v24 }
 0x3c4   :  { %v4544_v31 = vpop.eup %4543  ;;  %4551 = vrcp.f32 %v3835_v5 }
 0x3c5   :  { %3882 = vst.msk [vmem:[%s6182_s7 + $0x20] sm:$0xff] %vm3877_vm0, %v4544_v31  ;;  %v4546_v52 = vpop.eup %4545  ;;  %4553 = vpow2.f32 %v4199_v45  ;;  %v3712_v47 = vpop.xlane.xlu0 %3711 }
 0x3c6   :  { %v3836_v6 = vadd.f32 1.0, %v4546_v52  ;;  %v3775_v60 = vadd.f32 %v6093_v30, %v3712_v47 }
 0x3c8   :  { %4555 = vrcp.f32 %v3836_v6  ;;  %v4200_v49 = vmul.f32 -1.442695, %v3775_v60 }
 0x3ca   :  { %v4548_v54 = vpop.eup %4547  ;;  %4557 = vpow2.f32 %v4200_v49  ;;  %v3721_v32 = vpop.xlane.xlu1 %3720 }
 0x3cb   :  { %v4550_v57 = vpop.eup %4549  ;;  %3883 = vst.msk [vmem:[%s6182_s7 + $0x28] sm:$0xff] %vm3877_vm0, %v4548_v54  ;;  %v3776_v3 = vadd.f32 %v6093_v30, %v3721_v32  ;;  %v3730_v10 = vpop.xlane.xlu0 %3729 }
 0x3cc   :  { %v3837_v50 = vadd.f32 1.0, %v4550_v57  ;;  %v3777_v62 = vadd.f32 %v6093_v30, %v3730_v10 }
 0x3cd   :  { %v4201_v38 = vmul.f32 -1.442695, %v3776_v3 }
 0x3ce   :  { %v4552_v9 = vpop.eup %4551  ;;  %4559 = vrcp.f32 %v3837_v50  ;;  %v4202_v11 = vmul.f32 -1.442695, %v3777_v62  ;;  %v3739_v33 = vpop.xlane.xlu1 %3738 }
 0x3cf   :  { %3884 = vst.msk [vmem:[%s6182_s7 + $0x30] sm:$0xff] %vm3877_vm0, %v4552_v9  ;;  %v4554_v48 = vpop.eup %4553  ;;  %4561 = vpow2.f32 %v4201_v38  ;;  %v3778_v63 = vadd.f32 %v6093_v30, %v3739_v33  ;;  %v3748_v56 = vpop.xlane.xlu0 %3747 }
 0x3d0   :  { %v3838_v42 = vadd.f32 1.0, %v4554_v48  ;;  %4563 = vpow2.f32 %v4202_v11  ;;  %v3779_v28 = vadd.f32 %v6093_v30, %v3748_v56 }
 0x3d1   :  { %v4203_v8 = vmul.f32 -1.442695, %v3778_v63 }
 0x3d2   :  { %v4556_v34 = vpop.eup %4555  ;;  %4565 = vrcp.f32 %v3838_v42  ;;  %v4204_v39 = vmul.f32 -1.442695, %v3779_v28  ;;  %v3757_v59 = vpop.xlane.xlu1 %3756 }
 0x3d3   :  { %3885 = vst.msk [vmem:[%s6182_s7 + $0x38] sm:$0xff] %vm3877_vm0, %v4556_v34  ;;  %4567 = vpow2.f32 %v4203_v8  ;;  %v3780_v55 = vadd.f32 %v6093_v30, %v3757_v59 }
 0x3d4   :  { %v4558_v1 = vpop.eup %4557  ;;  %4569 = vpow2.f32 %v4204_v39 }
 0x3d5   :  { %v3839_v19 = vadd.f32 1.0, %v4558_v1  ;;  %v4205_v22 = vmul.f32 -1.442695, %v3780_v55 }
 0x3d7   :  { %4571 = vrcp.f32 %v3839_v19 }
 0x3d8   :  { %v4560_v7 = vpop.eup %4559  ;;  %4573 = vpow2.f32 %v4205_v22 }
 0x3d9   :  { %3886 = vst.msk [vmem:[%s6182_s7 + $0x40] sm:$0xff] %vm3877_vm0, %v4560_v7  ;;  %v4562_v12 = vpop.eup %4561 }
 0x3da   :  { %v4564_v29 = vpop.eup %4563  ;;  %v3840_v53 = vadd.f32 1.0, %v4562_v12 }
 0x3db   :  { %v3841_v21 = vadd.f32 1.0, %v4564_v29 }
 0x3dc   :  { %v4566_v18 = vpop.eup %4565  ;;  %4575 = vrcp.f32 %v3840_v53 }
 0x3dd   :  { %v4568_v16 = vpop.eup %4567  ;;  %3887 = vst.msk [vmem:[%s6182_s7 + $0x48] sm:$0xff] %vm3877_vm0, %v4566_v18  ;;  %4577 = vrcp.f32 %v3841_v21 }
 0x3de   :  { %v4570_v30 = vpop.eup %4569  ;;  %v3842_v51 = vadd.f32 1.0, %v4568_v16 }
 0x3df   :  { %v3843_v40 = vadd.f32 1.0, %v4570_v30 }
 0x3e0   :  { %4579 = vrcp.f32 %v3842_v51 }
 0x3e1   :  { %v4572_v46 = vpop.eup %4571  ;;  %4581 = vrcp.f32 %v3843_v40 }
 0x3e2   :  { %v4574_v14 = vpop.eup %4573  ;;  %3888 = vst.msk [vmem:[%s6182_s7 + $0x50] sm:$0xff] %vm3877_vm0, %v4572_v46 }
 0x3e3   :  { %v3844_v17 = vadd.f32 1.0, %v4574_v14 }
 0x3e5   :  { %4583 = vrcp.f32 %v3844_v17 }
 0x3e6   :  { %v4576_v27 = vpop.eup %4575 }
 0x3e7   :  { %v4578_v44 = vpop.eup %4577  ;;  %3889 = vst.msk [vmem:[%s6182_s7 + $0x58] sm:$0xff] %vm3877_vm0, %v4576_v27 }
 0x3e8   :  { %3890 = vst.msk [vmem:[%s6182_s7 + $0x60] sm:$0xff] %vm3877_vm0, %v4578_v44 }
 0x3ea   :  { %v4580_v61 = vpop.eup %4579 }
 0x3eb   :  { %v4582_v35 = vpop.eup %4581  ;;  %3891 = vst.msk [vmem:[%s6182_s7 + $0x68] sm:$0xff] %vm3877_vm0, %v4580_v61 }
 0x3ec   :  { %3892 = vst.msk [vmem:[%s6182_s7 + $0x70] sm:$0xff] %vm3877_vm0, %v4582_v35 }
 0x3ef   :  { %v4584_v36 = vpop.eup %4583 }
 0x3f0   :  { %3893 = vst.msk [vmem:[%s6182_s7 + $0x78] sm:$0xff] %vm3877_vm0, %v4584_v36 }
 0x3f1   :  { %3898 = vsyncpa [#allocation4], 1 }
 0x3f2   :  { %3899 = vsyncpa [#allocation6], 1 }
 0x3f3   :  { %3900 = vsyncpa [#allocation9], 1 }

</bundles_post_ra>
